<compile_context>
chip_gen: v7x
topology: tpu7x:2x2x1
jax: 0.10.0
libtpu: 0.0.40
codegen_flags: <defaults>
</compile_context>

<pallas_src>
import numpy as np
import jax
import jax.numpy as jnp
from jax.experimental import pallas as pl
from jax.experimental.pallas import tpu as pltpu


# ------------------------------ fused Pallas kernel ------------------------------

def _fused_autoencoder_kernel(
    x_ref,
    s1_ref, b1_ref, bias1_ref, r1_ref, t1_ref,
    s2_ref, b2_ref, bias2_ref, r2_ref, t2_ref,
    s3_ref, b3_ref, bias3_ref, r3_ref, t3_ref,
    e1_ref, c1_ref, tbias1_ref,
    e2_ref, c2_ref, tbias2_ref,
    e3_ref, c3_ref, tbias3_ref,
    out_ref,
):
    f32 = jnp.float32

    def conv3x3_relu(x, s_ref, b_ref, bias_ref):
        # x: (N*H, W*Cin) f32 ; B_ky bf16 banded ; S_ky f32 0/1 row shift (ky=0 and ky=2).
        xb = x.astype(jnp.bfloat16)
        y0 = jnp.dot(xb, b_ref[0], preferred_element_type=f32)   # ky = 0 (dy = -1)
        y1 = jnp.dot(xb, b_ref[1], preferred_element_type=f32)   # ky = 1 (dy =  0)
        y2 = jnp.dot(xb, b_ref[2], preferred_element_type=f32)   # ky = 2 (dy = +1)
        acc = y1
        acc = acc + jnp.dot(s_ref[0], y0, preferred_element_type=f32)
        acc = acc + jnp.dot(s_ref[1], y2, preferred_element_type=f32)
        return jnp.maximum(acc + bias_ref[...], 0.0)

    def maxpool2x2(x, r_ref, t_ref):
        # row pairwise max via 0/1 selection matmuls, then column pairwise max.
        rows = jnp.maximum(jnp.dot(r_ref[0], x, preferred_element_type=f32),
                           jnp.dot(r_ref[1], x, preferred_element_type=f32))
        return jnp.maximum(jnp.dot(rows, t_ref[0], preferred_element_type=f32),
                           jnp.dot(rows, t_ref[1], preferred_element_type=f32))

    def tconv2x2_relu(x, e_ref, c_ref, bias_ref):
        # x: (N*H, W*Cin); C_dy folds the dx interleave, E_dy the dy interleave.
        xb = x.astype(jnp.bfloat16)
        y0 = jnp.dot(xb, c_ref[0], preferred_element_type=f32)
        y1 = jnp.dot(xb, c_ref[1], preferred_element_type=f32)
        out = (jnp.dot(e_ref[0], y0, preferred_element_type=f32)
               + jnp.dot(e_ref[1], y1, preferred_element_type=f32))
        return jnp.maximum(out + bias_ref[...], 0.0)

    x = x_ref[...]                                            # (N*16, 16)      rows=(n,h), cols=(w,c)
    x = conv3x3_relu(x, s1_ref, b1_ref, bias1_ref)            # (N*16, 16*16)
    x = maxpool2x2(x, r1_ref, t1_ref)                         # (N*8,  8*16)
    x = conv3x3_relu(x, s2_ref, b2_ref, bias2_ref)            # (N*8,  8*64)
    x = maxpool2x2(x, r2_ref, t2_ref)                         # (N*4,  4*64)
    x = conv3x3_relu(x, s3_ref, b3_ref, bias3_ref)            # (N*4,  4*128)
    x = maxpool2x2(x, r3_ref, t3_ref)                         # (N*2,  2*128)
    x = tconv2x2_relu(x, e1_ref, c1_ref, tbias1_ref)          # (N*4,  4*64)
    x = tconv2x2_relu(x, e2_ref, c2_ref, tbias2_ref)          # (N*8,  8*16)
    x = tconv2x2_relu(x, e3_ref, c3_ref, tbias3_ref)          # (N*16, 16*1)
    out_ref[...] = x


# ------------------------- one-time parameter preparation -------------------------

def prepare_params(params, N, H, W):
    """Build the constant matrices the fused kernel consumes (done once, outside the fwd)."""
    f32 = np.float32

    def conv_row_shift(n, h):
        # index 0 <-> ky=0 (reads row h-1), index 1 <-> ky=2 (reads row h+1); zero rows = padding.
        S = np.zeros((2, n * h, n * h), f32)
        for b in range(n):
            for i in range(h):
                if i - 1 >= 0:
                    S[0, b * h + i, b * h + i - 1] = 1.0
                if i + 1 < h:
                    S[1, b * h + i, b * h + i + 1] = 1.0
        return jnp.asarray(S)

    def conv_band(w, wd):
        # w: (Cout, Cin, 3, 3) torch layout.  B[ky, win*Cin+ci, wout*Cout+co] = w[co,ci,ky,kx]
        # where win = wout + kx - 1 (boundary entries absent => zero padding in W).
        cout, cin = int(w.shape[0]), int(w.shape[1])
        w4 = jnp.transpose(w, (2, 3, 1, 0))                     # (ky, kx, Cin, Cout)
        D = np.zeros((3, wd, wd), f32)
        for kx in range(3):
            for wo in range(wd):
                wi = wo + kx - 1
                if 0 <= wi < wd:
                    D[kx, wi, wo] = 1.0
        B = jnp.einsum('xab,yxcd->yacbd', jnp.asarray(D), w4)   # (ky, win, Cin, wout, Cout)
        return B.reshape(3, wd * cin, wd * cout).astype(jnp.bfloat16)

    def pool_mats(n, h, wd, c):
        R = np.zeros((2, n * (h // 2), n * h), f32)             # even / odd row selectors
        for b in range(n):
            for i in range(h // 2):
                R[0, b * (h // 2) + i, b * h + 2 * i] = 1.0
                R[1, b * (h // 2) + i, b * h + 2 * i + 1] = 1.0
        T = np.zeros((2, wd * c, (wd // 2) * c), f32)           # even / odd column-block selectors
        for j in range(wd // 2):
            for cc in range(c):
                T[0, (2 * j) * c + cc, j * c + cc] = 1.0
                T[1, (2 * j + 1) * c + cc, j * c + cc] = 1.0
        return jnp.asarray(R), jnp.asarray(T)

    def tconv_mats(wt, n, h, wd):
        # wt: (Cin, Cout, 2, 2) torch layout.
        cin, cout = int(wt.shape[0]), int(wt.shape[1])
        G = np.zeros((2, wd, 2 * wd), f32)                      # G[dx, w, 2w+dx] = 1
        for j in range(wd):
            for dx in range(2):
                G[dx, j, 2 * j + dx] = 1.0
        C = jnp.einsum('xwv,coyx->ywcvo', jnp.asarray(G), wt)   # (dy, w, Cin, wout, Cout)
        C = C.reshape(2, wd * cin, 2 * wd * cout).astype(jnp.bfloat16)
        E = np.zeros((2, n * 2 * h, n * h), f32)                # E[dy, (n,2h+dy), (n,h)] = 1
        for b in range(n):
            for i in range(h):
                E[0, b * 2 * h + 2 * i, b * h + i] = 1.0
                E[1, b * 2 * h + 2 * i + 1, b * h + i] = 1.0
        return jnp.asarray(E), C

    def bias_row(b, reps):
        return jnp.tile(b, reps).reshape(1, -1).astype(jnp.float32)

    H1, W1 = H, W
    H2, W2 = H // 2, W // 2
    H3, W3 = H // 4, W // 4
    H4, W4 = H // 8, W // 8
    c1 = int(params['conv1_w'].shape[0])    # 16
    c2 = int(params['conv2_w'].shape[0])    # 64
    c3 = int(params['conv3_w'].shape[0])    # 128

    S1 = conv_row_shift(N, H1); B1 = conv_band(params['conv1_w'], W1); bias1 = bias_row(params['conv1_b'], W1)
    R1, T1 = pool_mats(N, H1, W1, c1)
    S2 = conv_row_shift(N, H2); B2 = conv_band(params['conv2_w'], W2); bias2 = bias_row(params['conv2_b'], W2)
    R2, T2 = pool_mats(N, H2, W2, c2)
    S3 = conv_row_shift(N, H3); B3 = conv_band(params['conv3_w'], W3); bias3 = bias_row(params['conv3_b'], W3)
    R3, T3 = pool_mats(N, H3, W3, c3)

    E1, C1 = tconv_mats(params['tconv1_w'], N, H4, W4); tb1 = bias_row(params['tconv1_b'], 2 * W4)
    E2, C2 = tconv_mats(params['tconv2_w'], N, H3, W3); tb2 = bias_row(params['tconv2_b'], 2 * W3)
    E3, C3 = tconv_mats(params['tconv3_w'], N, H2, W2); tb3 = bias_row(params['tconv3_b'], 2 * W2)

    return (S1, B1, bias1, R1, T1,
            S2, B2, bias2, R2, T2,
            S3, B3, bias3, R3, T3,
            E1, C1, tb1,
            E2, C2, tb2,
            E3, C3, tb3)


# ------------------------------------ forward ------------------------------------

def conv_autoencoder_forward(prep, x_nchw):
    """x_nchw: (N, 1, H, W) float32, H and W divisible by 8.  Returns (N, 1, H, W)."""
    N, C, H, W = x_nchw.shape
    x2d = x_nchw.reshape(N * H, W)                       # rows=(n,h), cols=(w, ci=0)
    vmem = pl.BlockSpec(memory_space=pltpu.MemorySpace.VMEM)
    out2d = pl.pallas_call(
        _fused_autoencoder_kernel,
        out_shape=jax.ShapeDtypeStruct((N * H, W), jnp.float32),
        in_specs=[vmem] * (1 + len(prep)),
        out_specs=vmem,
    )(x2d, *prep)
    return out2d.reshape(N, 1, H, W)


# ------------------------------- params & reference -------------------------------

def init_params(key):
    ks = jax.random.split(key, 12)
    def w(k, shape):
        fan_in = shape[1] * shape[2] * shape[3]   # init scale only (not part of fwd semantics)
        return jax.random.normal(k, shape, jnp.float32) * (1.0 / jnp.sqrt(fan_in))
    return dict(
        conv1_w=w(ks[0], (16, 1, 3, 3)),    conv1_b=0.01 * jax.random.normal(ks[1], (16,), jnp.float32),
        conv2_w=w(ks[2], (64, 16, 3, 3)),   conv2_b=0.01 * jax.random.normal(ks[3], (64,), jnp.float32),
        conv3_w=w(ks[4], (128, 64, 3, 3)),  conv3_b=0.01 * jax.random.normal(ks[5], (128,), jnp.float32),
        tconv1_w=w(ks[6], (128, 64, 2, 2)), tconv1_b=0.01 * jax.random.normal(ks[7], (64,), jnp.float32),
        tconv2_w=w(ks[8], (64, 16, 2, 2)),  tconv2_b=0.01 * jax.random.normal(ks[9], (16,), jnp.float32),
        tconv3_w=w(ks[10], (16, 1, 2, 2)),  tconv3_b=0.01 * jax.random.normal(ks[11], (1,), jnp.float32),
    )


def reference_forward(params, x):
    """Pure-JAX (XLA) reference matching the PyTorch module, used for self-validation."""
    def conv(x, w, b):
        y = jax.lax.conv_general_dilated(
            x, w, window_strides=(1, 1), padding=((1, 1), (1, 1)),
            dimension_numbers=('NCHW', 'OIHW', 'NCHW'))
        return jax.nn.relu(y + b[None, :, None, None])

    def pool(x):
        return jax.lax.reduce_window(x, -jnp.inf, jax.lax.max,
                                     (1, 1, 2, 2), (1, 1, 2, 2), 'VALID')

    def tconv(x, w, b):   # ConvTranspose2d(k=2, s=2): stride == kernel -> exact sub-pixel scatter
        n, cin, h, wd = x.shape
        cout = w.shape[1]
        y = jnp.einsum('nchw,cdyx->ndhywx', x, w).reshape(n, cout, 2 * h, 2 * wd)
        return jax.nn.relu(y + b[None, :, None, None])

    x = conv(x, params['conv1_w'], params['conv1_b']); x = pool(x)
    x = conv(x, params['conv2_w'], params['conv2_b']); x = pool(x)
    x = conv(x, params['conv3_w'], params['conv3_b']); x = pool(x)
    x = tconv(x, params['tconv1_w'], params['tconv1_b'])
    x = tconv(x, params['tconv2_w'], params['tconv2_b'])
    x = tconv(x, params['tconv3_w'], params['tconv3_b'])
    return x


if __name__ == "__main__":
    key = jax.random.PRNGKey(0)
    pkey, xkey = jax.random.split(key)
    params = init_params(pkey)

    # PyTorch module expects single-channel images; spatial must be divisible by 8.
    x = jax.random.normal(xkey, (2, 1, 16, 16), jnp.float32)     # NCHW, like PyTorch

    prep = prepare_params(params, N=2, H=16, W=16)               # one-time weight re-layout
    fwd = jax.jit(conv_autoencoder_forward)
    out = fwd(prep, x)
    jax.block_until_ready(out)

    assert out.shape == (2, 1, 16, 16), out.shape
    assert out.dtype == jnp.float32
    assert bool(jnp.all(out >= 0.0))                              # final ReLU

    # self-check against a pure-JAX reference (loose tolerance: bf16 matmul operands).
    ref = reference_forward(params, x)
    err = float(jnp.max(jnp.abs(out - ref) / (jnp.abs(ref) + 1.0)))
    assert err < 5e-2, f"mismatch vs reference: {err}"

    print("KERNEL_OK")
</pallas_src>

<mosaic_0001>
module attributes {stable_mosaic.version = 11 : i64} {
  func.func @_fused_autoencoder_kernel(%arg0: memref<32x16xf32, #tpu.memory_space<vmem>>, %arg1: memref<2x32x32xf32, #tpu.memory_space<vmem>>, %arg2: memref<3x16x256xbf16, #tpu.memory_space<vmem>>, %arg3: memref<1x256xf32, #tpu.memory_space<vmem>>, %arg4: memref<2x16x32xf32, #tpu.memory_space<vmem>>, %arg5: memref<2x256x128xf32, #tpu.memory_space<vmem>>, %arg6: memref<2x16x16xf32, #tpu.memory_space<vmem>>, %arg7: memref<3x128x512xbf16, #tpu.memory_space<vmem>>, %arg8: memref<1x512xf32, #tpu.memory_space<vmem>>, %arg9: memref<2x8x16xf32, #tpu.memory_space<vmem>>, %arg10: memref<2x512x256xf32, #tpu.memory_space<vmem>>, %arg11: memref<2x8x8xf32, #tpu.memory_space<vmem>>, %arg12: memref<3x256x512xbf16, #tpu.memory_space<vmem>>, %arg13: memref<1x512xf32, #tpu.memory_space<vmem>>, %arg14: memref<2x4x8xf32, #tpu.memory_space<vmem>>, %arg15: memref<2x512x256xf32, #tpu.memory_space<vmem>>, %arg16: memref<2x8x4xf32, #tpu.memory_space<vmem>>, %arg17: memref<2x256x256xbf16, #tpu.memory_space<vmem>>, %arg18: memref<1x256xf32, #tpu.memory_space<vmem>>, %arg19: memref<2x16x8xf32, #tpu.memory_space<vmem>>, %arg20: memref<2x256x128xbf16, #tpu.memory_space<vmem>>, %arg21: memref<1x128xf32, #tpu.memory_space<vmem>>, %arg22: memref<2x32x16xf32, #tpu.memory_space<vmem>>, %arg23: memref<2x128x16xbf16, #tpu.memory_space<vmem>>, %arg24: memref<1x16xf32, #tpu.memory_space<vmem>>, %arg25: memref<32x16xf32, #tpu.memory_space<vmem>>) attributes {dimension_semantics = [], scalar_prefetch = 0 : i64, scratch_operands = 0 : i64, tpu.core_type = #tpu.core_type<tc>} {
    %c0 = arith.constant 0 : index
    %c0_0 = arith.constant 0 : index
    %0 = vector.load %arg0[%c0, %c0_0] : memref<32x16xf32, #tpu.memory_space<vmem>>, vector<32x16xf32>
    %1 = arith.truncf %0 : vector<32x16xf32> to vector<32x16xbf16>
    %c0_1 = arith.constant 0 : index
    %c0_2 = arith.constant 0 : index
    %c0_3 = arith.constant 0 : index
    %2 = vector.load %arg2[%c0_1, %c0_2, %c0_3] : memref<3x16x256xbf16, #tpu.memory_space<vmem>>, vector<1x16x256xbf16>
    %3 = vector.shape_cast %2 : vector<1x16x256xbf16> to vector<16x256xbf16>
    %cst = arith.constant dense<0.000000e+00> : vector<32x256xf32>
    %4 = tpu.matmul %1, %3, %cst {dimension_numbers = #tpu.dot_dimension_numbers<[1], [0], [0], [1], [0, 0, 1, 1], [], []>} : vector<32x16xbf16>, vector<16x256xbf16>, vector<32x256xf32> -> vector<32x256xf32>
    %c1 = arith.constant 1 : index
    %c0_4 = arith.constant 0 : index
    %c0_5 = arith.constant 0 : index
    %5 = vector.load %arg2[%c1, %c0_4, %c0_5] : memref<3x16x256xbf16, #tpu.memory_space<vmem>>, vector<1x16x256xbf16>
    %6 = vector.shape_cast %5 : vector<1x16x256xbf16> to vector<16x256xbf16>
    %cst_6 = arith.constant dense<0.000000e+00> : vector<32x256xf32>
    %7 = tpu.matmul %1, %6, %cst_6 {dimension_numbers = #tpu.dot_dimension_numbers<[1], [0], [0], [1], [0, 0, 1, 1], [], []>} : vector<32x16xbf16>, vector<16x256xbf16>, vector<32x256xf32> -> vector<32x256xf32>
    %c2 = arith.constant 2 : index
    %c0_7 = arith.constant 0 : index
    %c0_8 = arith.constant 0 : index
    %8 = vector.load %arg2[%c2, %c0_7, %c0_8] : memref<3x16x256xbf16, #tpu.memory_space<vmem>>, vector<1x16x256xbf16>
    %9 = vector.shape_cast %8 : vector<1x16x256xbf16> to vector<16x256xbf16>
    %cst_9 = arith.constant dense<0.000000e+00> : vector<32x256xf32>
    %10 = tpu.matmul %1, %9, %cst_9 {dimension_numbers = #tpu.dot_dimension_numbers<[1], [0], [0], [1], [0, 0, 1, 1], [], []>} : vector<32x16xbf16>, vector<16x256xbf16>, vector<32x256xf32> -> vector<32x256xf32>
    %c0_10 = arith.constant 0 : index
    %c0_11 = arith.constant 0 : index
    %c0_12 = arith.constant 0 : index
    %11 = vector.load %arg1[%c0_10, %c0_11, %c0_12] : memref<2x32x32xf32, #tpu.memory_space<vmem>>, vector<1x32x32xf32>
    %12 = vector.shape_cast %11 : vector<1x32x32xf32> to vector<32x32xf32>
    %cst_13 = arith.constant dense<0.000000e+00> : vector<32x256xf32>
    %13 = tpu.matmul %12, %4, %cst_13 {dimension_numbers = #tpu.dot_dimension_numbers<[1], [0], [0], [1], [0, 0, 1, 1], [], []>} : vector<32x32xf32>, vector<32x256xf32>, vector<32x256xf32> -> vector<32x256xf32>
    %14 = arith.addf %7, %13 : vector<32x256xf32>
    %c1_14 = arith.constant 1 : index
    %c0_15 = arith.constant 0 : index
    %c0_16 = arith.constant 0 : index
    %15 = vector.load %arg1[%c1_14, %c0_15, %c0_16] : memref<2x32x32xf32, #tpu.memory_space<vmem>>, vector<1x32x32xf32>
    %16 = vector.shape_cast %15 : vector<1x32x32xf32> to vector<32x32xf32>
    %cst_17 = arith.constant dense<0.000000e+00> : vector<32x256xf32>
    %17 = tpu.matmul %16, %10, %cst_17 {dimension_numbers = #tpu.dot_dimension_numbers<[1], [0], [0], [1], [0, 0, 1, 1], [], []>} : vector<32x32xf32>, vector<32x256xf32>, vector<32x256xf32> -> vector<32x256xf32>
    %18 = arith.addf %14, %17 : vector<32x256xf32>
    %c0_18 = arith.constant 0 : index
    %c0_19 = arith.constant 0 : index
    %19 = vector.load %arg3[%c0_18, %c0_19] : memref<1x256xf32, #tpu.memory_space<vmem>>, vector<1x256xf32>
    %20 = vector.broadcast %19 : vector<1x256xf32> to vector<32x256xf32>
    %21 = arith.addf %18, %20 : vector<32x256xf32>
    %cst_20 = arith.constant 0.000000e+00 : f32
    %22 = vector.broadcast %cst_20 : f32 to vector<32x256xf32>
    %23 = arith.maximumf %21, %22 : vector<32x256xf32>
    %c0_21 = arith.constant 0 : index
    %c0_22 = arith.constant 0 : index
    %c0_23 = arith.constant 0 : index
    %24 = vector.load %arg4[%c0_21, %c0_22, %c0_23] : memref<2x16x32xf32, #tpu.memory_space<vmem>>, vector<1x16x32xf32>
    %25 = vector.shape_cast %24 : vector<1x16x32xf32> to vector<16x32xf32>
    %cst_24 = arith.constant dense<0.000000e+00> : vector<16x256xf32>
    %26 = tpu.matmul %25, %23, %cst_24 {dimension_numbers = #tpu.dot_dimension_numbers<[1], [0], [0], [1], [0, 0, 1, 1], [], []>} : vector<16x32xf32>, vector<32x256xf32>, vector<16x256xf32> -> vector<16x256xf32>
    %c1_25 = arith.constant 1 : index
    %c0_26 = arith.constant 0 : index
    %c0_27 = arith.constant 0 : index
    %27 = vector.load %arg4[%c1_25, %c0_26, %c0_27] : memref<2x16x32xf32, #tpu.memory_space<vmem>>, vector<1x16x32xf32>
    %28 = vector.shape_cast %27 : vector<1x16x32xf32> to vector<16x32xf32>
    %cst_28 = arith.constant dense<0.000000e+00> : vector<16x256xf32>
    %29 = tpu.matmul %28, %23, %cst_28 {dimension_numbers = #tpu.dot_dimension_numbers<[1], [0], [0], [1], [0, 0, 1, 1], [], []>} : vector<16x32xf32>, vector<32x256xf32>, vector<16x256xf32> -> vector<16x256xf32>
    %30 = arith.maximumf %26, %29 : vector<16x256xf32>
    %c0_29 = arith.constant 0 : index
    %c0_30 = arith.constant 0 : index
    %c0_31 = arith.constant 0 : index
    %31 = vector.load %arg5[%c0_29, %c0_30, %c0_31] : memref<2x256x128xf32, #tpu.memory_space<vmem>>, vector<1x256x128xf32>
    %32 = vector.shape_cast %31 : vector<1x256x128xf32> to vector<256x128xf32>
    %cst_32 = arith.constant dense<0.000000e+00> : vector<16x128xf32>
    %33 = tpu.matmul %30, %32, %cst_32 {dimension_numbers = #tpu.dot_dimension_numbers<[1], [0], [0], [1], [0, 0, 1, 1], [], []>} : vector<16x256xf32>, vector<256x128xf32>, vector<16x128xf32> -> vector<16x128xf32>
    %c1_33 = arith.constant 1 : index
    %c0_34 = arith.constant 0 : index
    %c0_35 = arith.constant 0 : index
    %34 = vector.load %arg5[%c1_33, %c0_34, %c0_35] : memref<2x256x128xf32, #tpu.memory_space<vmem>>, vector<1x256x128xf32>
    %35 = vector.shape_cast %34 : vector<1x256x128xf32> to vector<256x128xf32>
    %cst_36 = arith.constant dense<0.000000e+00> : vector<16x128xf32>
    %36 = tpu.matmul %30, %35, %cst_36 {dimension_numbers = #tpu.dot_dimension_numbers<[1], [0], [0], [1], [0, 0, 1, 1], [], []>} : vector<16x256xf32>, vector<256x128xf32>, vector<16x128xf32> -> vector<16x128xf32>
    %37 = arith.maximumf %33, %36 : vector<16x128xf32>
    %38 = arith.truncf %37 : vector<16x128xf32> to vector<16x128xbf16>
    %c0_37 = arith.constant 0 : index
    %c0_38 = arith.constant 0 : index
    %c0_39 = arith.constant 0 : index
    %39 = vector.load %arg7[%c0_37, %c0_38, %c0_39] : memref<3x128x512xbf16, #tpu.memory_space<vmem>>, vector<1x128x512xbf16>
    %40 = vector.shape_cast %39 : vector<1x128x512xbf16> to vector<128x512xbf16>
    %cst_40 = arith.constant dense<0.000000e+00> : vector<16x512xf32>
    %41 = tpu.matmul %38, %40, %cst_40 {dimension_numbers = #tpu.dot_dimension_numbers<[1], [0], [0], [1], [0, 0, 1, 1], [], []>} : vector<16x128xbf16>, vector<128x512xbf16>, vector<16x512xf32> -> vector<16x512xf32>
    %c1_41 = arith.constant 1 : index
    %c0_42 = arith.constant 0 : index
    %c0_43 = arith.constant 0 : index
    %42 = vector.load %arg7[%c1_41, %c0_42, %c0_43] : memref<3x128x512xbf16, #tpu.memory_space<vmem>>, vector<1x128x512xbf16>
    %43 = vector.shape_cast %42 : vector<1x128x512xbf16> to vector<128x512xbf16>
    %cst_44 = arith.constant dense<0.000000e+00> : vector<16x512xf32>
    %44 = tpu.matmul %38, %43, %cst_44 {dimension_numbers = #tpu.dot_dimension_numbers<[1], [0], [0], [1], [0, 0, 1, 1], [], []>} : vector<16x128xbf16>, vector<128x512xbf16>, vector<16x512xf32> -> vector<16x512xf32>
    %c2_45 = arith.constant 2 : index
    %c0_46 = arith.constant 0 : index
    %c0_47 = arith.constant 0 : index
    %45 = vector.load %arg7[%c2_45, %c0_46, %c0_47] : memref<3x128x512xbf16, #tpu.memory_space<vmem>>, vector<1x128x512xbf16>
    %46 = vector.shape_cast %45 : vector<1x128x512xbf16> to vector<128x512xbf16>
    %cst_48 = arith.constant dense<0.000000e+00> : vector<16x512xf32>
    %47 = tpu.matmul %38, %46, %cst_48 {dimension_numbers = #tpu.dot_dimension_numbers<[1], [0], [0], [1], [0, 0, 1, 1], [], []>} : vector<16x128xbf16>, vector<128x512xbf16>, vector<16x512xf32> -> vector<16x512xf32>
    %c0_49 = arith.constant 0 : index
    %c0_50 = arith.constant 0 : index
    %c0_51 = arith.constant 0 : index
    %48 = vector.load %arg6[%c0_49, %c0_50, %c0_51] : memref<2x16x16xf32, #tpu.memory_space<vmem>>, vector<1x16x16xf32>
    %49 = vector.shape_cast %48 : vector<1x16x16xf32> to vector<16x16xf32>
    %cst_52 = arith.constant dense<0.000000e+00> : vector<16x512xf32>
    %50 = tpu.matmul %49, %41, %cst_52 {dimension_numbers = #tpu.dot_dimension_numbers<[1], [0], [0], [1], [0, 0, 1, 1], [], []>} : vector<16x16xf32>, vector<16x512xf32>, vector<16x512xf32> -> vector<16x512xf32>
    %51 = arith.addf %44, %50 : vector<16x512xf32>
    %c1_53 = arith.constant 1 : index
    %c0_54 = arith.constant 0 : index
    %c0_55 = arith.constant 0 : index
    %52 = vector.load %arg6[%c1_53, %c0_54, %c0_55] : memref<2x16x16xf32, #tpu.memory_space<vmem>>, vector<1x16x16xf32>
    %53 = vector.shape_cast %52 : vector<1x16x16xf32> to vector<16x16xf32>
    %cst_56 = arith.constant dense<0.000000e+00> : vector<16x512xf32>
    %54 = tpu.matmul %53, %47, %cst_56 {dimension_numbers = #tpu.dot_dimension_numbers<[1], [0], [0], [1], [0, 0, 1, 1], [], []>} : vector<16x16xf32>, vector<16x512xf32>, vector<16x512xf32> -> vector<16x512xf32>
    %55 = arith.addf %51, %54 : vector<16x512xf32>
    %c0_57 = arith.constant 0 : index
    %c0_58 = arith.constant 0 : index
    %56 = vector.load %arg8[%c0_57, %c0_58] : memref<1x512xf32, #tpu.memory_space<vmem>>, vector<1x512xf32>
    %57 = vector.broadcast %56 : vector<1x512xf32> to vector<16x512xf32>
    %58 = arith.addf %55, %57 : vector<16x512xf32>
    %cst_59 = arith.constant 0.000000e+00 : f32
    %59 = vector.broadcast %cst_59 : f32 to vector<16x512xf32>
    %60 = arith.maximumf %58, %59 : vector<16x512xf32>
    %c0_60 = arith.constant 0 : index
    %c0_61 = arith.constant 0 : index
    %c0_62 = arith.constant 0 : index
    %61 = vector.load %arg9[%c0_60, %c0_61, %c0_62] : memref<2x8x16xf32, #tpu.memory_space<vmem>>, vector<1x8x16xf32>
    %62 = vector.shape_cast %61 : vector<1x8x16xf32> to vector<8x16xf32>
    %cst_63 = arith.constant dense<0.000000e+00> : vector<8x512xf32>
    %63 = tpu.matmul %62, %60, %cst_63 {dimension_numbers = #tpu.dot_dimension_numbers<[1], [0], [0], [1], [0, 0, 1, 1], [], []>} : vector<8x16xf32>, vector<16x512xf32>, vector<8x512xf32> -> vector<8x512xf32>
    %c1_64 = arith.constant 1 : index
    %c0_65 = arith.constant 0 : index
    %c0_66 = arith.constant 0 : index
    %64 = vector.load %arg9[%c1_64, %c0_65, %c0_66] : memref<2x8x16xf32, #tpu.memory_space<vmem>>, vector<1x8x16xf32>
    %65 = vector.shape_cast %64 : vector<1x8x16xf32> to vector<8x16xf32>
    %cst_67 = arith.constant dense<0.000000e+00> : vector<8x512xf32>
    %66 = tpu.matmul %65, %60, %cst_67 {dimension_numbers = #tpu.dot_dimension_numbers<[1], [0], [0], [1], [0, 0, 1, 1], [], []>} : vector<8x16xf32>, vector<16x512xf32>, vector<8x512xf32> -> vector<8x512xf32>
    %67 = arith.maximumf %63, %66 : vector<8x512xf32>
    %c0_68 = arith.constant 0 : index
    %c0_69 = arith.constant 0 : index
    %c0_70 = arith.constant 0 : index
    %68 = vector.load %arg10[%c0_68, %c0_69, %c0_70] : memref<2x512x256xf32, #tpu.memory_space<vmem>>, vector<1x512x256xf32>
    %69 = vector.shape_cast %68 : vector<1x512x256xf32> to vector<512x256xf32>
    %cst_71 = arith.constant dense<0.000000e+00> : vector<8x256xf32>
    %70 = tpu.matmul %67, %69, %cst_71 {dimension_numbers = #tpu.dot_dimension_numbers<[1], [0], [0], [1], [0, 0, 1, 1], [], []>} : vector<8x512xf32>, vector<512x256xf32>, vector<8x256xf32> -> vector<8x256xf32>
    %c1_72 = arith.constant 1 : index
    %c0_73 = arith.constant 0 : index
    %c0_74 = arith.constant 0 : index
    %71 = vector.load %arg10[%c1_72, %c0_73, %c0_74] : memref<2x512x256xf32, #tpu.memory_space<vmem>>, vector<1x512x256xf32>
    %72 = vector.shape_cast %71 : vector<1x512x256xf32> to vector<512x256xf32>
    %cst_75 = arith.constant dense<0.000000e+00> : vector<8x256xf32>
    %73 = tpu.matmul %67, %72, %cst_75 {dimension_numbers = #tpu.dot_dimension_numbers<[1], [0], [0], [1], [0, 0, 1, 1], [], []>} : vector<8x512xf32>, vector<512x256xf32>, vector<8x256xf32> -> vector<8x256xf32>
    %74 = arith.maximumf %70, %73 : vector<8x256xf32>
    %75 = arith.truncf %74 : vector<8x256xf32> to vector<8x256xbf16>
    %c0_76 = arith.constant 0 : index
    %c0_77 = arith.constant 0 : index
    %c0_78 = arith.constant 0 : index
    %76 = vector.load %arg12[%c0_76, %c0_77, %c0_78] : memref<3x256x512xbf16, #tpu.memory_space<vmem>>, vector<1x256x512xbf16>
    %77 = vector.shape_cast %76 : vector<1x256x512xbf16> to vector<256x512xbf16>
    %cst_79 = arith.constant dense<0.000000e+00> : vector<8x512xf32>
    %78 = tpu.matmul %75, %77, %cst_79 {dimension_numbers = #tpu.dot_dimension_numbers<[1], [0], [0], [1], [0, 0, 1, 1], [], []>} : vector<8x256xbf16>, vector<256x512xbf16>, vector<8x512xf32> -> vector<8x512xf32>
    %c1_80 = arith.constant 1 : index
    %c0_81 = arith.constant 0 : index
    %c0_82 = arith.constant 0 : index
    %79 = vector.load %arg12[%c1_80, %c0_81, %c0_82] : memref<3x256x512xbf16, #tpu.memory_space<vmem>>, vector<1x256x512xbf16>
    %80 = vector.shape_cast %79 : vector<1x256x512xbf16> to vector<256x512xbf16>
    %cst_83 = arith.constant dense<0.000000e+00> : vector<8x512xf32>
    %81 = tpu.matmul %75, %80, %cst_83 {dimension_numbers = #tpu.dot_dimension_numbers<[1], [0], [0], [1], [0, 0, 1, 1], [], []>} : vector<8x256xbf16>, vector<256x512xbf16>, vector<8x512xf32> -> vector<8x512xf32>
    %c2_84 = arith.constant 2 : index
    %c0_85 = arith.constant 0 : index
    %c0_86 = arith.constant 0 : index
    %82 = vector.load %arg12[%c2_84, %c0_85, %c0_86] : memref<3x256x512xbf16, #tpu.memory_space<vmem>>, vector<1x256x512xbf16>
    %83 = vector.shape_cast %82 : vector<1x256x512xbf16> to vector<256x512xbf16>
    %cst_87 = arith.constant dense<0.000000e+00> : vector<8x512xf32>
    %84 = tpu.matmul %75, %83, %cst_87 {dimension_numbers = #tpu.dot_dimension_numbers<[1], [0], [0], [1], [0, 0, 1, 1], [], []>} : vector<8x256xbf16>, vector<256x512xbf16>, vector<8x512xf32> -> vector<8x512xf32>
    %c0_88 = arith.constant 0 : index
    %c0_89 = arith.constant 0 : index
    %c0_90 = arith.constant 0 : index
    %85 = vector.load %arg11[%c0_88, %c0_89, %c0_90] : memref<2x8x8xf32, #tpu.memory_space<vmem>>, vector<1x8x8xf32>
    %86 = vector.shape_cast %85 : vector<1x8x8xf32> to vector<8x8xf32>
    %cst_91 = arith.constant dense<0.000000e+00> : vector<8x512xf32>
    %87 = tpu.matmul %86, %78, %cst_91 {dimension_numbers = #tpu.dot_dimension_numbers<[1], [0], [0], [1], [0, 0, 1, 1], [], []>} : vector<8x8xf32>, vector<8x512xf32>, vector<8x512xf32> -> vector<8x512xf32>
    %88 = arith.addf %81, %87 : vector<8x512xf32>
    %c1_92 = arith.constant 1 : index
    %c0_93 = arith.constant 0 : index
    %c0_94 = arith.constant 0 : index
    %89 = vector.load %arg11[%c1_92, %c0_93, %c0_94] : memref<2x8x8xf32, #tpu.memory_space<vmem>>, vector<1x8x8xf32>
    %90 = vector.shape_cast %89 : vector<1x8x8xf32> to vector<8x8xf32>
    %cst_95 = arith.constant dense<0.000000e+00> : vector<8x512xf32>
    %91 = tpu.matmul %90, %84, %cst_95 {dimension_numbers = #tpu.dot_dimension_numbers<[1], [0], [0], [1], [0, 0, 1, 1], [], []>} : vector<8x8xf32>, vector<8x512xf32>, vector<8x512xf32> -> vector<8x512xf32>
    %92 = arith.addf %88, %91 : vector<8x512xf32>
    %c0_96 = arith.constant 0 : index
    %c0_97 = arith.constant 0 : index
    %93 = vector.load %arg13[%c0_96, %c0_97] : memref<1x512xf32, #tpu.memory_space<vmem>>, vector<1x512xf32>
    %94 = vector.broadcast %93 : vector<1x512xf32> to vector<8x512xf32>
    %95 = arith.addf %92, %94 : vector<8x512xf32>
    %cst_98 = arith.constant 0.000000e+00 : f32
    %96 = vector.broadcast %cst_98 : f32 to vector<8x512xf32>
    %97 = arith.maximumf %95, %96 : vector<8x512xf32>
    %c0_99 = arith.constant 0 : index
    %c0_100 = arith.constant 0 : index
    %c0_101 = arith.constant 0 : index
    %98 = vector.load %arg14[%c0_99, %c0_100, %c0_101] : memref<2x4x8xf32, #tpu.memory_space<vmem>>, vector<1x4x8xf32>
    %99 = vector.shape_cast %98 : vector<1x4x8xf32> to vector<4x8xf32>
    %cst_102 = arith.constant dense<0.000000e+00> : vector<4x512xf32>
    %100 = tpu.matmul %99, %97, %cst_102 {dimension_numbers = #tpu.dot_dimension_numbers<[1], [0], [0], [1], [0, 0, 1, 1], [], []>} : vector<4x8xf32>, vector<8x512xf32>, vector<4x512xf32> -> vector<4x512xf32>
    %c1_103 = arith.constant 1 : index
    %c0_104 = arith.constant 0 : index
    %c0_105 = arith.constant 0 : index
    %101 = vector.load %arg14[%c1_103, %c0_104, %c0_105] : memref<2x4x8xf32, #tpu.memory_space<vmem>>, vector<1x4x8xf32>
    %102 = vector.shape_cast %101 : vector<1x4x8xf32> to vector<4x8xf32>
    %cst_106 = arith.constant dense<0.000000e+00> : vector<4x512xf32>
    %103 = tpu.matmul %102, %97, %cst_106 {dimension_numbers = #tpu.dot_dimension_numbers<[1], [0], [0], [1], [0, 0, 1, 1], [], []>} : vector<4x8xf32>, vector<8x512xf32>, vector<4x512xf32> -> vector<4x512xf32>
    %104 = arith.maximumf %100, %103 : vector<4x512xf32>
    %c0_107 = arith.constant 0 : index
    %c0_108 = arith.constant 0 : index
    %c0_109 = arith.constant 0 : index
    %105 = vector.load %arg15[%c0_107, %c0_108, %c0_109] : memref<2x512x256xf32, #tpu.memory_space<vmem>>, vector<1x512x256xf32>
    %106 = vector.shape_cast %105 : vector<1x512x256xf32> to vector<512x256xf32>
    %cst_110 = arith.constant dense<0.000000e+00> : vector<4x256xf32>
    %107 = tpu.matmul %104, %106, %cst_110 {dimension_numbers = #tpu.dot_dimension_numbers<[1], [0], [0], [1], [0, 0, 1, 1], [], []>} : vector<4x512xf32>, vector<512x256xf32>, vector<4x256xf32> -> vector<4x256xf32>
    %c1_111 = arith.constant 1 : index
    %c0_112 = arith.constant 0 : index
    %c0_113 = arith.constant 0 : index
    %108 = vector.load %arg15[%c1_111, %c0_112, %c0_113] : memref<2x512x256xf32, #tpu.memory_space<vmem>>, vector<1x512x256xf32>
    %109 = vector.shape_cast %108 : vector<1x512x256xf32> to vector<512x256xf32>
    %cst_114 = arith.constant dense<0.000000e+00> : vector<4x256xf32>
    %110 = tpu.matmul %104, %109, %cst_114 {dimension_numbers = #tpu.dot_dimension_numbers<[1], [0], [0], [1], [0, 0, 1, 1], [], []>} : vector<4x512xf32>, vector<512x256xf32>, vector<4x256xf32> -> vector<4x256xf32>
    %111 = arith.maximumf %107, %110 : vector<4x256xf32>
    %112 = arith.truncf %111 : vector<4x256xf32> to vector<4x256xbf16>
    %c0_115 = arith.constant 0 : index
    %c0_116 = arith.constant 0 : index
    %c0_117 = arith.constant 0 : index
    %113 = vector.load %arg17[%c0_115, %c0_116, %c0_117] : memref<2x256x256xbf16, #tpu.memory_space<vmem>>, vector<1x256x256xbf16>
    %114 = vector.shape_cast %113 : vector<1x256x256xbf16> to vector<256x256xbf16>
    %cst_118 = arith.constant dense<0.000000e+00> : vector<4x256xf32>
    %115 = tpu.matmul %112, %114, %cst_118 {dimension_numbers = #tpu.dot_dimension_numbers<[1], [0], [0], [1], [0, 0, 1, 1], [], []>} : vector<4x256xbf16>, vector<256x256xbf16>, vector<4x256xf32> -> vector<4x256xf32>
    %c1_119 = arith.constant 1 : index
    %c0_120 = arith.constant 0 : index
    %c0_121 = arith.constant 0 : index
    %116 = vector.load %arg17[%c1_119, %c0_120, %c0_121] : memref<2x256x256xbf16, #tpu.memory_space<vmem>>, vector<1x256x256xbf16>
    %117 = vector.shape_cast %116 : vector<1x256x256xbf16> to vector<256x256xbf16>
    %cst_122 = arith.constant dense<0.000000e+00> : vector<4x256xf32>
    %118 = tpu.matmul %112, %117, %cst_122 {dimension_numbers = #tpu.dot_dimension_numbers<[1], [0], [0], [1], [0, 0, 1, 1], [], []>} : vector<4x256xbf16>, vector<256x256xbf16>, vector<4x256xf32> -> vector<4x256xf32>
    %c0_123 = arith.constant 0 : index
    %c0_124 = arith.constant 0 : index
    %c0_125 = arith.constant 0 : index
    %119 = vector.load %arg16[%c0_123, %c0_124, %c0_125] : memref<2x8x4xf32, #tpu.memory_space<vmem>>, vector<1x8x4xf32>
    %120 = vector.shape_cast %119 : vector<1x8x4xf32> to vector<8x4xf32>
    %cst_126 = arith.constant dense<0.000000e+00> : vector<8x256xf32>
    %121 = tpu.matmul %120, %115, %cst_126 {dimension_numbers = #tpu.dot_dimension_numbers<[1], [0], [0], [1], [0, 0, 1, 1], [], []>} : vector<8x4xf32>, vector<4x256xf32>, vector<8x256xf32> -> vector<8x256xf32>
    %c1_127 = arith.constant 1 : index
    %c0_128 = arith.constant 0 : index
    %c0_129 = arith.constant 0 : index
    %122 = vector.load %arg16[%c1_127, %c0_128, %c0_129] : memref<2x8x4xf32, #tpu.memory_space<vmem>>, vector<1x8x4xf32>
    %123 = vector.shape_cast %122 : vector<1x8x4xf32> to vector<8x4xf32>
    %cst_130 = arith.constant dense<0.000000e+00> : vector<8x256xf32>
    %124 = tpu.matmul %123, %118, %cst_130 {dimension_numbers = #tpu.dot_dimension_numbers<[1], [0], [0], [1], [0, 0, 1, 1], [], []>} : vector<8x4xf32>, vector<4x256xf32>, vector<8x256xf32> -> vector<8x256xf32>
    %125 = arith.addf %121, %124 : vector<8x256xf32>
    %c0_131 = arith.constant 0 : index
    %c0_132 = arith.constant 0 : index
    %126 = vector.load %arg18[%c0_131, %c0_132] : memref<1x256xf32, #tpu.memory_space<vmem>>, vector<1x256xf32>
    %127 = vector.broadcast %126 : vector<1x256xf32> to vector<8x256xf32>
    %128 = arith.addf %125, %127 : vector<8x256xf32>
    %cst_133 = arith.constant 0.000000e+00 : f32
    %129 = vector.broadcast %cst_133 : f32 to vector<8x256xf32>
    %130 = arith.maximumf %128, %129 : vector<8x256xf32>
    %131 = arith.truncf %130 : vector<8x256xf32> to vector<8x256xbf16>
    %c0_134 = arith.constant 0 : index
    %c0_135 = arith.constant 0 : index
    %c0_136 = arith.constant 0 : index
    %132 = vector.load %arg20[%c0_134, %c0_135, %c0_136] : memref<2x256x128xbf16, #tpu.memory_space<vmem>>, vector<1x256x128xbf16>
    %133 = vector.shape_cast %132 : vector<1x256x128xbf16> to vector<256x128xbf16>
    %cst_137 = arith.constant dense<0.000000e+00> : vector<8x128xf32>
    %134 = tpu.matmul %131, %133, %cst_137 {dimension_numbers = #tpu.dot_dimension_numbers<[1], [0], [0], [1], [0, 0, 1, 1], [], []>} : vector<8x256xbf16>, vector<256x128xbf16>, vector<8x128xf32> -> vector<8x128xf32>
    %c1_138 = arith.constant 1 : index
    %c0_139 = arith.constant 0 : index
    %c0_140 = arith.constant 0 : index
    %135 = vector.load %arg20[%c1_138, %c0_139, %c0_140] : memref<2x256x128xbf16, #tpu.memory_space<vmem>>, vector<1x256x128xbf16>
    %136 = vector.shape_cast %135 : vector<1x256x128xbf16> to vector<256x128xbf16>
    %cst_141 = arith.constant dense<0.000000e+00> : vector<8x128xf32>
    %137 = tpu.matmul %131, %136, %cst_141 {dimension_numbers = #tpu.dot_dimension_numbers<[1], [0], [0], [1], [0, 0, 1, 1], [], []>} : vector<8x256xbf16>, vector<256x128xbf16>, vector<8x128xf32> -> vector<8x128xf32>
    %c0_142 = arith.constant 0 : index
    %c0_143 = arith.constant 0 : index
    %c0_144 = arith.constant 0 : index
    %138 = vector.load %arg19[%c0_142, %c0_143, %c0_144] : memref<2x16x8xf32, #tpu.memory_space<vmem>>, vector<1x16x8xf32>
    %139 = vector.shape_cast %138 : vector<1x16x8xf32> to vector<16x8xf32>
    %cst_145 = arith.constant dense<0.000000e+00> : vector<16x128xf32>
    %140 = tpu.matmul %139, %134, %cst_145 {dimension_numbers = #tpu.dot_dimension_numbers<[1], [0], [0], [1], [0, 0, 1, 1], [], []>} : vector<16x8xf32>, vector<8x128xf32>, vector<16x128xf32> -> vector<16x128xf32>
    %c1_146 = arith.constant 1 : index
    %c0_147 = arith.constant 0 : index
    %c0_148 = arith.constant 0 : index
    %141 = vector.load %arg19[%c1_146, %c0_147, %c0_148] : memref<2x16x8xf32, #tpu.memory_space<vmem>>, vector<1x16x8xf32>
    %142 = vector.shape_cast %141 : vector<1x16x8xf32> to vector<16x8xf32>
    %cst_149 = arith.constant dense<0.000000e+00> : vector<16x128xf32>
    %143 = tpu.matmul %142, %137, %cst_149 {dimension_numbers = #tpu.dot_dimension_numbers<[1], [0], [0], [1], [0, 0, 1, 1], [], []>} : vector<16x8xf32>, vector<8x128xf32>, vector<16x128xf32> -> vector<16x128xf32>
    %144 = arith.addf %140, %143 : vector<16x128xf32>
    %c0_150 = arith.constant 0 : index
    %c0_151 = arith.constant 0 : index
    %145 = vector.load %arg21[%c0_150, %c0_151] : memref<1x128xf32, #tpu.memory_space<vmem>>, vector<1x128xf32>
    %146 = vector.broadcast %145 : vector<1x128xf32> to vector<16x128xf32>
    %147 = arith.addf %144, %146 : vector<16x128xf32>
    %cst_152 = arith.constant 0.000000e+00 : f32
    %148 = vector.broadcast %cst_152 : f32 to vector<16x128xf32>
    %149 = arith.maximumf %147, %148 : vector<16x128xf32>
    %150 = arith.truncf %149 : vector<16x128xf32> to vector<16x128xbf16>
    %c0_153 = arith.constant 0 : index
    %c0_154 = arith.constant 0 : index
    %c0_155 = arith.constant 0 : index
    %151 = vector.load %arg23[%c0_153, %c0_154, %c0_155] : memref<2x128x16xbf16, #tpu.memory_space<vmem>>, vector<1x128x16xbf16>
    %152 = vector.shape_cast %151 : vector<1x128x16xbf16> to vector<128x16xbf16>
    %cst_156 = arith.constant dense<0.000000e+00> : vector<16x16xf32>
    %153 = tpu.matmul %150, %152, %cst_156 {dimension_numbers = #tpu.dot_dimension_numbers<[1], [0], [0], [1], [0, 0, 1, 1], [], []>} : vector<16x128xbf16>, vector<128x16xbf16>, vector<16x16xf32> -> vector<16x16xf32>
    %c1_157 = arith.constant 1 : index
    %c0_158 = arith.constant 0 : index
    %c0_159 = arith.constant 0 : index
    %154 = vector.load %arg23[%c1_157, %c0_158, %c0_159] : memref<2x128x16xbf16, #tpu.memory_space<vmem>>, vector<1x128x16xbf16>
    %155 = vector.shape_cast %154 : vector<1x128x16xbf16> to vector<128x16xbf16>
    %cst_160 = arith.constant dense<0.000000e+00> : vector<16x16xf32>
    %156 = tpu.matmul %150, %155, %cst_160 {dimension_numbers = #tpu.dot_dimension_numbers<[1], [0], [0], [1], [0, 0, 1, 1], [], []>} : vector<16x128xbf16>, vector<128x16xbf16>, vector<16x16xf32> -> vector<16x16xf32>
    %c0_161 = arith.constant 0 : index
    %c0_162 = arith.constant 0 : index
    %c0_163 = arith.constant 0 : index
    %157 = vector.load %arg22[%c0_161, %c0_162, %c0_163] : memref<2x32x16xf32, #tpu.memory_space<vmem>>, vector<1x32x16xf32>
    %158 = vector.shape_cast %157 : vector<1x32x16xf32> to vector<32x16xf32>
    %cst_164 = arith.constant dense<0.000000e+00> : vector<32x16xf32>
    %159 = tpu.matmul %158, %153, %cst_164 {dimension_numbers = #tpu.dot_dimension_numbers<[1], [0], [0], [1], [0, 0, 1, 1], [], []>} : vector<32x16xf32>, vector<16x16xf32>, vector<32x16xf32> -> vector<32x16xf32>
    %c1_165 = arith.constant 1 : index
    %c0_166 = arith.constant 0 : index
    %c0_167 = arith.constant 0 : index
    %160 = vector.load %arg22[%c1_165, %c0_166, %c0_167] : memref<2x32x16xf32, #tpu.memory_space<vmem>>, vector<1x32x16xf32>
    %161 = vector.shape_cast %160 : vector<1x32x16xf32> to vector<32x16xf32>
    %cst_168 = arith.constant dense<0.000000e+00> : vector<32x16xf32>
    %162 = tpu.matmul %161, %156, %cst_168 {dimension_numbers = #tpu.dot_dimension_numbers<[1], [0], [0], [1], [0, 0, 1, 1], [], []>} : vector<32x16xf32>, vector<16x16xf32>, vector<32x16xf32> -> vector<32x16xf32>
    %163 = arith.addf %159, %162 : vector<32x16xf32>
    %c0_169 = arith.constant 0 : index
    %c0_170 = arith.constant 0 : index
    %164 = vector.load %arg24[%c0_169, %c0_170] : memref<1x16xf32, #tpu.memory_space<vmem>>, vector<1x16xf32>
    %165 = vector.broadcast %164 : vector<1x16xf32> to vector<32x16xf32>
    %166 = arith.addf %163, %165 : vector<32x16xf32>
    %cst_171 = arith.constant 0.000000e+00 : f32
    %167 = vector.broadcast %cst_171 : f32 to vector<32x16xf32>
    %168 = arith.maximumf %166, %167 : vector<32x16xf32>
    %c0_172 = arith.constant 0 : index
    %c0_173 = arith.constant 0 : index
    %169 = vector.load %arg25[%c0_172, %c0_173] : memref<32x16xf32, #tpu.memory_space<vmem>>, vector<32x16xf32>
    tpu.vector_store %arg25[%c0_172, %c0_173], %168 {strides = array<i32>} : memref<32x16xf32, #tpu.memory_space<vmem>>, vector<32x16xf32>,
    return
  }
}

</mosaic_0001>

<bundles_post_ra>
// kernel: conv_autoencoder_forward.1
= control target key start
LH: loop header
LB: loop body
LE: loop exit
PB: predicated region body
PF: predicated region fallthrough
CT: control target
= control target key end

     0   :  { %s10668_s0 = inlined_call_operand.vmem [shape: f32[32,16], index: 0, kind: input, shape index: {}]   ;;  %s10669_s1 = inlined_call_operand.vmem [shape: f32[2,32,32], index: 1, kind: input, shape index: {}]   ;;  %s10670_s2 = inlined_call_operand.vmem [shape: bf16[3,16,256], index: 2, kind: input, shape index: {}]   ;;  %s10671_s3 = inlined_call_operand.vmem [shape: f32[1,256], index: 3, kind: input, shape index: {}]   ;;  %s10672_s4 = inlined_call_operand.hbm [shape: f32[2,16,32], index: 4, kind: input, shape index: {}]   ;;  %s10673_s5 = inlined_call_operand.hbm [shape: f32[2,256,128], index: 5, kind: input, shape index: {}]   ;;  %s10674_s6 = inlined_call_operand.hbm [shape: f32[2,16,16], index: 6, kind: input, shape index: {}]   ;;  %s10675_s7 = inlined_call_operand.hbm [shape: bf16[3,128,512], index: 7, kind: input, shape index: {}]   ;;  %s10676_s8 = inlined_call_operand.hbm [shape: f32[1,512], index: 8, kind: input, shape index: {}]   ;;  %s10677_s9 = inlined_call_operand.hbm [shape: f32[2,8,16], index: 9, kind: input, shape index: {}]   ;;  %s10678_s10 = inlined_call_operand.hbm [shape: f32[2,512,256], index: 10, kind: input, shape index: {}]   ;;  %s10679_s11 = inlined_call_operand.hbm [shape: f32[2,8,8], index: 11, kind: input, shape index: {}]   ;;  %s10680_s12 = inlined_call_operand.hbm [shape: bf16[3,256,512], index: 12, kind: input, shape index: {}]   ;;  %s10681_s13 = inlined_call_operand.hbm [shape: f32[1,512], index: 13, kind: input, shape index: {}]   ;;  %s10682_s14 = inlined_call_operand.hbm [shape: f32[2,4,8], index: 14, kind: input, shape index: {}]   ;;  %s10683_s15 = inlined_call_operand.hbm [shape: f32[2,512,256], index: 15, kind: input, shape index: {}]   ;;  %s10684_s16 = inlined_call_operand.vmem [shape: f32[2,8,4], index: 16, kind: input, shape index: {}]   ;;  %s10685_s17 = inlined_call_operand.hbm [shape: bf16[2,256,256], index: 17, kind: input, shape index: {}]   ;;  %s10686_s18 = inlined_call_operand.hbm [shape: f32[1,256], index: 18, kind: input, shape index: {}]   ;;  %s10687_s19 = inlined_call_operand.vmem [shape: f32[2,16,8], index: 19, kind: input, shape index: {}]   ;;  %s10688_s20 = inlined_call_operand.vmem [shape: bf16[2,256,128], index: 20, kind: input, shape index: {}]   ;;  %s10689_s21 = inlined_call_operand.hbm [shape: f32[1,128], index: 21, kind: input, shape index: {}]   ;;  %s10690_s22 = inlined_call_operand.vmem [shape: f32[2,32,16], index: 22, kind: input, shape index: {}]   ;;  %s10691_s23 = inlined_call_operand.vmem [shape: bf16[2,128,16], index: 23, kind: input, shape index: {}]   ;;  %s10692_s24 = inlined_call_operand.hbm [shape: f32[1,16], index: 24, kind: input, shape index: {}]   ;;  %s10693_s25 = inlined_call_operand.hbm [shape: f32[32,16], index: 25, kind: output, shape index: {}]  }
   0x1   :  { %10710 = sst [smem:[#allocation39_spill]] %s10668_s0 }
   0x2   :  { %10711 = sst [smem:[#allocation40_spill]] %s10669_s1 }
   0x3   :  { %10712 = sst [smem:[#allocation41_spill]] %s10670_s2 }
   0x4   :  { %10713 = sst [smem:[#allocation42_spill]] %s10671_s3 }
   0x5   :  { %10714 = sst [smem:[#allocation43_spill]] %s10672_s4 }
   0x6   :  { %10715 = sst [smem:[#allocation44_spill]] %s10673_s5 }
   0x7   :  { %10716 = sst [smem:[#allocation45_spill]] %s10674_s6 }
   0x8   :  { %10717 = sst [smem:[#allocation46_spill]] %s10675_s7 }
   0x9   :  { %10718 = sst [smem:[#allocation47_spill]] %s10676_s8 }
   0xa   :  { %10719 = sst [smem:[#allocation48_spill]] %s10677_s9 }
   0xb   :  { %10720 = sst [smem:[#allocation49_spill]] %s10690_s22 }
   0xc   :  { %10721 = sst [smem:[#allocation50_spill]] %s10691_s23 }
   0xd   :  { %10722 = sst [smem:[#allocation51_spill]] %s10693_s25 }
   0xe   :  { %30 = vsyncpa [#allocation3], 0 }
   0xf   :  { %31 = vsyncpa [#allocation6], 0 }
  0x10   :  { %32 = vsyncpa [#allocation9], 0 }
  0x11   :  { %33 = vsyncpa [#allocation12], 0 }
  0x12   :  { %34 = vsyncpa [#allocation15], 0 }
  0x13   :  { %35 = vsyncpa [#allocation18], 0 }
  0x14   :  { %36 = vsyncpa [#allocation21], 0 }
  0x15   :  { %37 = vsyncpa [#allocation24], 0 }
  0x16   :  { %38 = vsyncpa [#allocation27], 0 }
  0x17   :  { %39 = vsyncpa [#allocation4], 0  ;;  %s9807_s29 = smov [#allocation5]   ;;  %s9808_s6 = smov [#allocation8]  }
  0x18   :  { %s65_s2 = sshll.u32 %s9807_s29, 4  ;;  %s89_s30 = sshll.u32 %s9808_s6, 4  ;;  %s66_s2 = int_to_ptr.vmem [resolvable:$true] %s65_s2  ;;  %s9963_s30 = int_to_ptr.vmem [resolvable:$true] %s89_s30 }
  0x19   :  { %s10723_s26 = sld [smem:[#allocation44_spill]] }
  0x1f   :  { %s9413_s1 = scalar_lea.hbm %s10723_s26, 8192 }
  0x20   :  { %p9414_p0 = scmp.ne.s32.totalorder %s10723_s26, %s9413_s1  ;;  %p9417_p1 = scmp.lt.u32.totalorder %s9413_s1, %s10723_s26 }
  0x22   :  { %p9419_p2 = pnand %p9417_p1, %p9414_p0 }
  0x24   :  { %9422 = shalt.err (!%p9419_p2)
}
  0x25   :  { %s9423_s9 = scalar_lea.vmem %s66_s2, 8192  ;;  %p9428_p4 = scmp.lt.s32.totalorder %s66_s2, %s66_s2 }
  0x26   :  { %p9424_p3 = scmp.ne.s32.totalorder %s66_s2, %s9423_s9  ;;  %p9429_p5 = scmp.lt.s32.totalorder %s9423_s9, %s9423_s9 }
  0x28   :  { %p9430_p6 = por %p9429_p5, %p9428_p4 }
  0x2a   :  { %p9431_p7 = pnand %p9430_p6, %p9424_p3 }
  0x2c   :  { %9434 = shalt.err (!%p9431_p7)
}
  0x2d   :  { %s10704_s5 = smov 128   ;;  %s10706_s0 = smov 8  }
  0x2e   :  { %71 = dma.hbm_to_vmem [thread:$0]  %s10723_s26, 8192, %s66_s2, [#allocation6], %s10704_s5, %s10704_s5, %s10706_s0  }
  0x2f   :  { %s10724_s1 = sld [smem:[#allocation46_spill]] }
  0x35   :  { %s9435_s8 = scalar_lea.hbm %s10724_s1, 12288 }
  0x36   :  { %p9436_p8 = scmp.ne.s32.totalorder %s10724_s1, %s9435_s8  ;;  %p9439_p9 = scmp.lt.u32.totalorder %s9435_s8, %s10724_s1 }
  0x38   :  { %p9441_p10 = pnand %p9439_p9, %p9436_p8 }
  0x3a   :  { %9444 = shalt.err (!%p9441_p10)
}
  0x3b   :  { %s9445_s25 = scalar_lea.vmem %s9963_s30, 12288  ;;  %p9450_p12 = scmp.lt.s32.totalorder %s9963_s30, %s9963_s30 }
  0x3c   :  { %p9446_p11 = scmp.ne.s32.totalorder %s9963_s30, %s9445_s25  ;;  %p9451_p13 = scmp.lt.s32.totalorder %s9445_s25, %s9445_s25 }
  0x3e   :  { %p9452_p0 = por %p9451_p13, %p9450_p12 }
  0x40   :  { %p9453_p1 = pnand %p9452_p0, %p9446_p11 }
  0x42   :  { %9456 = shalt.err (!%p9453_p1)
}
  0x43   :  { %s9811_s2 = smov 256   ;;  %s9812_s26 = smov 16  }
  0x44   :  { %95 = dma.hbm_to_vmem [thread:$0]  %s10724_s1, 12288, %s9963_s30, [#allocation9], %s9811_s2, %s9811_s2, %s9812_s26  }
  0x45   :  { %s9813_s7 = smov [#allocation11]   ;;  %s9814_s8 = smov [#allocation14]  }
  0x46   :  { %s111_s3 = sshll.u32 %s9813_s7, 4  ;;  %s135_s27 = sshll.u32 %s9814_s8, 4  ;;  %s112_s3 = int_to_ptr.vmem [resolvable:$true] %s111_s3  ;;  %s10000_s27 = int_to_ptr.vmem [resolvable:$true] %s135_s27 }
  0x47   :  { %s10725_s28 = sld [smem:[#allocation48_spill]] }
  0x4d   :  { %s9457_s9 = scalar_lea.hbm %s10725_s28, 256 }
  0x4e   :  { %p9458_p2 = scmp.ne.s32.totalorder %s10725_s28, %s9457_s9  ;;  %p9461_p3 = scmp.lt.u32.totalorder %s9457_s9, %s10725_s28 }
  0x50   :  { %p9463_p4 = pnand %p9461_p3, %p9458_p2 }
  0x52   :  { %9466 = shalt.err (!%p9463_p4)
}
  0x53   :  { %s9467_s30 = scalar_lea.vmem %s112_s3, 256  ;;  %p9472_p6 = scmp.lt.s32.totalorder %s112_s3, %s112_s3 }
  0x54   :  { %p9468_p5 = scmp.ne.s32.totalorder %s112_s3, %s9467_s30  ;;  %p9473_p7 = scmp.lt.s32.totalorder %s9467_s30, %s9467_s30 }
  0x56   :  { %p9474_p8 = por %p9473_p7, %p9472_p6 }
  0x58   :  { %p9475_p9 = pnand %p9474_p8, %p9468_p5 }
  0x5a   :  { %9478 = shalt.err (!%p9475_p9)
}
  0x5b   :  { %s10726_s1 = smov 8   ;;  %s10727_s29 = smov 128  }
  0x5c   :  { %117 = dma.hbm_to_vmem [thread:$0]  %s10725_s28, 256, %s112_s3, [#allocation12], %s10727_s29, %s10727_s29, %s10726_s1  }
  0x5d   :  { %s9479_s22 = scalar_lea.hbm %s10679_s11, 256 }
  0x5e   :  { %p9480_p10 = scmp.ne.s32.totalorder %s10679_s11, %s9479_s22  ;;  %p9483_p11 = scmp.lt.u32.totalorder %s9479_s22, %s10679_s11 }
  0x60   :  { %p9485_p12 = pnand %p9483_p11, %p9480_p10 }
  0x62   :  { %9488 = shalt.err (!%p9485_p12)
}
  0x63   :  { %s9489_s9 = scalar_lea.vmem %s10000_s27, 256  ;;  %p9494_p0 = scmp.lt.s32.totalorder %s10000_s27, %s10000_s27 }
  0x64   :  { %p9490_p13 = scmp.ne.s32.totalorder %s10000_s27, %s9489_s9  ;;  %p9495_p1 = scmp.lt.s32.totalorder %s9489_s9, %s9489_s9 }
  0x66   :  { %p9496_p2 = por %p9495_p1, %p9494_p0 }
  0x68   :  { %p9497_p3 = pnand %p9496_p2, %p9490_p13 }
  0x6a   :  { %9500 = shalt.err (!%p9497_p3)
}
  0x6b   :  { %141 = dma.hbm_to_vmem [thread:$0]  %s10679_s11, 256, %s10000_s27, [#allocation15], %s10727_s29, %s10727_s29, %s10726_s1  }
  0x6c   :  { %s9815_s30 = smov [#allocation17]   ;;  %s9816_s7 = smov [#allocation20]  }
  0x6d   :  { %s160_s6 = sshll.u32 %s9815_s30, 4  ;;  %s181_s5 = sshll.u32 %s9816_s7, 4  ;;  %s161_s6 = int_to_ptr.vmem [resolvable:$true] %s160_s6  ;;  %s10037_s5 = int_to_ptr.vmem [resolvable:$true] %s181_s5 }
  0x6e   :  { %s9501_s23 = scalar_lea.hbm %s10681_s13, 64 }
  0x6f   :  { %p9502_p4 = scmp.ne.s32.totalorder %s10681_s13, %s9501_s23  ;;  %p9505_p5 = scmp.lt.u32.totalorder %s9501_s23, %s10681_s13 }
  0x71   :  { %p9507_p6 = pnand %p9505_p5, %p9502_p4 }
  0x73   :  { %9510 = shalt.err (!%p9507_p6)
}
  0x74   :  { %s9511_s11 = scalar_lea.vmem %s161_s6, 64  ;;  %p9516_p8 = scmp.lt.s32.totalorder %s161_s6, %s161_s6 }
  0x75   :  { %p9512_p7 = scmp.ne.s32.totalorder %s161_s6, %s9511_s11  ;;  %p9517_p9 = scmp.lt.s32.totalorder %s9511_s11, %s9511_s11 }
  0x77   :  { %p9518_p10 = por %p9517_p9, %p9516_p8 }
  0x79   :  { %p9519_p11 = pnand %p9518_p10, %p9512_p7 }
  0x7b   :  { %9522 = shalt.err (!%p9519_p11)
}
  0x7c   :  { %163 = dma.hbm_to_vmem [thread:$0]  %s10681_s13, 64, %s161_s6, [#allocation18]  }
  0x7d   :  { %s9523_s7 = scalar_lea.hbm %s10683_s15, 32768 }
  0x7e   :  { %p9524_p12 = scmp.ne.s32.totalorder %s10683_s15, %s9523_s7  ;;  %p9527_p13 = scmp.lt.u32.totalorder %s9523_s7, %s10683_s15 }
  0x80   :  { %p9529_p0 = pnand %p9527_p13, %p9524_p12 }
  0x82   :  { %9532 = shalt.err (!%p9529_p0)
}
  0x83   :  { %s9533_s25 = scalar_lea.vmem %s10037_s5, 32768  ;;  %p9538_p2 = scmp.lt.s32.totalorder %s10037_s5, %s10037_s5 }
  0x84   :  { %p9534_p1 = scmp.ne.s32.totalorder %s10037_s5, %s9533_s25  ;;  %p9539_p3 = scmp.lt.s32.totalorder %s9533_s25, %s9533_s25 }
  0x86   :  { %p9540_p4 = por %p9539_p3, %p9538_p2 }
  0x88   :  { %p9541_p5 = pnand %p9540_p4, %p9534_p1 }
  0x8a   :  { %9544 = shalt.err (!%p9541_p5)
}
  0x8b   :  { %187 = dma.hbm_to_vmem [thread:$0]  %s10683_s15, 32768, %s10037_s5, [#allocation21], %s9811_s2, %s9811_s2, %s9812_s26  }
  0x8c   :  { %s9817_s4 = smov [#allocation23]   ;;  %s9818_s11 = smov [#allocation2]  }
  0x8d   :  { %s208_s9 = sshll.u32 %s9817_s4, 4  ;;  %s53_s27 = sshll.u32 %s9818_s11, 4  ;;  %s209_s9 = int_to_ptr.vmem [resolvable:$true] %s208_s9  ;;  %s10071_s27 = int_to_ptr.vmem [resolvable:$true] %s53_s27 }
  0x8e   :  { %s9545_s30 = scalar_lea.hbm %s10686_s18, 32 }
  0x8f   :  { %p9546_p6 = scmp.ne.s32.totalorder %s10686_s18, %s9545_s30  ;;  %p9549_p7 = scmp.lt.u32.totalorder %s9545_s30, %s10686_s18 }
  0x91   :  { %p9551_p8 = pnand %p9549_p7, %p9546_p6 }
  0x93   :  { %9554 = shalt.err (!%p9551_p8)
}
  0x94   :  { %s9555_s15 = scalar_lea.vmem %s209_s9, 32  ;;  %p9560_p10 = scmp.lt.s32.totalorder %s209_s9, %s209_s9 }
  0x95   :  { %p9556_p9 = scmp.ne.s32.totalorder %s209_s9, %s9555_s15  ;;  %p9561_p11 = scmp.lt.s32.totalorder %s9555_s15, %s9555_s15 }
  0x97   :  { %p9562_p12 = por %p9561_p11, %p9560_p10 }
  0x99   :  { %p9563_p13 = pnand %p9562_p12, %p9556_p9 }
  0x9b   :  { %9566 = shalt.err (!%p9563_p13)
}
  0x9c   :  { %211 = dma.hbm_to_vmem [thread:$0]  %s10686_s18, 32, %s209_s9, [#allocation24]  }
  0x9d   :  { %s10728_s6 = sld [smem:[#allocation43_spill]] }
  0xa3   :  { %s9567_s4 = scalar_lea.hbm %s10728_s6, 512 }
  0xa4   :  { %p9568_p0 = scmp.ne.s32.totalorder %s10728_s6, %s9567_s4  ;;  %p9571_p1 = scmp.lt.u32.totalorder %s9567_s4, %s10728_s6 }
  0xa6   :  { %p9573_p2 = pnand %p9571_p1, %p9568_p0 }
  0xa8   :  { %9576 = shalt.err (!%p9573_p2)
}
  0xa9   :  { %s9577_s7 = scalar_lea.vmem %s10071_s27, 512  ;;  %p9582_p4 = scmp.lt.s32.totalorder %s10071_s27, %s10071_s27 }
  0xaa   :  { %p9578_p3 = scmp.ne.s32.totalorder %s10071_s27, %s9577_s7  ;;  %p9583_p5 = scmp.lt.s32.totalorder %s9577_s7, %s9577_s7 }
  0xac   :  { %p9584_p6 = por %p9583_p5, %p9582_p4 }
  0xae   :  { %p9585_p7 = pnand %p9584_p6, %p9578_p3 }
  0xb0   :  { %9588 = shalt.err (!%p9585_p7)
}
  0xb1   :  { %59 = dma.hbm_to_vmem [thread:$0]  %s10728_s6, 512, %s10071_s27, [#allocation3], %s10727_s29, %s10727_s29, %s10726_s1  }
  0xb2   :  { %s9819_s0 = smov [#allocation7]   ;;  %s9820_s23 = smov [#allocation10]  }
  0xb3   :  { %s77_s22 = sshll.u32 %s9819_s0, 4  ;;  %s102_s15 = sshll.u32 %s9820_s23, 4  ;;  %s78_s22 = int_to_ptr.vmem [resolvable:$true] %s77_s22  ;;  %s103_s15 = int_to_ptr.vmem [resolvable:$true] %s102_s15 }
  0xb4   :  { %s10729_s25 = sld [smem:[#allocation45_spill]] }
  0xba   :  { %s9589_s13 = scalar_lea.hbm %s10729_s25, 512 }
  0xbb   :  { %p9590_p8 = scmp.ne.s32.totalorder %s10729_s25, %s9589_s13  ;;  %p9593_p9 = scmp.lt.u32.totalorder %s9589_s13, %s10729_s25 }
  0xbd   :  { %p9595_p10 = pnand %p9593_p9, %p9590_p8 }
  0xbf   :  { %9598 = shalt.err (!%p9595_p10)
}
  0xc0   :  { %s9599_s27 = scalar_lea.vmem %s78_s22, 512  ;;  %p9604_p12 = scmp.lt.s32.totalorder %s78_s22, %s78_s22 }
  0xc1   :  { %p9600_p11 = scmp.ne.s32.totalorder %s78_s22, %s9599_s27  ;;  %p9605_p13 = scmp.lt.s32.totalorder %s9599_s27, %s9599_s27 }
  0xc3   :  { %p9606_p0 = por %p9605_p13, %p9604_p12 }
  0xc5   :  { %p9607_p1 = pnand %p9606_p0, %p9600_p11 }
  0xc7   :  { %9610 = shalt.err (!%p9607_p1)
}
  0xc8   :  { %83 = dma.hbm_to_vmem [thread:$0]  %s10729_s25, 512, %s78_s22, [#allocation6], %s10727_s29, %s10727_s29, %s10726_s1  }
  0xc9   :  { %s10730_s9 = sld [smem:[#allocation47_spill]] }
  0xcf   :  { %s9611_s0 = scalar_lea.hbm %s10730_s9, 64 }
  0xd0   :  { %p9612_p2 = scmp.ne.s32.totalorder %s10730_s9, %s9611_s0  ;;  %p9615_p3 = scmp.lt.u32.totalorder %s9611_s0, %s10730_s9 }
  0xd2   :  { %p9617_p4 = pnand %p9615_p3, %p9612_p2 }
  0xd4   :  { %9620 = shalt.err (!%p9617_p4)
}
  0xd5   :  { %s9621_s4 = scalar_lea.vmem %s103_s15, 64  ;;  %p9626_p6 = scmp.lt.s32.totalorder %s103_s15, %s103_s15 }
  0xd6   :  { %p9622_p5 = scmp.ne.s32.totalorder %s103_s15, %s9621_s4  ;;  %p9627_p7 = scmp.lt.s32.totalorder %s9621_s4, %s9621_s4 }
  0xd8   :  { %p9628_p8 = por %p9627_p7, %p9626_p6 }
  0xda   :  { %p9629_p9 = pnand %p9628_p8, %p9622_p5 }
  0xdc   :  { %9632 = shalt.err (!%p9629_p9)
}
  0xdd   :  { %105 = dma.hbm_to_vmem [thread:$0]  %s10730_s9, 64, %s103_s15, [#allocation9]  }
  0xde   :  { %s9821_s11 = smov [#allocation13]   ;;  %s9822_s28 = smov [#allocation16]  }
  0xdf   :  { %s123_s3 = sshll.u32 %s9821_s11, 4  ;;  %s147_s27 = sshll.u32 %s9822_s28, 4  ;;  %s124_s3 = int_to_ptr.vmem [resolvable:$true] %s123_s3  ;;  %s10132_s27 = int_to_ptr.vmem [resolvable:$true] %s147_s27 }
  0xe0   :  { %s9633_s7 = scalar_lea.hbm %s10678_s10, 32768 }
  0xe1   :  { %p9634_p10 = scmp.ne.s32.totalorder %s10678_s10, %s9633_s7  ;;  %p9637_p11 = scmp.lt.u32.totalorder %s9633_s7, %s10678_s10 }
  0xe3   :  { %p9639_p12 = pnand %p9637_p11, %p9634_p10 }
  0xe5   :  { %9642 = shalt.err (!%p9639_p12)
}
  0xe6   :  { %s9643_s15 = scalar_lea.vmem %s124_s3, 32768  ;;  %p9648_p0 = scmp.lt.s32.totalorder %s124_s3, %s124_s3 }
  0xe7   :  { %p9644_p13 = scmp.ne.s32.totalorder %s124_s3, %s9643_s15  ;;  %p9649_p1 = scmp.lt.s32.totalorder %s9643_s15, %s9643_s15 }
  0xe9   :  { %p9650_p2 = por %p9649_p1, %p9648_p0 }
  0xeb   :  { %p9651_p3 = pnand %p9650_p2, %p9644_p13 }
  0xed   :  { %9654 = shalt.err (!%p9651_p3)
}
  0xee   :  { %129 = dma.hbm_to_vmem [thread:$0]  %s10678_s10, 32768, %s124_s3, [#allocation12], %s9811_s2, %s9811_s2, %s9812_s26  }
  0xef   :  { %s9655_s22 = scalar_lea.hbm %s10680_s12, 24576 }
  0xf0   :  { %p9656_p4 = scmp.ne.s32.totalorder %s10680_s12, %s9655_s22  ;;  %p9659_p5 = scmp.lt.u32.totalorder %s9655_s22, %s10680_s12 }
  0xf2   :  { %p9661_p6 = pnand %p9659_p5, %p9656_p4 }
  0xf4   :  { %9664 = shalt.err (!%p9661_p6)
}
  0xf5   :  { %s9665_s30 = scalar_lea.vmem %s10132_s27, 24576  ;;  %p9670_p8 = scmp.lt.s32.totalorder %s10132_s27, %s10132_s27 }
  0xf6   :  { %p9666_p7 = scmp.ne.s32.totalorder %s10132_s27, %s9665_s30  ;;  %p9671_p9 = scmp.lt.s32.totalorder %s9665_s30, %s9665_s30 }
  0xf8   :  { %p9672_p10 = por %p9671_p9, %p9670_p8 }
  0xfa   :  { %p9673_p11 = pnand %p9672_p10, %p9666_p7 }
  0xfc   :  { %9676 = shalt.err (!%p9673_p11)
}
  0xfd   :  { %153 = dma.hbm_to_vmem [thread:$0]  %s10680_s12, 24576, %s10132_s27, [#allocation15], %s9811_s2, %s9811_s2, %s9812_s26  }
  0xfe   :  { %s9823_s7 = smov [#allocation19]   ;;  %s9677_s5 = scalar_lea.hbm %s10682_s14, 128 }
  0xff   :  { %s169_s18 = sshll.u32 %s9823_s7, 4  ;;  %p9678_p12 = scmp.ne.s32.totalorder %s10682_s14, %s9677_s5  ;;  %s170_s18 = int_to_ptr.vmem [resolvable:$true] %s169_s18 }
 0x100   :  { %p9681_p13 = scmp.lt.u32.totalorder %s9677_s5, %s10682_s14 }
 0x102   :  { %p9683_p0 = pnand %p9681_p13, %p9678_p12 }
 0x104   :  { %9686 = shalt.err (!%p9683_p0)
}
 0x105   :  { %s9687_s4 = scalar_lea.vmem %s170_s18, 128  ;;  %p9692_p2 = scmp.lt.s32.totalorder %s170_s18, %s170_s18 }
 0x106   :  { %p9688_p1 = scmp.ne.s32.totalorder %s170_s18, %s9687_s4  ;;  %p9693_p3 = scmp.lt.s32.totalorder %s9687_s4, %s9687_s4 }
 0x108   :  { %p9694_p4 = por %p9693_p3, %p9692_p2 }
 0x10a   :  { %p9695_p5 = pnand %p9694_p4, %p9688_p1 }
 0x10c   :  { %9698 = shalt.err (!%p9695_p5)
}
 0x10d   :  { %s9824_s12 = smov 64   ;;  %s9825_s2 = smov 4  }
 0x10e   :  { %175 = dma.hbm_to_vmem [thread:$0]  %s10682_s14, 128, %s170_s18, [#allocation18], %s9824_s12, %s9824_s12, %s9825_s2  }
 0x10f   :  { %s9826_s22 = smov [#allocation22]   ;;  %s9827_s11 = smov [#allocation25]  }
 0x110   :  { %s195_s25 = sshll.u32 %s9826_s22, 4  ;;  %s222_s28 = sshll.u32 %s9827_s11, 4  ;;  %s196_s25 = int_to_ptr.vmem [resolvable:$true] %s195_s25  ;;  %s223_s28 = int_to_ptr.vmem [resolvable:$true] %s222_s28 }
 0x111   :  { %s9699_s10 = scalar_lea.hbm %s10685_s17, 8192 }
 0x112   :  { %p9700_p6 = scmp.ne.s32.totalorder %s10685_s17, %s9699_s10  ;;  %p9703_p7 = scmp.lt.u32.totalorder %s9699_s10, %s10685_s17 }
 0x114   :  { %p9705_p8 = pnand %p9703_p7, %p9700_p6 }
 0x116   :  { %9708 = shalt.err (!%p9705_p8)
}
 0x117   :  { %s9709_s14 = scalar_lea.vmem %s196_s25, 8192  ;;  %p9714_p10 = scmp.lt.s32.totalorder %s196_s25, %s196_s25 }
 0x118   :  { %p9710_p9 = scmp.ne.s32.totalorder %s196_s25, %s9709_s14  ;;  %p9715_p11 = scmp.lt.s32.totalorder %s9709_s14, %s9709_s14 }
 0x11a   :  { %p9716_p12 = por %p9715_p11, %p9714_p10 }
 0x11c   :  { %p9717_p13 = pnand %p9716_p12, %p9710_p9 }
 0x11e   :  { %9720 = shalt.err (!%p9717_p13)
}
 0x11f   :  { %201 = dma.hbm_to_vmem [thread:$0]  %s10685_s17, 8192, %s196_s25, [#allocation21], %s10727_s29, %s10727_s29, %s10726_s1  }
 0x120   :  { %s9721_s8 = scalar_lea.hbm %s10689_s21, 16 }
 0x121   :  { %p9722_p0 = scmp.ne.s32.totalorder %s10689_s21, %s9721_s8  ;;  %p9725_p1 = scmp.lt.u32.totalorder %s9721_s8, %s10689_s21 }
 0x123   :  { %p9727_p2 = pnand %p9725_p1, %p9722_p0 }
 0x125   :  { %9730 = shalt.err (!%p9727_p2)
}
 0x126   :  { %s9731_s26 = scalar_lea.vmem %s223_s28, 16  ;;  %s9735_s27 = scalar_lea.vmem %s223_s28, 32 }
 0x127   :  { %p9732_p3 = scmp.ne.s32.totalorder %s223_s28, %s9731_s26  ;;  %p9736_p4 = scmp.lt.s32.totalorder %s223_s28, %s223_s28 }
 0x128   :  { %p9737_p5 = scmp.lt.s32.totalorder %s9735_s27, %s9731_s26 }
 0x12a   :  { %p9738_p6 = por %p9737_p5, %p9736_p4 }
 0x12c   :  { %p9739_p7 = pnand %p9738_p6, %p9732_p3 }
 0x12e   :  { %9742 = shalt.err (!%p9739_p7)
}
 0x12f   :  { %225 = dma.hbm_to_vmem [thread:$0]  %s10689_s21, 16, %s223_s28, [#allocation24]  }
 0x130   :  { %s9828_s25 = smov [#allocation26]   ;;  %s9743_s10 = scalar_lea.hbm %s10692_s24, 16 }
 0x131   :  { %s236_s11 = sshll.u32 %s9828_s25, 4  ;;  %p9744_p8 = scmp.ne.s32.totalorder %s10692_s24, %s9743_s10  ;;  %s237_s11 = int_to_ptr.vmem [resolvable:$true] %s236_s11 }
 0x132   :  { %p9747_p9 = scmp.lt.u32.totalorder %s9743_s10, %s10692_s24 }
 0x134   :  { %p9749_p10 = pnand %p9747_p9, %p9744_p8 }
 0x136   :  { %9752 = shalt.err (!%p9749_p10)
}
 0x137   :  { %s9753_s14 = scalar_lea.vmem %s237_s11, 16  ;;  %s9757_s21 = scalar_lea.vmem %s237_s11, 32 }
 0x138   :  { %p9754_p11 = scmp.ne.s32.totalorder %s237_s11, %s9753_s14  ;;  %p9758_p12 = scmp.lt.s32.totalorder %s237_s11, %s237_s11 }
 0x139   :  { %p9759_p13 = scmp.lt.s32.totalorder %s9757_s21, %s9753_s14 }
 0x13b   :  { %p9760_p0 = por %p9759_p13, %p9758_p12 }
 0x13d   :  { %p9761_p1 = pnand %p9760_p0, %p9754_p11 }
 0x13f   :  { %9764 = shalt.err (!%p9761_p1)
}
 0x140   :  { %239 = dma.hbm_to_vmem [thread:$0]  %s10692_s24, 16, %s237_s11, [#allocation27]  }
 0x141   :  { %9787 = dma.done.wait [#allocation3], 512  }
 0x142   :  { %9788 = vsyncadd [#allocation3], 4294966784 }
 0x143   :  { %9789 = dma.done.wait [#allocation6], 8704  }
 0x144   :  { %9790 = vsyncadd [#allocation6], 4294958592 }
 0x145   :  { %9791 = dma.done.wait [#allocation9], 12352  }
 0x146   :  { %9792 = vsyncadd [#allocation9], 4294954944 }
 0x147   :  { %9793 = dma.done.wait [#allocation12], 33024  }
 0x148   :  { %9794 = vsyncadd [#allocation12], 4294934272 }
 0x149   :  { %9795 = dma.done.wait [#allocation15], 24832  }
 0x14a   :  { %9796 = vsyncadd [#allocation15], 4294942464 }
 0x14b   :  { %9797 = dma.done.wait [#allocation18], 192  }
 0x14c   :  { %9798 = vsyncadd [#allocation18], 4294967104 }
 0x14d   :  { %9799 = dma.done.wait [#allocation21], 40960  }
 0x14e   :  { %9800 = vsyncadd [#allocation21], 4294926336 }
 0x14f   :  { %9801 = dma.done.wait [#allocation24], 48  }
 0x150   :  { %9802 = vsyncadd [#allocation24], 4294967248 }
 0x151   :  { %9803 = dma.done.wait [#allocation27], 16  }
 0x152   :  { %9804 = vsyncadd [#allocation27], 4294967280  ;;  %v9829_v0 = vmov 0   ;;  %s10731_s15 = sld [smem:[#allocation41_spill]]  ;;  %s10732_s12 = sld [smem:[#allocation39_spill]]  ;;  %vm307_vm0 = vcmask 130048  }
 0x153   :  { %346 = vmatprep.mubr.bf16.mxu0 %v9829_v0  ;;  %356 = vmatprep.mubr.bf16.mxu1 %v9829_v0  ;;  %v9830_v13 = vmov 0.0   ;;  %s10733_s28 = sld [smem:[#allocation40_spill]]  ;;  %vm440_vm1 = vcmask 261120   ;;  %v938_v54 = vld [vmem:[#allocation5 + $0x80] sm:$0xff]  ;;  %v939_v55 = vld [vmem:[#allocation5 + $0x88] sm:$0xff]  ;;  %v940_v60 = vld [vmem:[#allocation5 + $0x90] sm:$0xff] }
 0x154   :  { %v8168_v56 = vpack.c.bf16 %v939_v55, %v938_v54  ;;  %v922_v57 = vld [vmem:[#allocation5] sm:$0xff]  ;;  %v923_v58 = vld [vmem:[#allocation5 + $0x8] sm:$0xff]  ;;  %v941_v61 = vld [vmem:[#allocation5 + $0x98] sm:$0xff]  ;;  %s10734_s6 = sld [smem:[#allocation42_spill]]  ;;  %vm4188_vm2 = vcmask 64512   ;;  %vm6233_vm3 = vcmask 1043456  }
 0x155   :  { %v8170_v59 = vpack.c.bf16 %v923_v58, %v922_v57  ;;  %v8172_v62 = vpack.c.bf16 %v941_v61, %v940_v60  ;;  %v924_v63 = vld [vmem:[#allocation5 + $0x10] sm:$0xff]  ;;  %vm6229_vm4 = vcmask 31744   ;;  %vm9831_vm5 = vmmov 0  }
 0x158   :  { %v8828_v1 = vld [vmem:[%s10731_s15 + $0x4] ss:$8 sps:$4 sm:$0xff]   ;;  %v8830_v2 = vld [vmem:[%s10731_s15] ss:$8 sps:$4 sm:$0xff]   ;;  %v291_v6 = vld [vmem:[%s10732_s12 + $0x10] sm:$0xff] }
 0x159   :  { %v289_v3 = vld [vmem:[%s10732_s12] sm:$0xff]  ;;  %v290_v4 = vld [vmem:[%s10732_s12 + $0x8] sm:$0xff]  ;;  %314 = vmatprep.subr.bf16.mxu0 %v8828_v1  ;;  %8784 = vmatprep.subr.bf16.mxu1 %v8828_v1  ;;  %v292_v7 = vld [vmem:[%s10732_s12 + $0x18] sm:$0xff]  ;;  %s10735_s12 = sld [smem:[#allocation50_spill]] }
 0x15a   :  { %v293_v5 = vpack.c.bf16 %v290_v4, %v289_v3  ;;  %315 = vmatpush1.bf16.msra.mxu0 %v8830_v2  ;;  %8785 = vmatpush1.bf16.msra.mxu1 %v8830_v2  ;;  %v294_v8 = vpack.c.bf16 %v292_v7, %v291_v6  ;;  %v8831_v9 = vld [vmem:[%s10731_s15 + $0x20] ss:$8 sps:$4 sm:$0xff]   ;;  %v8833_v10 = vld [vmem:[%s10731_s15 + $0x24] ss:$8 sps:$4 sm:$0xff]   ;;  %v8836_v11 = vld [vmem:[%s10731_s15 + $0x14] ss:$8 sps:$4 sm:$0xff]  }
 0x15b   :  { %383 = vmatprep.subr.bf16.mxu1 %v8833_v10  ;;  %v8834_v12 = vld [vmem:[%s10731_s15 + $0x10] ss:$8 sps:$4 sm:$0xff]   ;;  %v436_v31 = vld [vmem:[%s10733_s28] sm:$0xff]  ;;  %v437_v33 = vld [vmem:[%s10733_s28 + $0x8] sm:$0xff] }
 0x15c   :  { %v438_v39 = vld [vmem:[%s10733_s28 + $0x10] sm:$0xff]  ;;  %v439_v41 = vld [vmem:[%s10733_s28 + $0x18] sm:$0xff]  ;;  %v7403_v42 = vld [vmem:[%s10733_s28 + $0x20] sm:$0xff] }
 0x15d   :  { %7385 = vmatmul.mubr.msk.bf16.vlgmr.msra.gmra.mrb[0].mxu0 %vm307_vm0, %v293_v5  ;;  %7386 = vmatmul.mubr.msk.bf16.vlgmr.msra.gmra.mrb[0].mxu1 %vm307_vm0, %v294_v8  ;;  %v7404_v43 = vld [vmem:[%s10733_s28 + $0x28] sm:$0xff]  ;;  %v7405_v44 = vld [vmem:[%s10733_s28 + $0x30] sm:$0xff]  ;;  %v7406_v45 = vld [vmem:[%s10733_s28 + $0x38] sm:$0xff] }
 0x15e   :  { %384 = vmatpush1.bf16.msra.mxu1 %v8831_v9  ;;  %415 = vmatprep.mubr.bf16.mxu1 %v9829_v0  ;;  %v925_v1 = vld [vmem:[#allocation5 + $0x18] sm:$0xff]  ;;  %v942_v3 = vld [vmem:[#allocation5 + $0xa0] sm:$0xff]  ;;  %v943_v4 = vld [vmem:[#allocation5 + $0xa8] sm:$0xff] }
 0x15f   :  { %552 = vmatprep.subr.bf16.mxu1 %v8836_v11  ;;  %517 = vmatprep.mubr.f32.mxu0 %v9830_v13  ;;  %v8174_v2 = vpack.c.bf16 %v925_v1, %v924_v63  ;;  %v926_v6 = vld [vmem:[#allocation5 + $0x20] sm:$0xff]  ;;  %v927_v7 = vld [vmem:[#allocation5 + $0x28] sm:$0xff]  ;;  %v944_v9 = vld [vmem:[#allocation5 + $0xb0] sm:$0xff] }
 0x160   :  { %v945_v10 = vld [vmem:[#allocation5 + $0xb8] sm:$0xff] }
 0x161   :  { %v8180_v11 = vpack.c.bf16 %v945_v10, %v944_v9 }
 0x165   :  { %7393 = vmatmul.mubr.msk.bf16.vlgmr.msra.gmra.mrb[4].mxu1 %vm307_vm0, %v293_v5 }
 0x166   :  { %425 = vmatprep.mubr.bf16.mxu1 %v9829_v0  ;;  %553 = vmatpush1.bf16.msra.mxu1 %v8834_v12  ;;  %v928_v12 = vld [vmem:[#allocation5 + $0x30] sm:$0xff] }
 0x16d   :  { %7394 = vmatmul.mubr.msk.bf16.gmra.mrb[8].mxu1 %vm307_vm0, %v294_v8 }
 0x16e   :  { %584 = vmatprep.mubr.bf16.mxu1 %v9829_v0 }
 0x175   :  { %7401 = vmatmul.mubr.msk.bf16.vlgmr.msra.gmra.mrb[12].mxu1 %vm307_vm0, %v293_v5  ;;  %v8176_v5 = vpack.c.bf16 %v943_v4, %v942_v3 }
 0x176   :  { %594 = vmatprep.mubr.bf16.mxu1 %v9829_v0 }
 0x17d   :  { %7402 = vmatmul.mubr.msk.bf16.gmra.mrb[16].mxu1 %vm307_vm0, %v294_v8  ;;  %v8178_v8 = vpack.c.bf16 %v927_v7, %v926_v6 }
 0x17e   :  { %819 = vmatprep.mubr.f32.mxu1 %v9830_v13 }
 0x230   :  { %v348_v14 = vpop.f32.mrb[0].mxu0  ;;  %v358_v15 = vpop.f32.mrb[0].mxu1 }
 0x231   :  { %v350_v16 = vpop.f32.mrb[1].mxu0  ;;  %v360_v17 = vpop.f32.mrb[1].mxu1 }
 0x232   :  { %v352_v18 = vpop.f32.mrb[2].mxu0  ;;  %v362_v19 = vpop.f32.mrb[2].mxu1 }
 0x233   :  { %v8138_v20 = vpack.c.bf16 %v352_v18, %v348_v14  ;;  %v354_v21 = vpop.f32.mrb[3].mxu0  ;;  %v8142_v22 = vpack.c.bf16 %v362_v19, %v358_v15  ;;  %v364_v23 = vpop.f32.mrb[3].mxu1  ;;  %v929_v14 = vld [vmem:[#allocation5 + $0x38] sm:$0xff]  ;;  %v946_v15 = vld [vmem:[#allocation5 + $0xc0] sm:$0xff] }
 0x234   :  { %v8136_v24 = vpack.c.bf16 %v354_v21, %v350_v16  ;;  %v8140_v25 = vpack.c.bf16 %v364_v23, %v360_v17  ;;  %v947_v16 = vld [vmem:[#allocation5 + $0xc8] sm:$0xff]  ;;  %v8182_v17 = vpack.c.bf16 %v929_v14, %v928_v12  ;;  %v930_v19 = vld [vmem:[#allocation5 + $0x40] sm:$0xff] }
 0x235   :  { %v8184_v18 = vpack.c.bf16 %v947_v16, %v946_v15 }
 0x236   :  { %8137 = vmatprep.subr.bf16.mxu0 %v8136_v24 }
 0x237   :  { %8139 = vmatpush1.bf16.msra.mxu0 %v8138_v20  ;;  %v931_v20 = vld [vmem:[#allocation5 + $0x48] sm:$0xff] }
 0x238   :  { %v417_v26 = vpop.f32.mrb[4].mxu1  ;;  %8141 = vmatprep.subr.bf16.mxu0 %v8140_v25  ;;  %v8186_v21 = vpack.c.bf16 %v931_v20, %v930_v19  ;;  %v747_v19 = vld [vmem:[#allocation2] sm:$0xff] }
 0x239   :  { %v419_v27 = vpop.f32.mrb[5].mxu1  ;;  %v1046_v20 = vld [vmem:[#allocation5 + $0x180] sm:$0xff] }
 0x23a   :  { %v421_v28 = vpop.f32.mrb[6].mxu1 }
 0x23b   :  { %v8146_v29 = vpack.c.bf16 %v421_v28, %v417_v26  ;;  %v423_v30 = vpop.f32.mrb[7].mxu1  ;;  %8143 = vmatpush1.bf16.msra.mxu0 %v8142_v22 }
 0x23c   :  { %v8144_v32 = vpack.c.bf16 %v423_v30, %v419_v27 }
 0x23e   :  { %7395 = vmatmul.mubr.msk.f32.vlgmr.msra.gmra.mrb[4].mxu0 %vm440_vm1, %v436_v31  ;;  %8145 = vmatprep.subr.bf16.mxu0 %v8144_v32 }
 0x23f   :  { %8147 = vmatpush1.bf16.msra.mxu0 %v8146_v29  ;;  %523 = vmatprep.mubr.f32.mxu0 %v9830_v13  ;;  %v721_v29 = vlaneseq }
 0x240   :  { %v427_v34 = vpop.f32.mrb[8].mxu1 }
 0x241   :  { %v429_v35 = vpop.f32.mrb[9].mxu1 }
 0x242   :  { %v431_v36 = vpop.f32.mrb[10].mxu1  ;;  %7396 = vmatmul.mubr.msk.f32.gmra.mrb[6].mxu0 %vm440_vm1, %v437_v33 }
 0x243   :  { %v8150_v37 = vpack.c.bf16 %v431_v36, %v427_v34  ;;  %v433_v38 = vpop.f32.mrb[11].mxu1  ;;  %529 = vmatprep.mubr.f32.mxu0 %v9830_v13  ;;  %v10303_v34 = vshrl.u32 %v721_v29, 7 }
 0x244   :  { %v8148_v40 = vpack.c.bf16 %v433_v38, %v429_v35 }
 0x246   :  { %7397 = vmatmul.mubr.msk.f32.gmra.mrb[8].mxu0 %vm440_vm1, %v438_v39  ;;  %8149 = vmatprep.subr.bf16.mxu0 %v8148_v40  ;;  %v10306_v39 = vsub.s32 0, %v10303_v34 }
 0x247   :  { %8151 = vmatpush1.bf16.msra.mxu0 %v8150_v37  ;;  %535 = vmatprep.mubr.f32.mxu0 %v9830_v13 }
 0x248   :  { %v586_v46 = vpop.f32.mrb[12].mxu1  ;;  %8169 = vmatprep.subr.bf16.mxu0 %v8168_v56 }
 0x249   :  { %v588_v47 = vpop.f32.mrb[13].mxu1 }
 0x24a   :  { %7398 = vmatmul.mubr.msk.f32.gmra.mrb[10].mxu0 %vm440_vm1, %v439_v41  ;;  %v590_v48 = vpop.f32.mrb[14].mxu1  ;;  %v719_v41 = vld [vmem:[%s10734_s6] sm:$0x3] }
 0x24b   :  { %686 = vmatprep.mubr.f32.mxu0 %v9830_v13  ;;  %v592_v49 = vpop.f32.mrb[15].mxu1 }
 0x24e   :  { %7407 = vmatmul.mubr.msk.f32.vlgmr.msra.gmra.mrb[12].mxu0 %vm440_vm1, %v7403_v42  ;;  %v10312_v42 = vsub.s32 1, %v10303_v34 }
 0x24f   :  { %692 = vmatprep.mubr.f32.mxu0 %v9830_v13  ;;  %8171 = vmatpush3.bf16.msra.mxu0 %v8170_v59 }
 0x250   :  { %v596_v50 = vpop.f32.mrb[16].mxu1  ;;  %8173 = vmatprep.subr.bf16.mxu0 %v8172_v62 }
 0x251   :  { %v598_v51 = vpop.f32.mrb[17].mxu1 }
 0x252   :  { %7408 = vmatmul.mubr.msk.f32.gmra.mrb[14].mxu0 %vm440_vm1, %v7404_v43  ;;  %v600_v52 = vpop.f32.mrb[18].mxu1 }
 0x253   :  { %698 = vmatprep.mubr.f32.mxu0 %v9830_v13  ;;  %v602_v53 = vpop.f32.mrb[19].mxu1  ;;  %8175 = vmatpush3.bf16.msra.mxu0 %v8174_v2 }
 0x254   :  { %8177 = vmatprep.subr.bf16.mxu0 %v8176_v5 }
 0x256   :  { %7409 = vmatmul.mubr.msk.f32.gmra.mrb[16].mxu0 %vm440_vm1, %v7405_v44 }
 0x257   :  { %704 = vmatprep.mubr.f32.mxu0 %v9830_v13  ;;  %8179 = vmatpush3.bf16.msra.mxu0 %v8178_v8 }
 0x258   :  { %8181 = vmatprep.subr.bf16.mxu0 %v8180_v11 }
 0x25a   :  { %7410 = vmatmul.mubr.msk.f32.gmra.mrb[18].mxu0 %vm440_vm1, %v7406_v45  ;;  %v724_v45 = vrot.slane %v719_v41, %v10306_v39 }
 0x25b   :  { %8183 = vmatpush3.bf16.msra.mxu0 %v8182_v17 }
 0x25c   :  { %8185 = vmatprep.subr.bf16.mxu0 %v8184_v18 }
 0x25f   :  { %8187 = vmatpush3.bf16.msra.mxu0 %v8186_v21  ;;  %v1047_v21 = vld [vmem:[#allocation5 + $0x188] sm:$0xff] }
 0x311   :  { %v519_v22 = vpop.f32.mrb[4].mxu0 }
 0x312   :  { %v587_v23 = vadd.f32 %v586_v46, %v519_v22  ;;  %v521_v24 = vpop.f32.mrb[5].mxu0  ;;  %v748_v22 = vld [vmem:[#allocation2 + $0x8] sm:$0xff] }
 0x313   :  { %v589_v25 = vadd.f32 %v588_v47, %v521_v24  ;;  %v1030_v24 = vld [vmem:[#allocation5 + $0x100] sm:$0xff] }
 0x315   :  { %v525_v26 = vpop.f32.mrb[6].mxu0 }
 0x316   :  { %v591_v27 = vadd.f32 %v590_v48, %v525_v26  ;;  %v527_v28 = vpop.f32.mrb[7].mxu0  ;;  %v728_v48 = vrot.slane %v719_v41, %v10312_v42  ;;  %v1048_v26 = vld [vmem:[#allocation5 + $0x190] sm:$0xff]  ;;  %v1035_v41 = vld [vmem:[#allocation5 + $0x128] sm:$0xff] }
 0x317   :  { %v593_v30 = vadd.f32 %v592_v49, %v527_v28  ;;  %v833_v28 = vld [vmem:[#allocation2 + $0x10] sm:$0xff] }
 0x319   :  { %v531_v31 = vpop.f32.mrb[8].mxu0 }
 0x31a   :  { %v597_v32 = vadd.f32 %v596_v50, %v531_v31  ;;  %v533_v33 = vpop.f32.mrb[9].mxu0  ;;  %v1032_v31 = vld [vmem:[#allocation5 + $0x110] sm:$0xff] }
 0x31b   :  { %v599_v35 = vadd.f32 %v598_v51, %v533_v33  ;;  %v1050_v33 = vld [vmem:[#allocation5 + $0x1a0] sm:$0xff] }
 0x31d   :  { %v537_v36 = vpop.f32.mrb[10].mxu0 }
 0x31e   :  { %v601_v37 = vadd.f32 %v600_v52, %v537_v36  ;;  %v539_v38 = vpop.f32.mrb[11].mxu0  ;;  %v834_v36 = vld [vmem:[#allocation2 + $0x18] sm:$0xff] }
 0x31f   :  { %v603_v40 = vadd.f32 %v602_v53, %v539_v38 }
 0x321   :  { %v688_v43 = vpop.f32.mrb[12].mxu0 }
 0x322   :  { %v711_v44 = vadd.f32 %v688_v43, %v587_v23  ;;  %v690_v46 = vpop.f32.mrb[13].mxu0  ;;  %v8200_v23 = vpack.c.bf16 %v1047_v21, %v1046_v20  ;;  %v1052_v43 = vld [vmem:[#allocation5 + $0x1b0] sm:$0xff] }
 0x323   :  { %v712_v47 = vadd.f32 %v690_v46, %v589_v25  ;;  %v1031_v25 = vld [vmem:[#allocation5 + $0x108] sm:$0xff]  ;;  %v1060_v20 = vld [vmem:[#allocation5 + $0x1f0] sm:$0xff] }
 0x324   :  { %v731_v50 = vadd.f32 %v724_v45, %v711_v44  ;;  %v8202_v29 = vpack.c.bf16 %v1031_v25, %v1030_v24  ;;  %v1053_v44 = vld [vmem:[#allocation5 + $0x1b8] sm:$0xff] }
 0x325   :  { %v694_v49 = vpop.f32.mrb[14].mxu0  ;;  %v732_v53 = vadd.f32 %v728_v48, %v712_v47  ;;  %v8212_v46 = vpack.c.bf16 %v1053_v44, %v1052_v43  ;;  %v1036_v47 = vld [vmem:[#allocation5 + $0x130] sm:$0xff]  ;;  %v937_v24 = vld [vmem:[#allocation5 + $0x78] sm:$0xff] }
 0x326   :  { %v713_v51 = vadd.f32 %v694_v49, %v591_v27  ;;  %v696_v52 = vpop.f32.mrb[15].mxu0  ;;  %v739_v58 = vmax.f32 %v731_v50, 0.0  ;;  %v1049_v27 = vld [vmem:[#allocation5 + $0x198] sm:$0xff]  ;;  %v1054_v49 = vld [vmem:[#allocation5 + $0x1c0] sm:$0xff]  ;;  %v1055_v50 = vld [vmem:[#allocation5 + $0x1c8] sm:$0xff] }
 0x327   :  { %v714_v54 = vadd.f32 %v696_v52, %v593_v30  ;;  %v740_v62 = vmax.f32 %v732_v53, 0.0  ;;  %v8204_v30 = vpack.c.bf16 %v1049_v27, %v1048_v26  ;;  %v8216_v52 = vpack.c.bf16 %v1055_v50, %v1054_v49  ;;  %v1038_v53 = vld [vmem:[#allocation5 + $0x140] sm:$0xff]  ;;  %v1044_v27 = vld [vmem:[#allocation5 + $0x170] sm:$0xff]  ;;  %v8840_v44 = vld [vmem:[#allocation8 + $0x8] ss:$16 sps:$4 sm:$0xff]  }
 0x328   :  { %v733_v55 = vadd.f32 %v724_v45, %v713_v51  ;;  %v8837_v43 = vld [vmem:[#allocation8] ss:$16 sps:$4 sm:$0xff]  }
 0x329   :  { %v734_v56 = vadd.f32 %v728_v48, %v714_v54  ;;  %v700_v57 = vpop.f32.mrb[16].mxu0  ;;  %v1039_v54 = vld [vmem:[#allocation5 + $0x148] sm:$0xff] }
 0x32a   :  { %v741_v59 = vmax.f32 %v733_v55, 0.0  ;;  %v715_v60 = vadd.f32 %v700_v57, %v597_v32  ;;  %v702_v61 = vpop.f32.mrb[17].mxu0  ;;  %v1033_v32 = vld [vmem:[#allocation5 + $0x118] sm:$0xff]  ;;  %v8218_v55 = vpack.c.bf16 %v1039_v54, %v1038_v53  ;;  %v8851_v53 = vld [vmem:[#allocation8 + $0x44] ss:$16 sps:$4 sm:$0xff]  }
 0x32b   :  { %v742_v63 = vmax.f32 %v734_v56, 0.0  ;;  %v716_v1 = vadd.f32 %v702_v61, %v599_v35  ;;  %v1051_v35 = vld [vmem:[#allocation5 + $0x1a8] sm:$0xff]  ;;  %v948_v56 = vld [vmem:[#allocation5 + $0xd0] sm:$0xff]  ;;  %v949_v57 = vld [vmem:[#allocation5 + $0xd8] sm:$0xff] }
 0x32c   :  { %v8154_v2 = vpack.c.bf16 %v741_v59, %v739_v58  ;;  %v735_v5 = vadd.f32 %v724_v45, %v715_v60  ;;  %v8208_v38 = vpack.c.bf16 %v1051_v35, %v1050_v33  ;;  %v1056_v58 = vld [vmem:[#allocation5 + $0x1d0] sm:$0xff]  ;;  %v8188_v59 = vpack.c.bf16 %v949_v57, %v948_v56  ;;  %v1057_v60 = vld [vmem:[#allocation5 + $0x1d8] sm:$0xff] }
 0x32d   :  { %v706_v3 = vpop.f32.mrb[18].mxu0  ;;  %v8152_v4 = vpack.c.bf16 %v742_v63, %v740_v62  ;;  %v736_v8 = vadd.f32 %v728_v48, %v716_v1  ;;  %v932_v61 = vld [vmem:[#allocation5 + $0x50] sm:$0xff]  ;;  %v933_v62 = vld [vmem:[#allocation5 + $0x58] sm:$0xff]  ;;  %v8220_v63 = vpack.c.bf16 %v1057_v60, %v1056_v58 }
 0x32e   :  { %v717_v6 = vadd.f32 %v706_v3, %v601_v37  ;;  %v708_v7 = vpop.f32.mrb[19].mxu0  ;;  %v743_v12 = vmax.f32 %v735_v5, 0.0  ;;  %v8206_v37 = vpack.c.bf16 %v1033_v32, %v1032_v31  ;;  %v8190_v1 = vpack.c.bf16 %v933_v62, %v932_v61  ;;  %v1041_v3 = vld [vmem:[#allocation5 + $0x158] sm:$0xff]  ;;  %8189 = vmatprep.subr.bf16.mxu0 %v8188_v59  ;;  %v950_v5 = vld [vmem:[#allocation5 + $0xe0] sm:$0xff] }
 0x32f   :  { %v718_v9 = vadd.f32 %v708_v7, %v603_v40  ;;  %8153 = vmatprep.subr.bf16.mxu1 %v8152_v4  ;;  %v744_v15 = vmax.f32 %v736_v8, 0.0  ;;  %v1034_v40 = vld [vmem:[#allocation5 + $0x120] sm:$0xff]  ;;  %v8842_v31 = vld [vmem:[#allocation8 + $0xc] ss:$16 sps:$4 sm:$0xff]   ;;  %v8852_v56 = vld [vmem:[#allocation8 + $0x48] ss:$16 sps:$4 sm:$0xff]  }
 0x330   :  { %v737_v10 = vadd.f32 %v724_v45, %v717_v6  ;;  %8155 = vmatpush1.bf16.msra.mxu1 %v8154_v2  ;;  %v8210_v45 = vpack.c.bf16 %v1035_v41, %v1034_v40  ;;  %8191 = vmatpush3.bf16.msra.mxu0 %v8190_v1  ;;  %v951_v6 = vld [vmem:[#allocation5 + $0xe8] sm:$0xff]  ;;  %v1058_v7 = vld [vmem:[#allocation5 + $0x1e0] sm:$0xff] }
 0x331   :  { %v738_v11 = vadd.f32 %v728_v48, %v718_v9  ;;  %v1037_v48 = vld [vmem:[#allocation5 + $0x138] sm:$0xff]  ;;  %v8192_v8 = vpack.c.bf16 %v951_v6, %v950_v5  ;;  %v1059_v9 = vld [vmem:[#allocation5 + $0x1e8] sm:$0xff]  ;;  %v8857_v57 = vld [vmem:[#allocation8 + $0x64] ss:$16 sps:$4 sm:$0xff]  }
 0x332   :  { %v745_v14 = vmax.f32 %v737_v10, 0.0  ;;  %v8214_v51 = vpack.c.bf16 %v1037_v48, %v1036_v47  ;;  %v934_v10 = vld [vmem:[#allocation5 + $0x60] sm:$0xff]  ;;  %v8854_v54 = vld [vmem:[#allocation8 + $0x4c] ss:$16 sps:$4 sm:$0xff]   ;;  %v8858_v60 = vld [vmem:[#allocation8 + $0x68] ss:$16 sps:$4 sm:$0xff]  }
 0x333   :  { %v746_v16 = vmax.f32 %v738_v11, 0.0  ;;  %v935_v11 = vld [vmem:[#allocation5 + $0x68] sm:$0xff]  ;;  %8193 = vmatprep.subr.bf16.mxu0 %v8192_v8  ;;  %v8855_v59 = vld [vmem:[#allocation8 + $0x60] ss:$16 sps:$4 sm:$0xff]   ;;  %v8863_v61 = vld [vmem:[#allocation8 + $0x84] ss:$16 sps:$4 sm:$0xff]  }
 0x334   :  { %v8158_v17 = vpack.c.bf16 %v745_v14, %v743_v12  ;;  %v8224_v12 = vpack.c.bf16 %v1059_v9, %v1058_v7  ;;  %v8194_v14 = vpack.c.bf16 %v935_v11, %v934_v10  ;;  %v8860_v58 = vld [vmem:[#allocation8 + $0x6c] ss:$16 sps:$4 sm:$0xff]   ;;  %v8864_v1 = vld [vmem:[#allocation8 + $0x88] ss:$16 sps:$4 sm:$0xff]   ;;  %v8875_v6 = vld [vmem:[#allocation8 + $0xc4] ss:$16 sps:$4 sm:$0xff]  }
 0x335   :  { %v8156_v18 = vpack.c.bf16 %v746_v16, %v744_v15  ;;  %v1042_v15 = vld [vmem:[#allocation5 + $0x160] sm:$0xff]  ;;  %v1043_v16 = vld [vmem:[#allocation5 + $0x168] sm:$0xff] }
 0x336   :  { %8195 = vmatpush3.bf16.msra.mxu0 %v8194_v14  ;;  %v8866_v62 = vld [vmem:[#allocation8 + $0x8c] ss:$16 sps:$4 sm:$0xff]   ;;  %v8870_v5 = vld [vmem:[#allocation8 + $0xa8] ss:$16 sps:$4 sm:$0xff]   ;;  %v8873_v8 = vld [vmem:[#allocation8 + $0xc0] ss:$16 sps:$4 sm:$0xff]  }
 0x337   :  { %8157 = vmatprep.subr.bf16.mxu1 %v8156_v18  ;;  %v8878_v7 = vld [vmem:[#allocation8 + $0xcc] ss:$16 sps:$4 sm:$0xff]   ;;  %v8876_v9 = vld [vmem:[#allocation8 + $0xc8] ss:$16 sps:$4 sm:$0xff]   ;;  %v8881_v10 = vld [vmem:[#allocation8 + $0xe4] ss:$16 sps:$4 sm:$0xff]  }
 0x338   :  { %8159 = vmatpush1.bf16.msra.mxu1 %v8158_v17  ;;  %v8884_v11 = vld [vmem:[#allocation8 + $0xec] ss:$16 sps:$4 sm:$0xff]   ;;  %v8882_v14 = vld [vmem:[#allocation8 + $0xe8] ss:$16 sps:$4 sm:$0xff]  }
 0x339   :  { %8161 = vmatprep.subr.bf16.mxu1 %v8152_v4 }
 0x33b   :  { %7411 = vmatmul.mubr.msk.f32.vlgmr.msra.gmra.mrb[20].mxu1 %vm440_vm1, %v747_v19  ;;  %v953_v19 = vld [vmem:[#allocation5 + $0xf8] sm:$0xff] }
 0x33c   :  { %8163 = vmatpush1.bf16.msra.mxu1 %v8154_v2  ;;  %825 = vmatprep.mubr.f32.mxu1 %v9830_v13  ;;  %v1040_v2 = vld [vmem:[#allocation5 + $0x150] sm:$0xff] }
 0x33d   :  { %8165 = vmatprep.subr.bf16.mxu1 %v8156_v18  ;;  %v8222_v4 = vpack.c.bf16 %v1041_v3, %v1040_v2  ;;  %v952_v18 = vld [vmem:[#allocation5 + $0xf0] sm:$0xff]  ;;  %v8872_v3 = vld [vmem:[#allocation8 + $0xac] ss:$16 sps:$4 sm:$0xff]  }
 0x33e   :  { %v8196_v21 = vpack.c.bf16 %v953_v19, %v952_v18  ;;  %v8869_v2 = vld [vmem:[#allocation8 + $0xa4] ss:$16 sps:$4 sm:$0xff]  }
 0x33f   :  { %7412 = vmatmul.mubr.msk.f32.gmra.mrb[22].mxu1 %vm440_vm1, %v748_v22  ;;  %v1061_v22 = vld [vmem:[#allocation5 + $0x1f8] sm:$0xff] }
 0x340   :  { %8167 = vmatpush1.bf16.msra.mxu1 %v8158_v17  ;;  %905 = vmatprep.mubr.f32.mxu1 %v9830_v13  ;;  %v8226_v17 = vpack.c.bf16 %v1043_v16, %v1042_v15  ;;  %v8228_v25 = vpack.c.bf16 %v1061_v22, %v1060_v20  ;;  %v8887_v15 = vld [vmem:[#allocation8 + $0x204] ss:$16 sps:$4 sm:$0xff]   ;;  %v8890_v16 = vld [vmem:[#allocation8 + $0x20c] ss:$16 sps:$4 sm:$0xff]  }
 0x341   :  { %8201 = vmatprep.subr.bf16.mxu1 %v8200_v23  ;;  %v936_v23 = vld [vmem:[#allocation5 + $0x70] sm:$0xff]  ;;  %8197 = vmatprep.subr.bf16.mxu0 %v8196_v21 }
 0x342   :  { %v8198_v26 = vpack.c.bf16 %v937_v24, %v936_v23 }
 0x343   :  { %7413 = vmatmul.mubr.msk.f32.vlgmr.msra.gmra.mrb[24].mxu1 %vm440_vm1, %v833_v28  ;;  %v1045_v28 = vld [vmem:[#allocation5 + $0x178] sm:$0xff] }
 0x344   :  { %911 = vmatprep.mubr.f32.mxu1 %v9830_v13  ;;  %8203 = vmatpush3.bf16.msra.mxu1 %v8202_v29  ;;  %v8230_v29 = vpack.c.bf16 %v1045_v28, %v1044_v27 }
 0x345   :  { %8205 = vmatprep.subr.bf16.mxu1 %v8204_v30  ;;  %8199 = vmatpush3.bf16.msra.mxu0 %v8198_v26  ;;  %v8839_v30 = vld [vmem:[#allocation8 + $0x4] ss:$16 sps:$4 sm:$0xff]  }
 0x346   :  { %1332 = vmatprep.subr.bf16.mxu0 %v8839_v30 }
 0x347   :  { %7414 = vmatmul.mubr.msk.f32.gmra.mrb[26].mxu1 %vm440_vm1, %v834_v36 }
 0x348   :  { %8207 = vmatpush3.bf16.msra.mxu1 %v8206_v37 }
 0x349   :  { %8209 = vmatprep.subr.bf16.mxu1 %v8208_v38 }
 0x34c   :  { %8211 = vmatpush3.bf16.msra.mxu1 %v8210_v45  ;;  %v8845_v45 = vld [vmem:[#allocation8 + $0x24] ss:$16 sps:$4 sm:$0xff]  }
 0x34d   :  { %8213 = vmatprep.subr.bf16.mxu1 %v8212_v46  ;;  %v8848_v46 = vld [vmem:[#allocation8 + $0x2c] ss:$16 sps:$4 sm:$0xff]  }
 0x350   :  { %8215 = vmatpush3.bf16.msra.mxu1 %v8214_v51  ;;  %v8843_v51 = vld [vmem:[#allocation8 + $0x20] ss:$16 sps:$4 sm:$0xff]  }
 0x351   :  { %8217 = vmatprep.subr.bf16.mxu1 %v8216_v52  ;;  %v8846_v52 = vld [vmem:[#allocation8 + $0x28] ss:$16 sps:$4 sm:$0xff]  }
 0x354   :  { %8219 = vmatpush3.bf16.msra.mxu1 %v8218_v55  ;;  %v8849_v55 = vld [vmem:[#allocation8 + $0x40] ss:$16 sps:$4 sm:$0xff]  }
 0x355   :  { %8221 = vmatprep.subr.bf16.mxu1 %v8220_v63  ;;  %v8861_v63 = vld [vmem:[#allocation8 + $0x80] ss:$16 sps:$4 sm:$0xff]  }
 0x358   :  { %8223 = vmatpush3.bf16.msra.mxu1 %v8222_v4  ;;  %v8867_v4 = vld [vmem:[#allocation8 + $0xa0] ss:$16 sps:$4 sm:$0xff]  }
 0x359   :  { %8225 = vmatprep.subr.bf16.mxu1 %v8224_v12  ;;  %v8879_v12 = vld [vmem:[#allocation8 + $0xe0] ss:$16 sps:$4 sm:$0xff]  }
 0x35c   :  { %8227 = vmatpush3.bf16.msra.mxu1 %v8226_v17 }
 0x35d   :  { %8229 = vmatprep.subr.bf16.mxu1 %v8228_v25 }
 0x360   :  { %8231 = vmatpush3.bf16.msra.mxu1 %v8230_v29 }
 0x361   :  { %1375 = vmatprep.subr.bf16.mxu1 %v8842_v31  ;;  %v8885_v31 = vld [vmem:[#allocation8 + $0x200] ss:$16 sps:$4 sm:$0xff]  }
 0x40e   :  { %v821_v32 = vpop.f32.mrb[20].mxu1 }
 0x40f   :  { %v823_v33 = vpop.f32.mrb[21].mxu1 }
 0x412   :  { %v827_v35 = vpop.f32.mrb[22].mxu1 }
 0x413   :  { %v829_v36 = vpop.f32.mrb[23].mxu1 }
 0x416   :  { %v907_v37 = vpop.f32.mrb[24].mxu1 }
 0x417   :  { %v918_v38 = vmax.f32 %v821_v32, %v907_v37  ;;  %v909_v40 = vpop.f32.mrb[25].mxu1  ;;  %v8888_v32 = vld [vmem:[#allocation8 + $0x208] ss:$16 sps:$4 sm:$0xff]   ;;  %v8891_v37 = vld [vmem:[#allocation8 + $0x220] ss:$16 sps:$4 sm:$0xff]  }
 0x418   :  { %v919_v41 = vmax.f32 %v823_v33, %v909_v40  ;;  %v8899_v40 = vld [vmem:[#allocation8 + $0x244] ss:$16 sps:$4 sm:$0xff]  }
 0x41a   :  { %v913_v47 = vpop.f32.mrb[26].mxu1  ;;  %1018 = vmatprep.mubr.f32.mxu0 %v919_v41  ;;  %1126 = vmatprep.mubr.f32.mxu1 %v919_v41  ;;  %v8902_v41 = vld [vmem:[#allocation8 + $0x24c] ss:$16 sps:$4 sm:$0xff]  }
 0x41b   :  { %v920_v48 = vmax.f32 %v827_v35, %v913_v47  ;;  %v915_v49 = vpop.f32.mrb[27].mxu1  ;;  %1019 = vmatmul.mubr.f32.vlgmr.msra.gmra.mrb[20].mxu0 %v918_v38  ;;  %1127 = vmatmul.mubr.f32.vlgmr.msra.gmra.mrb[28].mxu1 %v918_v38  ;;  %v8893_v35 = vld [vmem:[#allocation8 + $0x224] ss:$16 sps:$4 sm:$0xff]   ;;  %v8894_v38 = vld [vmem:[#allocation8 + $0x228] ss:$16 sps:$4 sm:$0xff]  }
 0x41c   :  { %v921_v50 = vmax.f32 %v829_v36, %v915_v49  ;;  %1333 = vmatpush1.bf16.msra.mxu0 %v8837_v43  ;;  %1376 = vmatpush1.bf16.msra.mxu1 %v8840_v44  ;;  %v8896_v36 = vld [vmem:[#allocation8 + $0x22c] ss:$16 sps:$4 sm:$0xff]   ;;  %v8897_v43 = vld [vmem:[#allocation8 + $0x240] ss:$16 sps:$4 sm:$0xff]   ;;  %v8900_v44 = vld [vmem:[#allocation8 + $0x248] ss:$16 sps:$4 sm:$0xff]  }
 0x41d   :  { %1334 = vmatprep.subr.bf16.mxu0 %v8845_v45  ;;  %1377 = vmatprep.subr.bf16.mxu1 %v8848_v46  ;;  %v8905_v45 = vld [vmem:[#allocation8 + $0x264] ss:$16 sps:$4 sm:$0xff]   ;;  %v8908_v46 = vld [vmem:[#allocation8 + $0x26c] ss:$16 sps:$4 sm:$0xff]   ;;  %v8903_v47 = vld [vmem:[#allocation8 + $0x260] ss:$16 sps:$4 sm:$0xff]  }
 0x41e   :  { %1023 = vmatprep.mubr.f32.mxu0 %v921_v50  ;;  %1131 = vmatprep.mubr.f32.mxu1 %v921_v50  ;;  %v8911_v49 = vld [vmem:[#allocation8 + $0x284] ss:$16 sps:$4 sm:$0xff]   ;;  %v8914_v50 = vld [vmem:[#allocation8 + $0x28c] ss:$16 sps:$4 sm:$0xff]  }
 0x41f   :  { %1024 = vmatmul.mubr.f32.gmra.mrb[22].mxu0 %v920_v48  ;;  %1132 = vmatmul.mubr.f32.gmra.mrb[30].mxu1 %v920_v48  ;;  %v8906_v48 = vld [vmem:[#allocation8 + $0x268] ss:$16 sps:$4 sm:$0xff]  }
 0x420   :  { %1335 = vmatpush1.bf16.msra.mxu0 %v8843_v51  ;;  %1378 = vmatpush1.bf16.msra.mxu1 %v8846_v52  ;;  %v8909_v51 = vld [vmem:[#allocation8 + $0x280] ss:$16 sps:$4 sm:$0xff]   ;;  %v8912_v52 = vld [vmem:[#allocation8 + $0x288] ss:$16 sps:$4 sm:$0xff]  }
 0x421   :  { %1336 = vmatprep.subr.bf16.mxu0 %v8851_v53  ;;  %1379 = vmatprep.subr.bf16.mxu1 %v8854_v54  ;;  %v8917_v53 = vld [vmem:[#allocation8 + $0x2a4] ss:$16 sps:$4 sm:$0xff]   ;;  %v8920_v54 = vld [vmem:[#allocation8 + $0x2ac] ss:$16 sps:$4 sm:$0xff]  }
 0x422   :  { %1364 = vmatprep.mubr.bf16.mxu0 %v9829_v0  ;;  %1407 = vmatprep.mubr.bf16.mxu1 %v9829_v0 }
 0x424   :  { %1337 = vmatpush1.bf16.msra.mxu0 %v8849_v55  ;;  %1380 = vmatpush1.bf16.msra.mxu1 %v8852_v56  ;;  %v8915_v55 = vld [vmem:[#allocation8 + $0x2a0] ss:$16 sps:$4 sm:$0xff]   ;;  %v8918_v56 = vld [vmem:[#allocation8 + $0x2a8] ss:$16 sps:$4 sm:$0xff]  }
 0x425   :  { %1338 = vmatprep.subr.bf16.mxu0 %v8857_v57  ;;  %1381 = vmatprep.subr.bf16.mxu1 %v8860_v58  ;;  %v8923_v57 = vld [vmem:[#allocation8 + $0x2c4] ss:$16 sps:$4 sm:$0xff]   ;;  %v8926_v58 = vld [vmem:[#allocation8 + $0x2cc] ss:$16 sps:$4 sm:$0xff]  }
 0x428   :  { %1339 = vmatpush1.bf16.msra.mxu0 %v8855_v59  ;;  %1382 = vmatpush1.bf16.msra.mxu1 %v8858_v60  ;;  %v8921_v59 = vld [vmem:[#allocation8 + $0x2c0] ss:$16 sps:$4 sm:$0xff]   ;;  %v8924_v60 = vld [vmem:[#allocation8 + $0x2c8] ss:$16 sps:$4 sm:$0xff]  }
 0x429   :  { %1340 = vmatprep.subr.bf16.mxu0 %v8863_v61  ;;  %1383 = vmatprep.subr.bf16.mxu1 %v8866_v62  ;;  %v8929_v61 = vld [vmem:[#allocation8 + $0x2e4] ss:$16 sps:$4 sm:$0xff]   ;;  %v8932_v62 = vld [vmem:[#allocation8 + $0x2ec] ss:$16 sps:$4 sm:$0xff]  }
 0x42c   :  { %1341 = vmatpush1.bf16.msra.mxu0 %v8861_v63  ;;  %1384 = vmatpush1.bf16.msra.mxu1 %v8864_v1  ;;  %v8927_v63 = vld [vmem:[#allocation8 + $0x2e0] ss:$16 sps:$4 sm:$0xff]   ;;  %v8930_v1 = vld [vmem:[#allocation8 + $0x2e8] ss:$16 sps:$4 sm:$0xff]  }
 0x42d   :  { %1342 = vmatprep.subr.bf16.mxu0 %v8869_v2  ;;  %1385 = vmatprep.subr.bf16.mxu1 %v8872_v3  ;;  %v8935_v2 = vld [vmem:[#allocation8 + $0x104] ss:$16 sps:$4 sm:$0xff]   ;;  %v8933_v3 = vld [vmem:[#allocation8 + $0x100] ss:$16 sps:$4 sm:$0xff]  }
 0x430   :  { %1343 = vmatpush1.bf16.msra.mxu0 %v8867_v4  ;;  %1386 = vmatpush1.bf16.msra.mxu1 %v8870_v5  ;;  %v8938_v4 = vld [vmem:[#allocation8 + $0x124] ss:$16 sps:$4 sm:$0xff]   ;;  %v8936_v5 = vld [vmem:[#allocation8 + $0x120] ss:$16 sps:$4 sm:$0xff]  }
 0x431   :  { %1344 = vmatprep.subr.bf16.mxu0 %v8875_v6  ;;  %1387 = vmatprep.subr.bf16.mxu1 %v8878_v7  ;;  %v8941_v6 = vld [vmem:[#allocation8 + $0x144] ss:$16 sps:$4 sm:$0xff]   ;;  %v8939_v7 = vld [vmem:[#allocation8 + $0x140] ss:$16 sps:$4 sm:$0xff]  }
 0x434   :  { %1345 = vmatpush1.bf16.msra.mxu0 %v8873_v8  ;;  %1388 = vmatpush1.bf16.msra.mxu1 %v8876_v9  ;;  %v8944_v8 = vld [vmem:[#allocation8 + $0x164] ss:$16 sps:$4 sm:$0xff]   ;;  %v8942_v9 = vld [vmem:[#allocation8 + $0x160] ss:$16 sps:$4 sm:$0xff]  }
 0x435   :  { %1346 = vmatprep.subr.bf16.mxu0 %v8881_v10  ;;  %1389 = vmatprep.subr.bf16.mxu1 %v8884_v11  ;;  %v8947_v10 = vld [vmem:[#allocation8 + $0x184] ss:$16 sps:$4 sm:$0xff]   ;;  %v8945_v11 = vld [vmem:[#allocation8 + $0x180] ss:$16 sps:$4 sm:$0xff]  }
 0x438   :  { %1347 = vmatpush1.bf16.msra.mxu0 %v8879_v12  ;;  %1390 = vmatpush1.bf16.msra.mxu1 %v8882_v14  ;;  %v8950_v12 = vld [vmem:[#allocation8 + $0x1a4] ss:$16 sps:$4 sm:$0xff]   ;;  %v8948_v14 = vld [vmem:[#allocation8 + $0x1a0] ss:$16 sps:$4 sm:$0xff]  }
 0x439   :  { %1644 = vmatprep.subr.bf16.mxu0 %v8887_v15  ;;  %1687 = vmatprep.subr.bf16.mxu1 %v8890_v16  ;;  %v8953_v15 = vld [vmem:[#allocation8 + $0x1c4] ss:$16 sps:$4 sm:$0xff]   ;;  %v8951_v16 = vld [vmem:[#allocation8 + $0x1c0] ss:$16 sps:$4 sm:$0xff]  }
 0x4ee   :  { %v7942_v17 = vpop.f32.mrb[20].mxu0  ;;  %v7980_v18 = vpop.f32.mrb[28].mxu1 }
 0x4ef   :  { %v7943_v19 = vpop.f32.mrb[21].mxu0  ;;  %v7981_v20 = vpop.f32.mrb[29].mxu1 }
 0x4f0   :  { %v7944_v21 = vadd.f32 %v7943_v19, %v7942_v17  ;;  %v7982_v22 = vadd.f32 %v7981_v20, %v7980_v18  ;;  %v8956_v17 = vld [vmem:[#allocation8 + $0x1e4] ss:$16 sps:$4 sm:$0xff]   ;;  %v8954_v18 = vld [vmem:[#allocation8 + $0x1e0] ss:$16 sps:$4 sm:$0xff]  }
 0x4f2   :  { %v1137_v23 = vmax.f32 %v7944_v21, %v7982_v22  ;;  %v7945_v24 = vpop.f32.mrb[22].mxu0  ;;  %v7983_v25 = vpop.f32.mrb[30].mxu1 }
 0x4f3   :  { %v7946_v26 = vpop.f32.mrb[23].mxu0  ;;  %v7984_v27 = vpop.f32.mrb[31].mxu1 }
 0x4f4   :  { %v7947_v28 = vadd.f32 %v7946_v26, %v7945_v24  ;;  %v7985_v29 = vadd.f32 %v7984_v27, %v7983_v25 }
 0x4f6   :  { %v1138_v30 = vmax.f32 %v7947_v28, %v7985_v29 }
 0x4f8   :  { %v10325_v33 = vpack.c.bf16 %v1138_v30, %v1137_v23 }
 0x4fa   :  { %1365 = vmatmul.mubr.bf16.vlgmr.msra.gmra.mrb[24].mxu0 %v10325_v33  ;;  %1408 = vmatmul.mubr.bf16.vlgmr.msra.gmra.mrb[32].mxu1 %v10325_v33 }
 0x4fb   :  { %1645 = vmatpush1.bf16.msra.mxu0 %v8885_v31  ;;  %1688 = vmatpush1.bf16.msra.mxu1 %v8888_v32  ;;  %v1730_v31 = vld [vmem:[#allocation7] sm:$0xff]  ;;  %v8959_v32 = vld [vmem:[#allocation8 + $0x10c] ss:$16 sps:$4 sm:$0xff]  }
 0x4fc   :  { %1646 = vmatprep.subr.bf16.mxu0 %v8893_v35  ;;  %1689 = vmatprep.subr.bf16.mxu1 %v8896_v36  ;;  %v1731_v35 = vld [vmem:[#allocation7 + $0x8] sm:$0xff] }
 0x4fd   :  { %1676 = vmatprep.mubr.bf16.mxu0 %v9829_v0  ;;  %1719 = vmatprep.mubr.bf16.mxu1 %v9829_v0  ;;  %v8957_v36 = vld [vmem:[#allocation8 + $0x108] ss:$16 sps:$4 sm:$0xff]  }
 0x4ff   :  { %1647 = vmatpush1.bf16.msra.mxu0 %v8891_v37  ;;  %1690 = vmatpush1.bf16.msra.mxu1 %v8894_v38  ;;  %v8962_v37 = vld [vmem:[#allocation8 + $0x12c] ss:$16 sps:$4 sm:$0xff]   ;;  %v8960_v38 = vld [vmem:[#allocation8 + $0x128] ss:$16 sps:$4 sm:$0xff]  }
 0x500   :  { %1648 = vmatprep.subr.bf16.mxu0 %v8899_v40  ;;  %1691 = vmatprep.subr.bf16.mxu1 %v8902_v41  ;;  %v8965_v40 = vld [vmem:[#allocation8 + $0x14c] ss:$16 sps:$4 sm:$0xff]   ;;  %v8963_v41 = vld [vmem:[#allocation8 + $0x148] ss:$16 sps:$4 sm:$0xff]  }
 0x503   :  { %1649 = vmatpush1.bf16.msra.mxu0 %v8897_v43  ;;  %1692 = vmatpush1.bf16.msra.mxu1 %v8900_v44  ;;  %v8968_v43 = vld [vmem:[#allocation8 + $0x16c] ss:$16 sps:$4 sm:$0xff]   ;;  %v8966_v44 = vld [vmem:[#allocation8 + $0x168] ss:$16 sps:$4 sm:$0xff]  }
 0x504   :  { %1650 = vmatprep.subr.bf16.mxu0 %v8905_v45  ;;  %1693 = vmatprep.subr.bf16.mxu1 %v8908_v46  ;;  %v8971_v45 = vld [vmem:[#allocation8 + $0x18c] ss:$16 sps:$4 sm:$0xff]   ;;  %v8969_v46 = vld [vmem:[#allocation8 + $0x188] ss:$16 sps:$4 sm:$0xff]  }
 0x507   :  { %1651 = vmatpush1.bf16.msra.mxu0 %v8903_v47  ;;  %1694 = vmatpush1.bf16.msra.mxu1 %v8906_v48 }
 0x508   :  { %1652 = vmatprep.subr.bf16.mxu0 %v8911_v49  ;;  %1695 = vmatprep.subr.bf16.mxu1 %v8914_v50  ;;  %v8974_v49 = vld [vmem:[#allocation8 + $0x1ac] ss:$16 sps:$4 sm:$0xff]  }
 0x50b   :  { %1653 = vmatpush1.bf16.msra.mxu0 %v8909_v51  ;;  %1696 = vmatpush1.bf16.msra.mxu1 %v8912_v52 }
 0x50c   :  { %1654 = vmatprep.subr.bf16.mxu0 %v8917_v53  ;;  %1697 = vmatprep.subr.bf16.mxu1 %v8920_v54 }
 0x50f   :  { %1655 = vmatpush1.bf16.msra.mxu0 %v8915_v55  ;;  %1698 = vmatpush1.bf16.msra.mxu1 %v8918_v56 }
 0x510   :  { %1656 = vmatprep.subr.bf16.mxu0 %v8923_v57  ;;  %1699 = vmatprep.subr.bf16.mxu1 %v8926_v58  ;;  %v8972_v57 = vld [vmem:[#allocation8 + $0x1a8] ss:$16 sps:$4 sm:$0xff]  }
 0x513   :  { %1657 = vmatpush1.bf16.msra.mxu0 %v8921_v59  ;;  %1700 = vmatpush1.bf16.msra.mxu1 %v8924_v60  ;;  %v8977_v60 = vld [vmem:[#allocation8 + $0x1cc] ss:$16 sps:$4 sm:$0xff]  }
 0x514   :  { %1658 = vmatprep.subr.bf16.mxu0 %v8929_v61  ;;  %1701 = vmatprep.subr.bf16.mxu1 %v8932_v62  ;;  %v8975_v61 = vld [vmem:[#allocation8 + $0x1c8] ss:$16 sps:$4 sm:$0xff]   ;;  %v2139_v62 = vld [vmem:[#allocation7 + $0x10] sm:$0xff] }
 0x517   :  { %1659 = vmatpush1.bf16.msra.mxu0 %v8927_v63  ;;  %1702 = vmatpush1.bf16.msra.mxu1 %v8930_v1  ;;  %v8980_v63 = vld [vmem:[#allocation8 + $0x1ec] ss:$16 sps:$4 sm:$0xff]   ;;  %v8978_v1 = vld [vmem:[#allocation8 + $0x1e8] ss:$16 sps:$4 sm:$0xff]  }
 0x518   :  { %2052 = vmatprep.subr.bf16.mxu1 %v8935_v2  ;;  %v2140_v2 = vld [vmem:[#allocation7 + $0x18] sm:$0xff] }
 0x51a   :  { %1677 = vmatmul.mubr.bf16.vlgmr.msra.gmra.mrb[28].mxu0 %v10325_v33  ;;  %1720 = vmatmul.mubr.bf16.vlgmr.msra.gmra.mrb[36].mxu1 %v10325_v33 }
 0x51b   :  { %2053 = vmatpush1.bf16.msra.mxu1 %v8933_v3  ;;  %2084 = vmatprep.mubr.bf16.mxu1 %v9829_v0 }
 0x51c   :  { %2054 = vmatprep.subr.bf16.mxu1 %v8938_v4  ;;  %1802 = vmatprep.mubr.f32.mxu0 %v9830_v13 }
 0x51f   :  { %2055 = vmatpush1.bf16.msra.mxu1 %v8936_v5 }
 0x520   :  { %2056 = vmatprep.subr.bf16.mxu1 %v8941_v6 }
 0x523   :  { %2057 = vmatpush1.bf16.msra.mxu1 %v8939_v7 }
 0x524   :  { %2058 = vmatprep.subr.bf16.mxu1 %v8944_v8 }
 0x527   :  { %2059 = vmatpush1.bf16.msra.mxu1 %v8942_v9 }
 0x528   :  { %2060 = vmatprep.subr.bf16.mxu1 %v8947_v10 }
 0x52b   :  { %2061 = vmatpush1.bf16.msra.mxu1 %v8945_v11 }
 0x52c   :  { %2062 = vmatprep.subr.bf16.mxu1 %v8950_v12 }
 0x52f   :  { %2063 = vmatpush1.bf16.msra.mxu1 %v8948_v14 }
 0x530   :  { %2064 = vmatprep.subr.bf16.mxu1 %v8953_v15 }
 0x533   :  { %2065 = vmatpush1.bf16.msra.mxu1 %v8951_v16 }
 0x534   :  { %2066 = vmatprep.subr.bf16.mxu1 %v8956_v17 }
 0x537   :  { %2067 = vmatpush1.bf16.msra.mxu1 %v8954_v18 }
 0x53a   :  { %2085 = vmatmul.mubr.bf16.vlgmr.msra.gmra.mrb[40].mxu1 %v10325_v33 }
 0x53b   :  { %2211 = vmatprep.mubr.f32.mxu1 %v9830_v13 }
 0x5cd   :  { %v1366_v19 = vpop.f32.mrb[24].mxu0  ;;  %v1409_v20 = vpop.f32.mrb[32].mxu1 }
 0x5ce   :  { %v1368_v21 = vpop.f32.mrb[25].mxu0  ;;  %v1411_v22 = vpop.f32.mrb[33].mxu1 }
 0x5cf   :  { %v1370_v23 = vpop.f32.mrb[26].mxu0  ;;  %v1413_v24 = vpop.f32.mrb[34].mxu1 }
 0x5d0   :  { %v8234_v25 = vpack.c.bf16 %v1370_v23, %v1366_v19  ;;  %v8238_v26 = vpack.c.bf16 %v1413_v24, %v1409_v20  ;;  %v1372_v27 = vpop.f32.mrb[27].mxu0  ;;  %v1415_v28 = vpop.f32.mrb[35].mxu1  ;;  %v2309_v19 = vld [vmem:[#allocation10] sm:$0xf] }
 0x5d1   :  { %v8232_v29 = vpack.c.bf16 %v1372_v27, %v1368_v21  ;;  %v8236_v30 = vpack.c.bf16 %v1415_v28, %v1411_v22  ;;  %v2314_v22 = vrot.slane %v2309_v19, %v10306_v39 }
 0x5d3   :  { %8233 = vmatprep.subr.bf16.mxu0 %v8232_v29 }
 0x5d4   :  { %8235 = vmatpush1.bf16.msra.mxu0 %v8234_v25  ;;  %v2318_v25 = vrot.slane %v2309_v19, %v10312_v42 }
 0x5d5   :  { %8237 = vmatprep.subr.bf16.mxu0 %v8236_v30 }
 0x5d7   :  { %7479 = vmatmul.mubr.msk.f32.vlgmr.msra.gmra.mrb[32].mxu0 %vm307_vm0, %v1730_v31 }
 0x5d8   :  { %8239 = vmatpush1.bf16.msra.mxu0 %v8238_v26  ;;  %1808 = vmatprep.mubr.f32.mxu0 %v9830_v13 }
 0x5d9   :  { %2095 = vmatprep.subr.bf16.mxu0 %v8959_v32 }
 0x5db   :  { %7480 = vmatmul.mubr.msk.f32.gmra.mrb[34].mxu0 %vm307_vm0, %v1731_v35 }
 0x5dc   :  { %1879 = vmatprep.mubr.f32.mxu0 %v9830_v13 }
 0x5df   :  { %7481 = vmatmul.mubr.msk.f32.vlgmr.msra.gmra.mrb[36].mxu0 %vm307_vm0, %v1730_v31 }
 0x5e0   :  { %2096 = vmatpush1.bf16.msra.mxu0 %v8957_v36  ;;  %1885 = vmatprep.mubr.f32.mxu0 %v9830_v13 }
 0x5e1   :  { %2097 = vmatprep.subr.bf16.mxu0 %v8962_v37 }
 0x5e3   :  { %7482 = vmatmul.mubr.msk.f32.gmra.mrb[38].mxu0 %vm307_vm0, %v1731_v35 }
 0x5e4   :  { %2098 = vmatpush1.bf16.msra.mxu0 %v8960_v38  ;;  %2127 = vmatprep.mubr.bf16.mxu0 %v9829_v0 }
 0x5e5   :  { %2099 = vmatprep.subr.bf16.mxu0 %v8965_v40 }
 0x5e8   :  { %2100 = vmatpush1.bf16.msra.mxu0 %v8963_v41 }
 0x5e9   :  { %2101 = vmatprep.subr.bf16.mxu0 %v8968_v43  ;;  %v2645_v43 = vld [vmem:[#allocation13 + $0x8] sm:$0xff] }
 0x5ec   :  { %2102 = vmatpush1.bf16.msra.mxu0 %v8966_v44  ;;  %v2647_v44 = vld [vmem:[#allocation13 + $0x18] sm:$0xff] }
 0x5ed   :  { %v1678_v47 = vpop.f32.mrb[28].mxu0  ;;  %v1721_v48 = vpop.f32.mrb[36].mxu1  ;;  %2103 = vmatprep.subr.bf16.mxu0 %v8971_v45 }
 0x5ee   :  { %v1680_v50 = vpop.f32.mrb[29].mxu0  ;;  %v1723_v51 = vpop.f32.mrb[37].mxu1 }
 0x5ef   :  { %v1682_v52 = vpop.f32.mrb[30].mxu0  ;;  %v1725_v53 = vpop.f32.mrb[38].mxu1 }
 0x5f0   :  { %v8242_v54 = vpack.c.bf16 %v1682_v52, %v1678_v47  ;;  %v8246_v55 = vpack.c.bf16 %v1725_v53, %v1721_v48  ;;  %v1684_v56 = vpop.f32.mrb[31].mxu0  ;;  %v1727_v0 = vpop.f32.mrb[39].mxu1  ;;  %2104 = vmatpush1.bf16.msra.mxu0 %v8969_v46 }
 0x5f1   :  { %v8240_v58 = vpack.c.bf16 %v1684_v56, %v1680_v50  ;;  %v8244_v59 = vpack.c.bf16 %v1727_v0, %v1723_v51  ;;  %2105 = vmatprep.subr.bf16.mxu0 %v8974_v49  ;;  %v2646_v56 = vld [vmem:[#allocation13 + $0x10] sm:$0xff]  ;;  %v2321_v0 = vsub.s32 2, %v10303_v34 }
 0x5f3   :  { %8241 = vmatprep.subr.bf16.mxu1 %v8240_v58  ;;  %v2651_v58 = vld [vmem:[#allocation13 + $0x38] sm:$0xff] }
 0x5f4   :  { %2106 = vmatpush1.bf16.msra.mxu0 %v8972_v57  ;;  %8243 = vmatpush1.bf16.msra.mxu1 %v8242_v54  ;;  %v8264_v54 = vpack.c.bf16 %v2647_v44, %v2645_v43  ;;  %v2649_v57 = vld [vmem:[#allocation13 + $0x28] sm:$0xff]  ;;  %v2918_v44 = vld [vmem:[#allocation13 + $0x418] sm:$0xff] }
 0x5f5   :  { %2107 = vmatprep.subr.bf16.mxu0 %v8977_v60  ;;  %v10359_v60 = vld [vmem:[#allocation11] sm:$0xff] }
 0x5f7   :  { %7515 = vmatmul.mubr.msk.f32.vlgmr.msra.gmra.mrb[44].mxu1 %vm307_vm0, %v2139_v62 }
 0x5f8   :  { %2108 = vmatpush1.bf16.msra.mxu0 %v8975_v61  ;;  %2217 = vmatprep.mubr.f32.mxu1 %v9830_v13  ;;  %v10361_v61 = vld [vmem:[#allocation11 + $0x8] sm:$0xff] }
 0x5f9   :  { %2109 = vmatprep.subr.bf16.mxu0 %v8980_v63 }
 0x5fb   :  { %7516 = vmatmul.mubr.msk.f32.gmra.mrb[46].mxu1 %vm307_vm0, %v2140_v2 }
 0x5fc   :  { %2110 = vmatpush1.bf16.msra.mxu0 %v8978_v1  ;;  %2415 = vmatprep.mubr.f32.mxu1 %v9830_v13  ;;  %v8268_v1 = vpack.c.bf16 %v2651_v58, %v2649_v57  ;;  %v2666_v57 = vld [vmem:[#allocation13 + $0xb0] sm:$0xff]  ;;  %v2669_v58 = vld [vmem:[#allocation13 + $0xc8] sm:$0xff] }
 0x5fd   :  { %8245 = vmatprep.subr.bf16.mxu0 %v8244_v59  ;;  %v2325_v59 = vsub.s32 3, %v10303_v34  ;;  %v5214_v34 = vld [vmem:[#allocation20] sm:$0xff] }
 0x5ff   :  { %2128 = vmatmul.mubr.bf16.vlgmr.msra.gmra.mrb[40].mxu0 %v10325_v33 }
 0x600   :  { %8247 = vmatpush1.bf16.msra.mxu0 %v8246_v55  ;;  %2288 = vmatprep.mubr.f32.mxu0 %v9830_v13  ;;  %v2644_v55 = vld [vmem:[#allocation13] sm:$0xff] }
 0x607   :  { %7517 = vmatmul.mubr.msk.f32.vlgmr.msra.gmra.mrb[44].mxu0 %vm307_vm0, %v2139_v62  ;;  %v8266_v62 = vpack.c.bf16 %v2646_v56, %v2644_v55  ;;  %v2664_v56 = vld [vmem:[#allocation13 + $0xa0] sm:$0xff] }
 0x608   :  { %2294 = vmatprep.mubr.f32.mxu0 %v9830_v13 }
 0x60b   :  { %7518 = vmatmul.mubr.msk.f32.gmra.mrb[46].mxu0 %vm307_vm0, %v2140_v2  ;;  %v2648_v2 = vld [vmem:[#allocation13 + $0x20] sm:$0xff] }
 0x60c   :  { %2562 = vmatprep.mubr.f32.mxu0 %v9830_v13 }
 0x60d   :  { %v2086_v3 = vpop.f32.mrb[40].mxu1 }
 0x60e   :  { %v2088_v4 = vpop.f32.mrb[41].mxu1 }
 0x60f   :  { %v2090_v5 = vpop.f32.mrb[42].mxu1 }
 0x610   :  { %v2092_v6 = vpop.f32.mrb[43].mxu1 }
 0x6aa   :  { %v1804_v7 = vpop.f32.mrb[32].mxu0 }
 0x6ab   :  { %v2087_v8 = vadd.f32 %v2086_v3, %v1804_v7  ;;  %v1806_v9 = vpop.f32.mrb[33].mxu0  ;;  %v2650_v3 = vld [vmem:[#allocation13 + $0x30] sm:$0xff]  ;;  %v2653_v7 = vld [vmem:[#allocation13 + $0x48] sm:$0xff] }
 0x6ac   :  { %v2089_v10 = vadd.f32 %v2088_v4, %v1806_v9 }
 0x6ae   :  { %v1810_v33 = vpop.f32.mrb[34].mxu0 }
 0x6af   :  { %v2091_v11 = vadd.f32 %v2090_v5, %v1810_v33  ;;  %v1812_v12 = vpop.f32.mrb[35].mxu0  ;;  %v2322_v5 = vrot.slane %v2309_v19, %v2321_v0  ;;  %v8270_v33 = vpack.c.bf16 %v2650_v3, %v2648_v2  ;;  %v2919_v2 = vld [vmem:[#allocation13 + $0x420] sm:$0xff]  ;;  %v2921_v3 = vld [vmem:[#allocation13 + $0x430] sm:$0xff] }
 0x6b0   :  { %v2093_v14 = vadd.f32 %v2092_v6, %v1812_v12 }
 0x6b2   :  { %v1881_v15 = vpop.f32.mrb[36].mxu0 }
 0x6b3   :  { %v1883_v16 = vpop.f32.mrb[37].mxu0 }
 0x6b6   :  { %v1887_v17 = vpop.f32.mrb[38].mxu0 }
 0x6b7   :  { %v1889_v18 = vpop.f32.mrb[39].mxu0 }
 0x6ca   :  { %v2213_v20 = vpop.f32.mrb[44].mxu1 }
 0x6cb   :  { %v2301_v21 = vadd.f32 %v2213_v20, %v2087_v8  ;;  %v2215_v23 = vpop.f32.mrb[45].mxu1  ;;  %v2655_v8 = vld [vmem:[#allocation13 + $0x58] sm:$0xff]  ;;  %v2657_v20 = vld [vmem:[#allocation13 + $0x68] sm:$0xff] }
 0x6cc   :  { %v2302_v24 = vadd.f32 %v2215_v23, %v2089_v10  ;;  %v2326_v10 = vrot.slane %v2309_v19, %v2325_v59  ;;  %v8272_v12 = vpack.c.bf16 %v2655_v8, %v2653_v7  ;;  %v2659_v19 = vld [vmem:[#allocation13 + $0x78] sm:$0xff]  ;;  %v2668_v8 = vld [vmem:[#allocation13 + $0xc0] sm:$0xff] }
 0x6cd   :  { %v2331_v27 = vadd.f32 %v2314_v22, %v2301_v21 }
 0x6ce   :  { %v2219_v26 = vpop.f32.mrb[46].mxu1  ;;  %v2332_v30 = vadd.f32 %v2318_v25, %v2302_v24 }
 0x6cf   :  { %v2305_v28 = vadd.f32 %v2219_v26, %v2091_v11  ;;  %v2221_v29 = vpop.f32.mrb[47].mxu1  ;;  %v2339_v37 = vmax.f32 %v2331_v27, 0.0  ;;  %v8276_v26 = vpack.c.bf16 %v2659_v19, %v2657_v20  ;;  %v2656_v27 = vld [vmem:[#allocation13 + $0x60] sm:$0xff]  ;;  %v2674_v19 = vld [vmem:[#allocation13 + $0xf0] sm:$0xff] }
 0x6d0   :  { %v2306_v31 = vadd.f32 %v2221_v29, %v2093_v14  ;;  %v2340_v45 = vmax.f32 %v2332_v30, 0.0  ;;  %v2652_v14 = vld [vmem:[#allocation13 + $0x40] sm:$0xff] }
 0x6d1   :  { %v2335_v32 = vadd.f32 %v2314_v22, %v2305_v28  ;;  %v2658_v28 = vld [vmem:[#allocation13 + $0x70] sm:$0xff]  ;;  %v2672_v20 = vld [vmem:[#allocation13 + $0xe0] sm:$0xff] }
 0x6d2   :  { %v2336_v35 = vadd.f32 %v2318_v25, %v2306_v31  ;;  %v2129_v36 = vpop.f32.mrb[40].mxu0  ;;  %v2661_v31 = vld [vmem:[#allocation13 + $0x88] sm:$0xff] }
 0x6d3   :  { %v2343_v38 = vmax.f32 %v2335_v32, 0.0  ;;  %v2130_v40 = vadd.f32 %v2129_v36, %v1881_v15  ;;  %v2131_v41 = vpop.f32.mrb[41].mxu0  ;;  %v2654_v15 = vld [vmem:[#allocation13 + $0x50] sm:$0xff]  ;;  %v2663_v32 = vld [vmem:[#allocation13 + $0x98] sm:$0xff] }
 0x6d4   :  { %v2344_v46 = vmax.f32 %v2336_v35, 0.0  ;;  %v2132_v47 = vadd.f32 %v2131_v41, %v1883_v16  ;;  %v2133_v48 = vpop.f32.mrb[42].mxu0  ;;  %v8274_v24 = vpack.c.bf16 %v2654_v15, %v2652_v14  ;;  %v2916_v41 = vld [vmem:[#allocation13 + $0x408] sm:$0xff]  ;;  %v8280_v43 = vpack.c.bf16 %v2663_v32, %v2661_v31  ;;  %v2925_v14 = vld [vmem:[#allocation13 + $0x450] sm:$0xff] }
 0x6d5   :  { %v8250_v49 = vpack.c.bf16 %v2343_v38, %v2339_v37  ;;  %v2134_v50 = vadd.f32 %v2133_v48, %v1887_v17  ;;  %v2135_v51 = vpop.f32.mrb[43].mxu0  ;;  %v8278_v38 = vpack.c.bf16 %v2658_v28, %v2656_v27  ;;  %v2667_v48 = vld [vmem:[#allocation13 + $0xb8] sm:$0xff]  ;;  %v2928_v15 = vld [vmem:[#allocation13 + $0x468] sm:$0xff]  ;;  %v8294_v27 = vpack.c.bf16 %v2674_v19, %v2672_v20  ;;  %v2678_v31 = vld [vmem:[#allocation13 + $0x110] sm:$0xff] }
 0x6d6   :  { %v2136_v52 = vadd.f32 %v2135_v51, %v1889_v18  ;;  %v8248_v53 = vpack.c.bf16 %v2344_v46, %v2340_v45  ;;  %v2660_v45 = vld [vmem:[#allocation13 + $0x80] sm:$0xff]  ;;  %v2662_v46 = vld [vmem:[#allocation13 + $0x90] sm:$0xff]  ;;  %v2934_v28 = vld [vmem:[#allocation13 + $0x498] sm:$0xff] }
 0x6d7   :  { %v2917_v51 = vld [vmem:[#allocation13 + $0x410] sm:$0xff]  ;;  %v2681_v32 = vld [vmem:[#allocation13 + $0x128] sm:$0xff]  ;;  %v2950_v20 = vld [vmem:[#allocation13 + $0x518] sm:$0xff] }
 0x6d8   :  { %8249 = vmatprep.subr.bf16.mxu1 %v8248_v53  ;;  %8257 = vmatprep.subr.bf16.mxu0 %v8248_v53  ;;  %v8282_v53 = vpack.c.bf16 %v2662_v46, %v2660_v45  ;;  %v2680_v46 = vld [vmem:[#allocation13 + $0x120] sm:$0xff] }
 0x6d9   :  { %8251 = vmatpush1.bf16.msra.mxu1 %v8250_v49  ;;  %8259 = vmatpush1.bf16.msra.mxu0 %v8250_v49  ;;  %v8392_v49 = vpack.c.bf16 %v2918_v44, %v2916_v41  ;;  %v2936_v41 = vld [vmem:[#allocation13 + $0x4a8] sm:$0xff]  ;;  %v2938_v44 = vld [vmem:[#allocation13 + $0x4b8] sm:$0xff] }
 0x6da   :  { %v2290_v63 = vpop.f32.mrb[44].mxu0  ;;  %8265 = vmatprep.subr.bf16.mxu0 %v8264_v54  ;;  %v2922_v54 = vld [vmem:[#allocation13 + $0x438] sm:$0xff] }
 0x6db   :  { %v2303_v4 = vadd.f32 %v2290_v63, %v2130_v40  ;;  %v2292_v6 = vpop.f32.mrb[45].mxu0 }
 0x6dc   :  { %v2304_v9 = vadd.f32 %v2292_v6, %v2132_v47  ;;  %7519 = vmatmul.mubr.msk.f32.vlgmr.msra.gmra.mrb[48].mxu1 %vm307_vm0, %v10359_v60  ;;  %7521 = vmatmul.mubr.msk.f32.vlgmr.msra.gmra.mrb[48].mxu0 %vm307_vm0, %v10361_v61  ;;  %v2665_v47 = vld [vmem:[#allocation13 + $0xa8] sm:$0xff]  ;;  %v2926_v6 = vld [vmem:[#allocation13 + $0x458] sm:$0xff] }
 0x6dd   :  { %2486 = vmatprep.mubr.f32.mxu1 %v9830_v13  ;;  %8267 = vmatpush1.bf16.msra.mxu0 %v8266_v62  ;;  %v2333_v16 = vadd.f32 %v2322_v5, %v2303_v4  ;;  %v8284_v55 = vpack.c.bf16 %v2667_v48, %v2665_v47  ;;  %v2671_v62 = vld [vmem:[#allocation13 + $0xd8] sm:$0xff]  ;;  %v2924_v4 = vld [vmem:[#allocation13 + $0x448] sm:$0xff]  ;;  %v2682_v47 = vld [vmem:[#allocation13 + $0x130] sm:$0xff] }
 0x6de   :  { %v2296_v11 = vpop.f32.mrb[46].mxu0  ;;  %8269 = vmatprep.subr.bf16.mxu0 %v8268_v1  ;;  %v2334_v21 = vadd.f32 %v2326_v10, %v2304_v9  ;;  %v8288_v7 = vpack.c.bf16 %v2671_v62, %v2669_v58  ;;  %v2670_v9 = vld [vmem:[#allocation13 + $0xd0] sm:$0xff]  ;;  %v2685_v48 = vld [vmem:[#allocation13 + $0x148] sm:$0xff]  ;;  %v2684_v58 = vld [vmem:[#allocation13 + $0x140] sm:$0xff] }
 0x6df   :  { %v2307_v17 = vadd.f32 %v2296_v11, %v2134_v50  ;;  %v2298_v18 = vpop.f32.mrb[47].mxu0  ;;  %v2341_v29 = vmax.f32 %v2333_v16, 0.0  ;;  %v2915_v50 = vld [vmem:[#allocation13 + $0x400] sm:$0xff]  ;;  %v8400_v11 = vpack.c.bf16 %v2926_v6, %v2924_v4  ;;  %v8290_v16 = vpack.c.bf16 %v2670_v9, %v2668_v8  ;;  %v2686_v62 = vld [vmem:[#allocation13 + $0x150] sm:$0xff]  ;;  %v2944_v6 = vld [vmem:[#allocation13 + $0x4e8] sm:$0xff] }
 0x6e0   :  { %v2308_v22 = vadd.f32 %v2298_v18, %v2136_v52  ;;  %v2342_v35 = vmax.f32 %v2334_v21, 0.0  ;;  %v2920_v52 = vld [vmem:[#allocation13 + $0x428] sm:$0xff]  ;;  %v8394_v63 = vpack.c.bf16 %v2917_v51, %v2915_v50  ;;  %v8412_v51 = vpack.c.bf16 %v2938_v44, %v2936_v41  ;;  %v2939_v4 = vld [vmem:[#allocation13 + $0x4c0] sm:$0xff]  ;;  %v2946_v8 = vld [vmem:[#allocation13 + $0x4f8] sm:$0xff] }
 0x6e1   :  { %v2337_v23 = vadd.f32 %v2322_v5, %v2307_v17  ;;  %8271 = vmatpush1.bf16.msra.mxu0 %v8270_v33  ;;  %v8396_v1 = vpack.c.bf16 %v2922_v54, %v2920_v52  ;;  %v8286_v5 = vpack.c.bf16 %v2666_v57, %v2664_v56  ;;  %v8398_v33 = vpack.c.bf16 %v2921_v3, %v2919_v2  ;;  %v2930_v17 = vld [vmem:[#allocation13 + $0x478] sm:$0xff]  ;;  %v2677_v21 = vld [vmem:[#allocation13 + $0x108] sm:$0xff]  ;;  %v2935_v52 = vld [vmem:[#allocation13 + $0x4a0] sm:$0xff] }
 0x6e2   :  { %v2338_v25 = vadd.f32 %v2326_v10, %v2308_v22  ;;  %8273 = vmatprep.subr.bf16.mxu0 %v8272_v12  ;;  %v2675_v10 = vld [vmem:[#allocation13 + $0xf8] sm:$0xff]  ;;  %v2923_v12 = vld [vmem:[#allocation13 + $0x440] sm:$0xff]  ;;  %v2940_v54 = vld [vmem:[#allocation13 + $0x4c8] sm:$0xff] }
 0x6e3   :  { %v2345_v30 = vmax.f32 %v2337_v23, 0.0  ;;  %v2679_v22 = vld [vmem:[#allocation13 + $0x118] sm:$0xff]  ;;  %v8404_v23 = vpack.c.bf16 %v2930_v17, %v2928_v15  ;;  %v2943_v15 = vld [vmem:[#allocation13 + $0x4e0] sm:$0xff]  ;;  %v2948_v17 = vld [vmem:[#allocation13 + $0x508] sm:$0xff] }
 0x6e4   :  { %v2346_v36 = vmax.f32 %v2338_v25, 0.0  ;;  %v2929_v25 = vld [vmem:[#allocation13 + $0x470] sm:$0xff]  ;;  %v2942_v56 = vld [vmem:[#allocation13 + $0x4d8] sm:$0xff]  ;;  %v2951_v41 = vld [vmem:[#allocation13 + $0x520] sm:$0xff] }
 0x6e5   :  { %v8254_v37 = vpack.c.bf16 %v2345_v30, %v2341_v29  ;;  %8275 = vmatpush1.bf16.msra.mxu0 %v8274_v24  ;;  %v2927_v24 = vld [vmem:[#allocation13 + $0x460] sm:$0xff]  ;;  %v8296_v29 = vpack.c.bf16 %v2679_v22, %v2677_v21  ;;  %v8416_v3 = vpack.c.bf16 %v2942_v56, %v2940_v54  ;;  %v2694_v22 = vld [vmem:[#allocation13 + $0x190] sm:$0xff]  ;;  %v2956_v44 = vld [vmem:[#allocation13 + $0x548] sm:$0xff] }
 0x6e6   :  { %v8252_v40 = vpack.c.bf16 %v2346_v36, %v2342_v35  ;;  %8277 = vmatprep.subr.bf16.mxu0 %v8276_v26  ;;  %v2932_v26 = vld [vmem:[#allocation13 + $0x488] sm:$0xff]  ;;  %v2676_v30 = vld [vmem:[#allocation13 + $0x100] sm:$0xff]  ;;  %v2683_v35 = vld [vmem:[#allocation13 + $0x138] sm:$0xff]  ;;  %v8406_v36 = vpack.c.bf16 %v2929_v25, %v2927_v24  ;;  %v8424_v25 = vpack.c.bf16 %v2950_v20, %v2948_v17 }
 0x6e7   :  { %v8300_v45 = vpack.c.bf16 %v2683_v35, %v2681_v32  ;;  %v2692_v21 = vld [vmem:[#allocation13 + $0x180] sm:$0xff]  ;;  %v2698_v35 = vld [vmem:[#allocation13 + $0x1b0] sm:$0xff]  ;;  %v2962_v56 = vld [vmem:[#allocation13 + $0x578] sm:$0xff] }
 0x6e8   :  { %8253 = vmatprep.subr.bf16.mxu1 %v8252_v40  ;;  %v2696_v32 = vld [vmem:[#allocation13 + $0x1a0] sm:$0xff]  ;;  %v2973_v17 = vld [vmem:[#allocation13 + $0x5d0] sm:$0xff]  ;;  %v2705_v20 = vld [vmem:[#allocation13 + $0x1e8] sm:$0xff] }
 0x6e9   :  { %8255 = vmatpush1.bf16.msra.mxu1 %v8254_v37  ;;  %8279 = vmatpush1.bf16.msra.mxu0 %v8278_v38  ;;  %v2931_v38 = vld [vmem:[#allocation13 + $0x480] sm:$0xff] }
 0x6ea   :  { %8261 = vmatprep.subr.bf16.mxu1 %v8252_v40  ;;  %8281 = vmatprep.subr.bf16.mxu0 %v8280_v43  ;;  %v2933_v40 = vld [vmem:[#allocation13 + $0x490] sm:$0xff]  ;;  %v8298_v43 = vpack.c.bf16 %v2678_v31, %v2676_v30  ;;  %v2954_v30 = vld [vmem:[#allocation13 + $0x538] sm:$0xff] }
 0x6eb   :  { %v8410_v50 = vpack.c.bf16 %v2933_v40, %v2931_v38 }
 0x6ec   :  { %7520 = vmatmul.mubr.msk.f32.vlgmr.msra.gmra.mrb[50].mxu1 %vm307_vm0, %v10359_v60  ;;  %v2673_v60 = vld [vmem:[#allocation13 + $0xe8] sm:$0xff] }
 0x6ed   :  { %8263 = vmatpush1.bf16.msra.mxu1 %v8254_v37  ;;  %2633 = vmatprep.mubr.f32.mxu1 %v9830_v13  ;;  %v8292_v18 = vpack.c.bf16 %v2675_v10, %v2673_v60  ;;  %v8408_v37 = vpack.c.bf16 %v2934_v28, %v2932_v26  ;;  %v2688_v60 = vld [vmem:[#allocation13 + $0x160] sm:$0xff]  ;;  %v2690_v10 = vld [vmem:[#allocation13 + $0x170] sm:$0xff]  ;;  %v2952_v28 = vld [vmem:[#allocation13 + $0x528] sm:$0xff] }
 0x6ee   :  { %8393 = vmatprep.subr.bf16.mxu1 %v8392_v49  ;;  %8283 = vmatpush1.bf16.msra.mxu0 %v8282_v53  ;;  %v2687_v49 = vld [vmem:[#allocation13 + $0x158] sm:$0xff]  ;;  %v2937_v53 = vld [vmem:[#allocation13 + $0x4b0] sm:$0xff]  ;;  %v2947_v26 = vld [vmem:[#allocation13 + $0x500] sm:$0xff]  ;;  %v8428_v40 = vpack.c.bf16 %v2954_v30, %v2952_v28 }
 0x6ef   :  { %8285 = vmatprep.subr.bf16.mxu0 %v8284_v55  ;;  %v8302_v55 = vpack.c.bf16 %v2682_v47, %v2680_v46  ;;  %v8304_v57 = vpack.c.bf16 %v2687_v49, %v2685_v48  ;;  %v8414_v2 = vpack.c.bf16 %v2937_v53, %v2935_v52  ;;  %v2958_v46 = vld [vmem:[#allocation13 + $0x558] sm:$0xff]  ;;  %v2700_v48 = vld [vmem:[#allocation13 + $0x1c0] sm:$0xff]  ;;  %v2702_v49 = vld [vmem:[#allocation13 + $0x1d0] sm:$0xff] }
 0x6f0   :  { %7522 = vmatmul.mubr.msk.f32.vlgmr.msra.gmra.mrb[52].mxu1 %vm307_vm0, %v10361_v61  ;;  %v8402_v61 = vpack.c.bf16 %v2925_v14, %v2923_v12  ;;  %v8420_v14 = vpack.c.bf16 %v2946_v8, %v2944_v6  ;;  %v2955_v52 = vld [vmem:[#allocation13 + $0x540] sm:$0xff]  ;;  %v2957_v53 = vld [vmem:[#allocation13 + $0x550] sm:$0xff]  ;;  %v8322_v54 = vpack.c.bf16 %v2702_v49, %v2700_v48  ;;  %v2970_v8 = vld [vmem:[#allocation13 + $0x5b8] sm:$0xff] }
 0x6f1   :  { %8395 = vmatpush1.bf16.msra.mxu1 %v8394_v63  ;;  %v2689_v63 = vld [vmem:[#allocation13 + $0x168] sm:$0xff]  ;;  %v2965_v6 = vld [vmem:[#allocation13 + $0x590] sm:$0xff]  ;;  %v2986_v49 = vld [vmem:[#allocation13 + $0x638] sm:$0xff] }
 0x6f2   :  { %8397 = vmatprep.subr.bf16.mxu1 %v8396_v1  ;;  %8287 = vmatpush1.bf16.msra.mxu0 %v8286_v5  ;;  %v2691_v1 = vld [vmem:[#allocation13 + $0x178] sm:$0xff]  ;;  %v2941_v5 = vld [vmem:[#allocation13 + $0x4d0] sm:$0xff]  ;;  %v2709_v30 = vld [vmem:[#allocation13 + $0x208] sm:$0xff] }
 0x6f3   :  { %8289 = vmatprep.subr.bf16.mxu0 %v8288_v7  ;;  %v8306_v7 = vpack.c.bf16 %v2686_v62, %v2684_v58  ;;  %v8308_v9 = vpack.c.bf16 %v2691_v1, %v2689_v63  ;;  %v8418_v12 = vpack.c.bf16 %v2941_v5, %v2939_v4  ;;  %v2959_v62 = vld [vmem:[#allocation13 + $0x560] sm:$0xff]  ;;  %v2961_v63 = vld [vmem:[#allocation13 + $0x570] sm:$0xff]  ;;  %v2964_v1 = vld [vmem:[#allocation13 + $0x588] sm:$0xff] }
 0x6f4   :  { %v2963_v5 = vld [vmem:[#allocation13 + $0x580] sm:$0xff]  ;;  %v2977_v28 = vld [vmem:[#allocation13 + $0x5f0] sm:$0xff]  ;;  %v2984_v48 = vld [vmem:[#allocation13 + $0x628] sm:$0xff] }
 0x6f5   :  { %8399 = vmatpush1.bf16.msra.mxu1 %v8398_v33  ;;  %v2693_v33 = vld [vmem:[#allocation13 + $0x188] sm:$0xff] }
 0x6f6   :  { %8401 = vmatprep.subr.bf16.mxu1 %v8400_v11  ;;  %8291 = vmatpush1.bf16.msra.mxu0 %v8290_v16  ;;  %v2695_v11 = vld [vmem:[#allocation13 + $0x198] sm:$0xff]  ;;  %v2945_v16 = vld [vmem:[#allocation13 + $0x4f0] sm:$0xff] }
 0x6f7   :  { %8293 = vmatprep.subr.bf16.mxu0 %v8292_v18  ;;  %v8310_v18 = vpack.c.bf16 %v2690_v10, %v2688_v60  ;;  %v8312_v19 = vpack.c.bf16 %v2695_v11, %v2693_v33  ;;  %v8422_v24 = vpack.c.bf16 %v2945_v16, %v2943_v15  ;;  %v2967_v10 = vld [vmem:[#allocation13 + $0x5a0] sm:$0xff]  ;;  %v2969_v33 = vld [vmem:[#allocation13 + $0x5b0] sm:$0xff]  ;;  %v2972_v11 = vld [vmem:[#allocation13 + $0x5c8] sm:$0xff] }
 0x6f8   :  { %v2971_v16 = vld [vmem:[#allocation13 + $0x5c0] sm:$0xff] }
 0x6f9   :  { %8403 = vmatpush1.bf16.msra.mxu1 %v8402_v61  ;;  %v2697_v61 = vld [vmem:[#allocation13 + $0x1a8] sm:$0xff] }
 0x6fa   :  { %8405 = vmatprep.subr.bf16.mxu1 %v8404_v23  ;;  %8295 = vmatpush1.bf16.msra.mxu0 %v8294_v27  ;;  %v2699_v23 = vld [vmem:[#allocation13 + $0x1b8] sm:$0xff]  ;;  %v2949_v27 = vld [vmem:[#allocation13 + $0x510] sm:$0xff] }
 0x6fb   :  { %8297 = vmatprep.subr.bf16.mxu0 %v8296_v29  ;;  %v8314_v29 = vpack.c.bf16 %v2694_v22, %v2692_v21  ;;  %v8316_v31 = vpack.c.bf16 %v2699_v23, %v2697_v61  ;;  %v8426_v38 = vpack.c.bf16 %v2949_v27, %v2947_v26  ;;  %v2976_v21 = vld [vmem:[#allocation13 + $0x5e8] sm:$0xff]  ;;  %v2978_v61 = vld [vmem:[#allocation13 + $0x5f8] sm:$0xff]  ;;  %v2704_v23 = vld [vmem:[#allocation13 + $0x1e0] sm:$0xff] }
 0x6fc   :  { %v2975_v27 = vld [vmem:[#allocation13 + $0x5e0] sm:$0xff] }
 0x6fd   :  { %8407 = vmatpush1.bf16.msra.mxu1 %v8406_v36  ;;  %v2701_v36 = vld [vmem:[#allocation13 + $0x1c8] sm:$0xff] }
 0x6fe   :  { %8409 = vmatprep.subr.bf16.mxu1 %v8408_v37  ;;  %8299 = vmatpush1.bf16.msra.mxu0 %v8298_v43  ;;  %v2703_v37 = vld [vmem:[#allocation13 + $0x1d8] sm:$0xff]  ;;  %v2953_v43 = vld [vmem:[#allocation13 + $0x530] sm:$0xff] }
 0x6ff   :  { %8301 = vmatprep.subr.bf16.mxu0 %v8300_v45  ;;  %v8318_v45 = vpack.c.bf16 %v2698_v35, %v2696_v32  ;;  %v8320_v47 = vpack.c.bf16 %v2703_v37, %v2701_v36  ;;  %v2980_v32 = vld [vmem:[#allocation13 + $0x608] sm:$0xff]  ;;  %v2982_v36 = vld [vmem:[#allocation13 + $0x618] sm:$0xff] }
 0x700   :  { %v8456_v37 = vpack.c.bf16 %v2982_v36, %v2980_v32  ;;  %v2995_v36 = vld [vmem:[#allocation13 + $0x680] sm:$0xff] }
 0x701   :  { %8411 = vmatpush1.bf16.msra.mxu1 %v8410_v50  ;;  %v8430_v50 = vpack.c.bf16 %v2953_v43, %v2951_v41  ;;  %v2979_v41 = vld [vmem:[#allocation13 + $0x600] sm:$0xff]  ;;  %v2981_v43 = vld [vmem:[#allocation13 + $0x610] sm:$0xff] }
 0x702   :  { %8413 = vmatprep.subr.bf16.mxu1 %v8412_v51  ;;  %8303 = vmatpush1.bf16.msra.mxu0 %v8302_v55  ;;  %v8432_v51 = vpack.c.bf16 %v2958_v46, %v2956_v44  ;;  %v2960_v55 = vld [vmem:[#allocation13 + $0x568] sm:$0xff] }
 0x703   :  { %8305 = vmatprep.subr.bf16.mxu0 %v8304_v57  ;;  %v8434_v57 = vpack.c.bf16 %v2957_v53, %v2955_v52  ;;  %v8436_v58 = vpack.c.bf16 %v2962_v56, %v2960_v55  ;;  %v2713_v44 = vld [vmem:[#allocation13 + $0x228] sm:$0xff]  ;;  %v8458_v55 = vpack.c.bf16 %v2981_v43, %v2979_v41  ;;  %v2712_v56 = vld [vmem:[#allocation13 + $0x220] sm:$0xff]  ;;  %v3002_v43 = vld [vmem:[#allocation13 + $0x6b8] sm:$0xff] }
 0x704   :  { %v3000_v41 = vld [vmem:[#allocation13 + $0x6a8] sm:$0xff] }
 0x705   :  { %8415 = vmatpush1.bf16.msra.mxu1 %v8414_v2  ;;  %v2966_v2 = vld [vmem:[#allocation13 + $0x598] sm:$0xff] }
 0x706   :  { %8417 = vmatprep.subr.bf16.mxu1 %v8416_v3  ;;  %8307 = vmatpush1.bf16.msra.mxu0 %v8306_v7  ;;  %v8438_v3 = vpack.c.bf16 %v2961_v63, %v2959_v62  ;;  %v8440_v4 = vpack.c.bf16 %v2966_v2, %v2964_v1  ;;  %v2968_v7 = vld [vmem:[#allocation13 + $0x5a8] sm:$0xff]  ;;  %v8460_v62 = vpack.c.bf16 %v2986_v49, %v2984_v48  ;;  %v2983_v63 = vld [vmem:[#allocation13 + $0x620] sm:$0xff]  ;;  %v2985_v1 = vld [vmem:[#allocation13 + $0x630] sm:$0xff] }
 0x707   :  { %8309 = vmatprep.subr.bf16.mxu0 %v8308_v9  ;;  %v8442_v9 = vpack.c.bf16 %v2965_v6, %v2963_v5  ;;  %v8444_v60 = vpack.c.bf16 %v2970_v8, %v2968_v7  ;;  %v2717_v2 = vld [vmem:[#allocation13 + $0x248] sm:$0xff]  ;;  %v2990_v5 = vld [vmem:[#allocation13 + $0x658] sm:$0xff]  ;;  %v8462_v7 = vpack.c.bf16 %v2985_v1, %v2983_v63  ;;  %v2716_v8 = vld [vmem:[#allocation13 + $0x240] sm:$0xff] }
 0x708   :  { %v2728_v48 = vld [vmem:[#allocation13 + $0x2a0] sm:$0xff]  ;;  %v2730_v49 = vld [vmem:[#allocation13 + $0x2b0] sm:$0xff] }
 0x709   :  { %8419 = vmatpush1.bf16.msra.mxu1 %v8418_v12  ;;  %v2974_v12 = vld [vmem:[#allocation13 + $0x5d8] sm:$0xff]  ;;  %v8350_v1 = vpack.c.bf16 %v2730_v49, %v2728_v48  ;;  %v2749_v48 = vld [vmem:[#allocation13 + $0x348] sm:$0xff] }
 0x70a   :  { %8421 = vmatprep.subr.bf16.mxu1 %v8420_v14  ;;  %8311 = vmatpush1.bf16.msra.mxu0 %v8310_v18  ;;  %v8446_v14 = vpack.c.bf16 %v2969_v33, %v2967_v10  ;;  %v8448_v15 = vpack.c.bf16 %v2974_v12, %v2972_v11  ;;  %v8450_v18 = vpack.c.bf16 %v2973_v17, %v2971_v16  ;;  %v2987_v33 = vld [vmem:[#allocation13 + $0x640] sm:$0xff]  ;;  %v2989_v11 = vld [vmem:[#allocation13 + $0x650] sm:$0xff]  ;;  %v2721_v12 = vld [vmem:[#allocation13 + $0x268] sm:$0xff] }
 0x70b   :  { %8313 = vmatprep.subr.bf16.mxu0 %v8312_v19  ;;  %v2707_v19 = vld [vmem:[#allocation13 + $0x1f8] sm:$0xff] }
 0x70c   :  { %v8324_v22 = vpack.c.bf16 %v2707_v19, %v2705_v20  ;;  %v2994_v16 = vld [vmem:[#allocation13 + $0x678] sm:$0xff]  ;;  %v2720_v20 = vld [vmem:[#allocation13 + $0x260] sm:$0xff]  ;;  %v2722_v19 = vld [vmem:[#allocation13 + $0x270] sm:$0xff] }
 0x70d   :  { %8423 = vmatpush1.bf16.msra.mxu1 %v8422_v24  ;;  %v2706_v24 = vld [vmem:[#allocation13 + $0x1f0] sm:$0xff]  ;;  %v2751_v49 = vld [vmem:[#allocation13 + $0x358] sm:$0xff] }
 0x70e   :  { %8425 = vmatprep.subr.bf16.mxu1 %v8424_v25  ;;  %8315 = vmatpush1.bf16.msra.mxu0 %v8314_v29  ;;  %v8452_v25 = vpack.c.bf16 %v2978_v61, %v2976_v21  ;;  %v8326_v26 = vpack.c.bf16 %v2706_v24, %v2704_v23  ;;  %v8454_v29 = vpack.c.bf16 %v2977_v28, %v2975_v27  ;;  %v2991_v61 = vld [vmem:[#allocation13 + $0x660] sm:$0xff]  ;;  %v2993_v23 = vld [vmem:[#allocation13 + $0x670] sm:$0xff]  ;;  %v2725_v24 = vld [vmem:[#allocation13 + $0x288] sm:$0xff] }
 0x70f   :  { %8317 = vmatprep.subr.bf16.mxu0 %v8316_v31  ;;  %v2711_v31 = vld [vmem:[#allocation13 + $0x218] sm:$0xff]  ;;  %v8342_v28 = vpack.c.bf16 %v2722_v19, %v2720_v20  ;;  %v3007_v20 = vld [vmem:[#allocation13 + $0x6e0] sm:$0xff]  ;;  %v3009_v19 = vld [vmem:[#allocation13 + $0x6f0] sm:$0xff] }
 0x710   :  { %v8328_v35 = vpack.c.bf16 %v2711_v31, %v2709_v30  ;;  %v2998_v27 = vld [vmem:[#allocation13 + $0x698] sm:$0xff]  ;;  %v2724_v30 = vld [vmem:[#allocation13 + $0x280] sm:$0xff]  ;;  %v2726_v31 = vld [vmem:[#allocation13 + $0x290] sm:$0xff] }
 0x711   :  { %8427 = vmatpush1.bf16.msra.mxu1 %v8426_v38  ;;  %v2708_v38 = vld [vmem:[#allocation13 + $0x200] sm:$0xff] }
 0x712   :  { %8429 = vmatprep.subr.bf16.mxu1 %v8428_v40  ;;  %8319 = vmatpush1.bf16.msra.mxu0 %v8318_v45  ;;  %v2710_v40 = vld [vmem:[#allocation13 + $0x210] sm:$0xff] }
 0x713   :  { %8321 = vmatprep.subr.bf16.mxu0 %v8320_v47  ;;  %v2715_v47 = vld [vmem:[#allocation13 + $0x238] sm:$0xff] }
 0x715   :  { %8431 = vmatpush1.bf16.msra.mxu1 %v8430_v50 }
 0x716   :  { %8433 = vmatprep.subr.bf16.mxu1 %v8432_v51  ;;  %8323 = vmatpush1.bf16.msra.mxu0 %v8322_v54  ;;  %v8330_v54 = vpack.c.bf16 %v2710_v40, %v2708_v38  ;;  %v2729_v38 = vld [vmem:[#allocation13 + $0x2a8] sm:$0xff]  ;;  %v2731_v40 = vld [vmem:[#allocation13 + $0x2b8] sm:$0xff] }
 0x717   :  { %8325 = vmatprep.subr.bf16.mxu0 %v8324_v22 }
 0x719   :  { %8435 = vmatpush1.bf16.msra.mxu1 %v8434_v57  ;;  %v2714_v57 = vld [vmem:[#allocation13 + $0x230] sm:$0xff] }
 0x71a   :  { %8437 = vmatprep.subr.bf16.mxu1 %v8436_v58  ;;  %8327 = vmatpush1.bf16.msra.mxu0 %v8326_v26  ;;  %v8332_v58 = vpack.c.bf16 %v2715_v47, %v2713_v44  ;;  %v8334_v6 = vpack.c.bf16 %v2714_v57, %v2712_v56  ;;  %v2996_v26 = vld [vmem:[#allocation13 + $0x688] sm:$0xff]  ;;  %v3006_v57 = vld [vmem:[#allocation13 + $0x6d8] sm:$0xff] }
 0x71b   :  { %8329 = vmatprep.subr.bf16.mxu0 %v8328_v35  ;;  %v8472_v35 = vpack.c.bf16 %v2998_v27, %v2996_v26  ;;  %v3004_v56 = vld [vmem:[#allocation13 + $0x6c8] sm:$0xff]  ;;  %v2740_v26 = vld [vmem:[#allocation13 + $0x300] sm:$0xff]  ;;  %v2742_v27 = vld [vmem:[#allocation13 + $0x310] sm:$0xff] }
 0x71d   :  { %8439 = vmatpush1.bf16.msra.mxu1 %v8438_v3  ;;  %v2719_v3 = vld [vmem:[#allocation13 + $0x258] sm:$0xff] }
 0x71e   :  { %8441 = vmatprep.subr.bf16.mxu1 %v8440_v4  ;;  %v2988_v4 = vld [vmem:[#allocation13 + $0x648] sm:$0xff] }
 0x71f   :  { %v8464_v10 = vpack.c.bf16 %v2990_v5, %v2988_v4  ;;  %v2734_v4 = vld [vmem:[#allocation13 + $0x2d0] sm:$0xff] }
 0x721   :  { %8443 = vmatpush1.bf16.msra.mxu1 %v8442_v9  ;;  %v2718_v9 = vld [vmem:[#allocation13 + $0x250] sm:$0xff] }
 0x722   :  { %8445 = vmatprep.subr.bf16.mxu1 %v8444_v60  ;;  %v8336_v60 = vpack.c.bf16 %v2719_v3, %v2717_v2  ;;  %v8338_v17 = vpack.c.bf16 %v2718_v9, %v2716_v8  ;;  %v2732_v3 = vld [vmem:[#allocation13 + $0x2c0] sm:$0xff]  ;;  %v3005_v9 = vld [vmem:[#allocation13 + $0x6d0] sm:$0xff] }
 0x723   :  { %v3003_v8 = vld [vmem:[#allocation13 + $0x6c0] sm:$0xff] }
 0x725   :  { %8447 = vmatpush1.bf16.msra.mxu1 %v8446_v14  ;;  %v2723_v14 = vld [vmem:[#allocation13 + $0x278] sm:$0xff] }
 0x726   :  { %8449 = vmatprep.subr.bf16.mxu1 %v8448_v15  ;;  %v2992_v15 = vld [vmem:[#allocation13 + $0x668] sm:$0xff]  ;;  %v8340_v21 = vpack.c.bf16 %v2723_v14, %v2721_v12  ;;  %v8354_v12 = vpack.c.bf16 %v2734_v4, %v2732_v3  ;;  %v8482_v14 = vpack.c.bf16 %v3005_v9, %v3003_v8  ;;  %v3026_v4 = vld [vmem:[#allocation13 + $0x778] sm:$0xff]  ;;  %v2754_v8 = vld [vmem:[#allocation13 + $0x370] sm:$0xff] }
 0x727   :  { %v8468_v22 = vpack.c.bf16 %v2994_v16, %v2992_v15  ;;  %v2736_v15 = vld [vmem:[#allocation13 + $0x2e0] sm:$0xff]  ;;  %v2738_v16 = vld [vmem:[#allocation13 + $0x2f0] sm:$0xff]  ;;  %v3024_v3 = vld [vmem:[#allocation13 + $0x768] sm:$0xff] }
 0x729   :  { %8451 = vmatpush1.bf16.msra.mxu1 %v8450_v18  ;;  %v8466_v18 = vpack.c.bf16 %v2989_v11, %v2987_v33  ;;  %v3008_v33 = vld [vmem:[#allocation13 + $0x6e8] sm:$0xff]  ;;  %v3010_v11 = vld [vmem:[#allocation13 + $0x6f8] sm:$0xff] }
 0x72a   :  { %8453 = vmatprep.subr.bf16.mxu1 %v8452_v25  ;;  %v2727_v25 = vld [vmem:[#allocation13 + $0x298] sm:$0xff] }
 0x72b   :  { %v8344_v32 = vpack.c.bf16 %v2727_v25, %v2725_v24  ;;  %v8358_v24 = vpack.c.bf16 %v2738_v16, %v2736_v15  ;;  %v8486_v25 = vpack.c.bf16 %v3009_v19, %v3007_v20  ;;  %v3030_v15 = vld [vmem:[#allocation13 + $0x798] sm:$0xff]  ;;  %v2758_v20 = vld [vmem:[#allocation13 + $0x390] sm:$0xff] }
 0x72d   :  { %8455 = vmatpush1.bf16.msra.mxu1 %v8454_v29  ;;  %v8470_v29 = vpack.c.bf16 %v2993_v23, %v2991_v61  ;;  %v3012_v61 = vld [vmem:[#allocation13 + $0x708] sm:$0xff]  ;;  %v3014_v23 = vld [vmem:[#allocation13 + $0x718] sm:$0xff] }
 0x72e   :  { %8457 = vmatprep.subr.bf16.mxu1 %v8456_v37  ;;  %v2997_v37 = vld [vmem:[#allocation13 + $0x690] sm:$0xff] }
 0x72f   :  { %v8474_v47 = vpack.c.bf16 %v2997_v37, %v2995_v36  ;;  %v3016_v36 = vld [vmem:[#allocation13 + $0x728] sm:$0xff]  ;;  %v3018_v37 = vld [vmem:[#allocation13 + $0x738] sm:$0xff] }
 0x7af   :  { %v2417_v45 = vpop.f32.mrb[48].mxu1  ;;  %v2564_v46 = vpop.f32.mrb[48].mxu0 }
 0x7b0   :  { %v2640_v50 = vmax.f32 %v2417_v45, %v2564_v46  ;;  %v2419_v51 = vpop.f32.mrb[49].mxu1  ;;  %v2566_v52 = vpop.f32.mrb[49].mxu0  ;;  %v8346_v46 = vpack.c.bf16 %v2726_v31, %v2724_v30  ;;  %v3011_v30 = vld [vmem:[#allocation13 + $0x700] sm:$0xff]  ;;  %v3013_v31 = vld [vmem:[#allocation13 + $0x710] sm:$0xff] }
 0x7b1   :  { %v2641_v53 = vmax.f32 %v2419_v51, %v2566_v52  ;;  %v8476_v51 = vpack.c.bf16 %v3002_v43, %v3000_v41  ;;  %v2999_v52 = vld [vmem:[#allocation13 + $0x6a0] sm:$0xff]  ;;  %v2746_v43 = vld [vmem:[#allocation13 + $0x330] sm:$0xff] }
 0x7b2   :  { %v2744_v41 = vld [vmem:[#allocation13 + $0x320] sm:$0xff] }
 0x7b3   :  { %2836 = vmatprep.mubr.f32.mxu0 %v2641_v53  ;;  %3107 = vmatprep.mubr.f32.mxu1 %v2641_v53  ;;  %v3001_v53 = vld [vmem:[#allocation13 + $0x6b0] sm:$0xff] }
 0x7b4   :  { %2837 = vmatmul.mubr.f32.vlgmr.msra.gmra.mrb[50].mxu0 %v2640_v50  ;;  %3108 = vmatmul.mubr.f32.vlgmr.msra.gmra.mrb[54].mxu1 %v2640_v50  ;;  %v8348_v50 = vpack.c.bf16 %v2731_v40, %v2729_v38  ;;  %v8478_v2 = vpack.c.bf16 %v3001_v53, %v2999_v52  ;;  %v8362_v38 = vpack.c.bf16 %v2742_v27, %v2740_v26  ;;  %v3034_v26 = vld [vmem:[#allocation13 + $0x7b8] sm:$0xff] }
 0x7b5   :  { %8331 = vmatpush1.bf16.msra.mxu0 %v8330_v54  ;;  %8459 = vmatpush1.bf16.msra.mxu1 %v8458_v55  ;;  %v2733_v54 = vld [vmem:[#allocation13 + $0x2c8] sm:$0xff]  ;;  %v2735_v55 = vld [vmem:[#allocation13 + $0x2d8] sm:$0xff]  ;;  %v8490_v40 = vpack.c.bf16 %v3013_v31, %v3011_v30  ;;  %v8366_v52 = vpack.c.bf16 %v2746_v43, %v2744_v41  ;;  %v2762_v30 = vld [vmem:[#allocation13 + $0x3b0] sm:$0xff] }
 0x7b6   :  { %8333 = vmatprep.subr.bf16.mxu0 %v8332_v58  ;;  %8461 = vmatprep.subr.bf16.mxu1 %v8460_v62  ;;  %v3038_v41 = vld [vmem:[#allocation13 + $0x7d8] sm:$0xff] }
 0x7b9   :  { %8335 = vmatpush1.bf16.msra.mxu0 %v8334_v6  ;;  %8463 = vmatpush1.bf16.msra.mxu1 %v8462_v7  ;;  %v8352_v6 = vpack.c.bf16 %v2735_v55, %v2733_v54  ;;  %v8480_v7 = vpack.c.bf16 %v3006_v57, %v3004_v56  ;;  %v2748_v54 = vld [vmem:[#allocation13 + $0x340] sm:$0xff]  ;;  %v2750_v55 = vld [vmem:[#allocation13 + $0x350] sm:$0xff]  ;;  %v8368_v56 = vpack.c.bf16 %v2751_v49, %v2749_v48 }
 0x7ba   :  { %8337 = vmatprep.subr.bf16.mxu0 %v8336_v60  ;;  %8465 = vmatprep.subr.bf16.mxu1 %v8464_v10  ;;  %v2737_v60 = vld [vmem:[#allocation13 + $0x2e8] sm:$0xff]  ;;  %v2739_v10 = vld [vmem:[#allocation13 + $0x2f8] sm:$0xff]  ;;  %v3035_v49 = vld [vmem:[#allocation13 + $0x7c0] sm:$0xff] }
 0x7bd   :  { %8339 = vmatpush1.bf16.msra.mxu0 %v8338_v17  ;;  %8467 = vmatpush1.bf16.msra.mxu1 %v8466_v18  ;;  %v8356_v17 = vpack.c.bf16 %v2739_v10, %v2737_v60  ;;  %v8484_v18 = vpack.c.bf16 %v3010_v11, %v3008_v33  ;;  %v8500_v60 = vpack.c.bf16 %v3026_v4, %v3024_v3  ;;  %v3023_v10 = vld [vmem:[#allocation13 + $0x760] sm:$0xff]  ;;  %v3025_v33 = vld [vmem:[#allocation13 + $0x770] sm:$0xff]  ;;  %v2757_v11 = vld [vmem:[#allocation13 + $0x388] sm:$0xff] }
 0x7be   :  { %8341 = vmatprep.subr.bf16.mxu0 %v8340_v21  ;;  %8469 = vmatprep.subr.bf16.mxu1 %v8468_v22  ;;  %v2741_v21 = vld [vmem:[#allocation13 + $0x308] sm:$0xff]  ;;  %v2743_v22 = vld [vmem:[#allocation13 + $0x318] sm:$0xff]  ;;  %v3041_v3 = vld [vmem:[#allocation13 + $0x7f0] sm:$0xff] }
 0x7bf   :  { %v2488_v44 = vpop.f32.mrb[50].mxu1 }
 0x7c0   :  { %v2490_v45 = vpop.f32.mrb[51].mxu1 }
 0x7c1   :  { %8343 = vmatpush1.bf16.msra.mxu0 %v8342_v28  ;;  %8471 = vmatpush1.bf16.msra.mxu1 %v8470_v29  ;;  %v8360_v28 = vpack.c.bf16 %v2743_v22, %v2741_v21  ;;  %v8488_v29 = vpack.c.bf16 %v3014_v23, %v3012_v61  ;;  %v3027_v22 = vld [vmem:[#allocation13 + $0x780] sm:$0xff]  ;;  %v3029_v61 = vld [vmem:[#allocation13 + $0x790] sm:$0xff]  ;;  %v2761_v23 = vld [vmem:[#allocation13 + $0x3a8] sm:$0xff] }
 0x7c2   :  { %8345 = vmatprep.subr.bf16.mxu0 %v8344_v32  ;;  %8473 = vmatprep.subr.bf16.mxu1 %v8472_v35  ;;  %v2745_v32 = vld [vmem:[#allocation13 + $0x328] sm:$0xff]  ;;  %v2747_v35 = vld [vmem:[#allocation13 + $0x338] sm:$0xff] }
 0x7c3   :  { %v2635_v58 = vpop.f32.mrb[52].mxu1 }
 0x7c4   :  { %v10377_v62 = vmax.f32 %v2488_v44, %v2635_v58  ;;  %v2637_v63 = vpop.f32.mrb[53].mxu1  ;;  %v8364_v44 = vpack.c.bf16 %v2747_v35, %v2745_v32  ;;  %v3019_v58 = vld [vmem:[#allocation13 + $0x740] sm:$0xff] }
 0x7c5   :  { %8347 = vmatpush1.bf16.msra.mxu0 %v8346_v46  ;;  %8475 = vmatpush1.bf16.msra.mxu1 %v8474_v47  ;;  %v2643_v5 = vmax.f32 %v2490_v45, %v2637_v63  ;;  %v8492_v45 = vpack.c.bf16 %v3018_v37, %v3016_v36  ;;  %v3015_v46 = vld [vmem:[#allocation13 + $0x720] sm:$0xff]  ;;  %v3017_v47 = vld [vmem:[#allocation13 + $0x730] sm:$0xff]  ;;  %v2765_v37 = vld [vmem:[#allocation13 + $0x3c8] sm:$0xff] }
 0x7c6   :  { %8349 = vmatprep.subr.bf16.mxu0 %v8348_v50  ;;  %8477 = vmatprep.subr.bf16.mxu1 %v8476_v51  ;;  %v3020_v50 = vld [vmem:[#allocation13 + $0x748] sm:$0xff]  ;;  %v3022_v51 = vld [vmem:[#allocation13 + $0x758] sm:$0xff]  ;;  %v8494_v53 = vpack.c.bf16 %v3017_v47, %v3015_v46  ;;  %v3021_v63 = vld [vmem:[#allocation13 + $0x750] sm:$0xff] }
 0x7c7   :  { %2907 = vmatprep.mubr.f32.mxu0 %v2643_v5  ;;  %3178 = vmatprep.mubr.f32.mxu1 %v2643_v5  ;;  %v8496_v57 = vpack.c.bf16 %v3022_v51, %v3020_v50  ;;  %v8370_v5 = vpack.c.bf16 %v2750_v55, %v2748_v54  ;;  %v3031_v35 = vld [vmem:[#allocation13 + $0x7a0] sm:$0xff]  ;;  %v3033_v36 = vld [vmem:[#allocation13 + $0x7b0] sm:$0xff]  ;;  %v2769_v51 = vld [vmem:[#allocation13 + $0x3e8] sm:$0xff] }
 0x7c8   :  { %v2766_v46 = vld [vmem:[#allocation13 + $0x3d0] sm:$0xff]  ;;  %v3042_v54 = vld [vmem:[#allocation13 + $0x7f8] sm:$0xff] }
 0x7c9   :  { %8351 = vmatpush1.bf16.msra.mxu0 %v8350_v1  ;;  %8479 = vmatpush1.bf16.msra.mxu1 %v8478_v2  ;;  %v2753_v1 = vld [vmem:[#allocation13 + $0x368] sm:$0xff]  ;;  %v2755_v2 = vld [vmem:[#allocation13 + $0x378] sm:$0xff]  ;;  %v3037_v50 = vld [vmem:[#allocation13 + $0x7d0] sm:$0xff] }
 0x7ca   :  { %8353 = vmatprep.subr.bf16.mxu0 %v8352_v6  ;;  %8481 = vmatprep.subr.bf16.mxu1 %v8480_v7  ;;  %v8498_v6 = vpack.c.bf16 %v3021_v63, %v3019_v58  ;;  %v2752_v7 = vld [vmem:[#allocation13 + $0x360] sm:$0xff]  ;;  %v8372_v9 = vpack.c.bf16 %v2755_v2, %v2753_v1  ;;  %v2770_v1 = vld [vmem:[#allocation13 + $0x3f0] sm:$0xff] }
 0x7cb   :  { %v8374_v16 = vpack.c.bf16 %v2754_v8, %v2752_v7  ;;  %v3039_v2 = vld [vmem:[#allocation13 + $0x7e0] sm:$0xff]  ;;  %v8986_v7 = vld [vmem:[#allocation16 + $0xc] ss:$16 sps:$4 sm:$0xff]  }
 0x7cc   :  { %v8981_v8 = vld [vmem:[#allocation16] ss:$16 sps:$4 sm:$0xff]  }
 0x7cd   :  { %8355 = vmatpush1.bf16.msra.mxu0 %v8354_v12  ;;  %8483 = vmatpush1.bf16.msra.mxu1 %v8482_v14  ;;  %v2759_v12 = vld [vmem:[#allocation13 + $0x398] sm:$0xff]  ;;  %v3028_v14 = vld [vmem:[#allocation13 + $0x788] sm:$0xff] }
 0x7ce   :  { %8357 = vmatprep.subr.bf16.mxu0 %v8356_v17  ;;  %8485 = vmatprep.subr.bf16.mxu1 %v8484_v18  ;;  %v8502_v17 = vpack.c.bf16 %v3025_v33, %v3023_v10  ;;  %v2756_v18 = vld [vmem:[#allocation13 + $0x380] sm:$0xff]  ;;  %v8376_v19 = vpack.c.bf16 %v2759_v12, %v2757_v11  ;;  %v8504_v21 = vpack.c.bf16 %v3030_v15, %v3028_v14  ;;  %v8992_v10 = vld [vmem:[#allocation16 + $0x2c] ss:$16 sps:$4 sm:$0xff]   ;;  %v8990_v11 = vld [vmem:[#allocation16 + $0x28] ss:$16 sps:$4 sm:$0xff]  }
 0x7cf   :  { %v8378_v27 = vpack.c.bf16 %v2758_v20, %v2756_v18  ;;  %v8987_v33 = vld [vmem:[#allocation16 + $0x20] ss:$16 sps:$4 sm:$0xff]   ;;  %v8995_v12 = vld [vmem:[#allocation16 + $0x44] ss:$16 sps:$4 sm:$0xff]   ;;  %v8998_v14 = vld [vmem:[#allocation16 + $0x4c] ss:$16 sps:$4 sm:$0xff]  }
 0x7d0   :  { %v8993_v15 = vld [vmem:[#allocation16 + $0x40] ss:$16 sps:$4 sm:$0xff]   ;;  %v9004_v18 = vld [vmem:[#allocation16 + $0x6c] ss:$16 sps:$4 sm:$0xff]  }
 0x7d1   :  { %8359 = vmatpush1.bf16.msra.mxu0 %v8358_v24  ;;  %8487 = vmatpush1.bf16.msra.mxu1 %v8486_v25  ;;  %v2763_v24 = vld [vmem:[#allocation13 + $0x3b8] sm:$0xff]  ;;  %v3032_v25 = vld [vmem:[#allocation13 + $0x7a8] sm:$0xff]  ;;  %v8999_v20 = vld [vmem:[#allocation16 + $0x60] ss:$16 sps:$4 sm:$0xff]  }
 0x7d2   :  { %8361 = vmatprep.subr.bf16.mxu0 %v8360_v28  ;;  %8489 = vmatprep.subr.bf16.mxu1 %v8488_v29  ;;  %v8506_v28 = vpack.c.bf16 %v3029_v61, %v3027_v22  ;;  %v2760_v29 = vld [vmem:[#allocation13 + $0x3a0] sm:$0xff]  ;;  %v8380_v31 = vpack.c.bf16 %v2763_v24, %v2761_v23  ;;  %v8508_v32 = vpack.c.bf16 %v3034_v26, %v3032_v25  ;;  %v9008_v61 = vld [vmem:[#allocation16 + $0x88] ss:$16 sps:$4 sm:$0xff]   ;;  %v9016_v24 = vld [vmem:[#allocation16 + $0xac] ss:$16 sps:$4 sm:$0xff]  }
 0x7d3   :  { %v8382_v43 = vpack.c.bf16 %v2762_v30, %v2760_v29  ;;  %v9005_v22 = vld [vmem:[#allocation16 + $0x80] ss:$16 sps:$4 sm:$0xff]   ;;  %v9013_v23 = vld [vmem:[#allocation16 + $0xa4] ss:$16 sps:$4 sm:$0xff]   ;;  %v9014_v26 = vld [vmem:[#allocation16 + $0xa8] ss:$16 sps:$4 sm:$0xff]  }
 0x7d4   :  { %v9011_v25 = vld [vmem:[#allocation16 + $0xa0] ss:$16 sps:$4 sm:$0xff]   ;;  %v9020_v30 = vld [vmem:[#allocation16 + $0xc8] ss:$16 sps:$4 sm:$0xff]  }
 0x7d5   :  { %8363 = vmatpush1.bf16.msra.mxu0 %v8362_v38  ;;  %8491 = vmatpush1.bf16.msra.mxu1 %v8490_v40  ;;  %v2767_v38 = vld [vmem:[#allocation13 + $0x3d8] sm:$0xff]  ;;  %v3036_v40 = vld [vmem:[#allocation13 + $0x7c8] sm:$0xff]  ;;  %v9017_v29 = vld [vmem:[#allocation16 + $0xc0] ss:$16 sps:$4 sm:$0xff]  }
 0x7d6   :  { %8365 = vmatprep.subr.bf16.mxu0 %v8364_v44  ;;  %8493 = vmatprep.subr.bf16.mxu1 %v8492_v45  ;;  %v8510_v44 = vpack.c.bf16 %v3033_v36, %v3031_v35  ;;  %v2764_v45 = vld [vmem:[#allocation13 + $0x3c0] sm:$0xff]  ;;  %v8384_v47 = vpack.c.bf16 %v2767_v38, %v2765_v37  ;;  %v8512_v48 = vpack.c.bf16 %v3038_v41, %v3036_v40  ;;  %v9026_v36 = vld [vmem:[#allocation16 + $0xe8] ss:$16 sps:$4 sm:$0xff]   ;;  %v9034_v38 = vld [vmem:[#allocation16 + $0x10c] ss:$16 sps:$4 sm:$0xff]  }
 0x7d7   :  { %v8386_v55 = vpack.c.bf16 %v2766_v46, %v2764_v45  ;;  %v9023_v35 = vld [vmem:[#allocation16 + $0xe0] ss:$16 sps:$4 sm:$0xff]   ;;  %v9031_v37 = vld [vmem:[#allocation16 + $0x104] ss:$16 sps:$4 sm:$0xff]   ;;  %v9032_v41 = vld [vmem:[#allocation16 + $0x108] ss:$16 sps:$4 sm:$0xff]  }
 0x7d8   :  { %v9029_v40 = vld [vmem:[#allocation16 + $0x100] ss:$16 sps:$4 sm:$0xff]   ;;  %v9038_v46 = vld [vmem:[#allocation16 + $0x128] ss:$16 sps:$4 sm:$0xff]  }
 0x7d9   :  { %8367 = vmatpush1.bf16.msra.mxu0 %v8366_v52  ;;  %8495 = vmatpush1.bf16.msra.mxu1 %v8494_v53  ;;  %v2771_v52 = vld [vmem:[#allocation13 + $0x3f8] sm:$0xff]  ;;  %v3040_v53 = vld [vmem:[#allocation13 + $0x7e8] sm:$0xff]  ;;  %v9035_v45 = vld [vmem:[#allocation16 + $0x120] ss:$16 sps:$4 sm:$0xff]  }
 0x7da   :  { %8369 = vmatprep.subr.bf16.mxu0 %v8368_v56  ;;  %8497 = vmatprep.subr.bf16.mxu1 %v8496_v57  ;;  %v8514_v56 = vpack.c.bf16 %v3037_v50, %v3035_v49  ;;  %v2768_v57 = vld [vmem:[#allocation13 + $0x3e0] sm:$0xff]  ;;  %v8388_v58 = vpack.c.bf16 %v2771_v52, %v2769_v51  ;;  %v8516_v63 = vpack.c.bf16 %v3042_v54, %v3040_v53  ;;  %v9044_v50 = vld [vmem:[#allocation16 + $0x148] ss:$16 sps:$4 sm:$0xff]   ;;  %v9052_v52 = vld [vmem:[#allocation16 + $0x16c] ss:$16 sps:$4 sm:$0xff]  }
 0x7db   :  { %v8390_v4 = vpack.c.bf16 %v2770_v1, %v2768_v57  ;;  %v9041_v49 = vld [vmem:[#allocation16 + $0x140] ss:$16 sps:$4 sm:$0xff]   ;;  %v9049_v51 = vld [vmem:[#allocation16 + $0x164] ss:$16 sps:$4 sm:$0xff]   ;;  %v9050_v54 = vld [vmem:[#allocation16 + $0x168] ss:$16 sps:$4 sm:$0xff]  }
 0x7dc   :  { %v9047_v53 = vld [vmem:[#allocation16 + $0x160] ss:$16 sps:$4 sm:$0xff]   ;;  %v9064_v1 = vld [vmem:[#allocation16 + $0x1ac] ss:$16 sps:$4 sm:$0xff]  }
 0x7dd   :  { %8371 = vmatpush1.bf16.msra.mxu0 %v8370_v5  ;;  %8499 = vmatpush1.bf16.msra.mxu1 %v8498_v6  ;;  %v8518_v5 = vpack.c.bf16 %v3041_v3, %v3039_v2  ;;  %v8983_v6 = vld [vmem:[#allocation16 + $0x4] ss:$16 sps:$4 sm:$0xff]   ;;  %v9053_v57 = vld [vmem:[#allocation16 + $0x180] ss:$16 sps:$4 sm:$0xff]   ;;  %v9062_v3 = vld [vmem:[#allocation16 + $0x1a8] ss:$16 sps:$4 sm:$0xff]  }
 0x7de   :  { %8373 = vmatprep.subr.bf16.mxu0 %v8372_v9  ;;  %8501 = vmatprep.subr.bf16.mxu1 %v8500_v60  ;;  %v8984_v9 = vld [vmem:[#allocation16 + $0x8] ss:$16 sps:$4 sm:$0xff]   ;;  %v8989_v60 = vld [vmem:[#allocation16 + $0x24] ss:$16 sps:$4 sm:$0xff]   ;;  %v9059_v2 = vld [vmem:[#allocation16 + $0x1a0] ss:$16 sps:$4 sm:$0xff]  }
 0x7e1   :  { %8375 = vmatpush1.bf16.msra.mxu0 %v8374_v16  ;;  %8503 = vmatpush1.bf16.msra.mxu1 %v8502_v17  ;;  %v8996_v16 = vld [vmem:[#allocation16 + $0x48] ss:$16 sps:$4 sm:$0xff]   ;;  %v9001_v17 = vld [vmem:[#allocation16 + $0x64] ss:$16 sps:$4 sm:$0xff]  }
 0x7e2   :  { %8377 = vmatprep.subr.bf16.mxu0 %v8376_v19  ;;  %8505 = vmatprep.subr.bf16.mxu1 %v8504_v21  ;;  %v9007_v19 = vld [vmem:[#allocation16 + $0x84] ss:$16 sps:$4 sm:$0xff]   ;;  %v9010_v21 = vld [vmem:[#allocation16 + $0x8c] ss:$16 sps:$4 sm:$0xff]  }
 0x7e5   :  { %8379 = vmatpush1.bf16.msra.mxu0 %v8378_v27  ;;  %8507 = vmatpush1.bf16.msra.mxu1 %v8506_v28  ;;  %v9019_v27 = vld [vmem:[#allocation16 + $0xc4] ss:$16 sps:$4 sm:$0xff]   ;;  %v9022_v28 = vld [vmem:[#allocation16 + $0xcc] ss:$16 sps:$4 sm:$0xff]  }
 0x7e6   :  { %8381 = vmatprep.subr.bf16.mxu0 %v8380_v31  ;;  %8509 = vmatprep.subr.bf16.mxu1 %v8508_v32  ;;  %v9025_v31 = vld [vmem:[#allocation16 + $0xe4] ss:$16 sps:$4 sm:$0xff]   ;;  %v9028_v32 = vld [vmem:[#allocation16 + $0xec] ss:$16 sps:$4 sm:$0xff]  }
 0x7e9   :  { %8383 = vmatpush1.bf16.msra.mxu0 %v8382_v43  ;;  %8511 = vmatpush1.bf16.msra.mxu1 %v8510_v44  ;;  %v9037_v43 = vld [vmem:[#allocation16 + $0x124] ss:$16 sps:$4 sm:$0xff]   ;;  %v9040_v44 = vld [vmem:[#allocation16 + $0x12c] ss:$16 sps:$4 sm:$0xff]  }
 0x7ea   :  { %8385 = vmatprep.subr.bf16.mxu0 %v8384_v47  ;;  %8513 = vmatprep.subr.bf16.mxu1 %v8512_v48  ;;  %v9043_v47 = vld [vmem:[#allocation16 + $0x144] ss:$16 sps:$4 sm:$0xff]   ;;  %v9046_v48 = vld [vmem:[#allocation16 + $0x14c] ss:$16 sps:$4 sm:$0xff]  }
 0x7ed   :  { %8387 = vmatpush1.bf16.msra.mxu0 %v8386_v55  ;;  %8515 = vmatpush1.bf16.msra.mxu1 %v8514_v56  ;;  %v9055_v55 = vld [vmem:[#allocation16 + $0x184] ss:$16 sps:$4 sm:$0xff]   ;;  %v9058_v56 = vld [vmem:[#allocation16 + $0x18c] ss:$16 sps:$4 sm:$0xff]  }
 0x7ee   :  { %8389 = vmatprep.subr.bf16.mxu0 %v8388_v58  ;;  %8517 = vmatprep.subr.bf16.mxu1 %v8516_v63  ;;  %v9056_v58 = vld [vmem:[#allocation16 + $0x188] ss:$16 sps:$4 sm:$0xff]   ;;  %v9061_v63 = vld [vmem:[#allocation16 + $0x1a4] ss:$16 sps:$4 sm:$0xff]  }
 0x7f1   :  { %8391 = vmatpush1.bf16.msra.mxu0 %v8390_v4  ;;  %8519 = vmatpush1.bf16.msra.mxu1 %v8518_v5  ;;  %v9067_v4 = vld [vmem:[#allocation16 + $0x1c4] ss:$16 sps:$4 sm:$0xff]   ;;  %v9070_v5 = vld [vmem:[#allocation16 + $0x1cc] ss:$16 sps:$4 sm:$0xff]  }
 0x7f2   :  { %3573 = vmatprep.subr.bf16.mxu0 %v8983_v6  ;;  %3614 = vmatprep.subr.bf16.mxu1 %v8986_v7  ;;  %v9065_v6 = vld [vmem:[#allocation16 + $0x1c0] ss:$16 sps:$4 sm:$0xff]   ;;  %v9068_v7 = vld [vmem:[#allocation16 + $0x1c8] ss:$16 sps:$4 sm:$0xff]  }
 0x7f4   :  { %2908 = vmatmul.mubr.f32.vlgmr.msra.gmra.mrb[50].mxu0 %v10377_v62  ;;  %3179 = vmatmul.mubr.f32.vlgmr.msra.gmra.mrb[54].mxu1 %v10377_v62  ;;  %v9002_v62 = vld [vmem:[#allocation16 + $0x68] ss:$16 sps:$4 sm:$0xff]  }
 0x7f5   :  { %3574 = vmatpush1.bf16.msra.mxu0 %v8981_v8  ;;  %3615 = vmatpush1.bf16.msra.mxu1 %v8984_v9  ;;  %v9073_v8 = vld [vmem:[#allocation16 + $0x1e4] ss:$16 sps:$4 sm:$0xff]   ;;  %v9076_v9 = vld [vmem:[#allocation16 + $0x1ec] ss:$16 sps:$4 sm:$0xff]  }
 0x7f6   :  { %3575 = vmatprep.subr.bf16.mxu0 %v8989_v60  ;;  %3616 = vmatprep.subr.bf16.mxu1 %v8992_v10  ;;  %v9071_v60 = vld [vmem:[#allocation16 + $0x1e0] ss:$16 sps:$4 sm:$0xff]   ;;  %v9074_v10 = vld [vmem:[#allocation16 + $0x1e8] ss:$16 sps:$4 sm:$0xff]  }
 0x7f9   :  { %3576 = vmatpush1.bf16.msra.mxu0 %v8987_v33  ;;  %3617 = vmatpush1.bf16.msra.mxu1 %v8990_v11  ;;  %v9079_v33 = vld [vmem:[#allocation16 + $0x404] ss:$16 sps:$4 sm:$0xff]   ;;  %v9082_v11 = vld [vmem:[#allocation16 + $0x40c] ss:$16 sps:$4 sm:$0xff]  }
 0x7fa   :  { %3577 = vmatprep.subr.bf16.mxu0 %v8995_v12  ;;  %3618 = vmatprep.subr.bf16.mxu1 %v8998_v14 }
 0x7fd   :  { %3578 = vmatpush1.bf16.msra.mxu0 %v8993_v15  ;;  %3619 = vmatpush1.bf16.msra.mxu1 %v8996_v16 }
 0x7fe   :  { %3579 = vmatprep.subr.bf16.mxu0 %v9001_v17  ;;  %3620 = vmatprep.subr.bf16.mxu1 %v9004_v18 }
 0x801   :  { %3580 = vmatpush1.bf16.msra.mxu0 %v8999_v20  ;;  %3621 = vmatpush1.bf16.msra.mxu1 %v9002_v62  ;;  %v9077_v62 = vld [vmem:[#allocation16 + $0x400] ss:$16 sps:$4 sm:$0xff]  }
 0x802   :  { %3581 = vmatprep.subr.bf16.mxu0 %v9007_v19  ;;  %3622 = vmatprep.subr.bf16.mxu1 %v9010_v21  ;;  %v9080_v19 = vld [vmem:[#allocation16 + $0x408] ss:$16 sps:$4 sm:$0xff]  }
 0x805   :  { %3582 = vmatpush1.bf16.msra.mxu0 %v9005_v22  ;;  %3623 = vmatpush1.bf16.msra.mxu1 %v9008_v61  ;;  %v9085_v22 = vld [vmem:[#allocation16 + $0x424] ss:$16 sps:$4 sm:$0xff]   ;;  %v9088_v61 = vld [vmem:[#allocation16 + $0x42c] ss:$16 sps:$4 sm:$0xff]  }
 0x806   :  { %3583 = vmatprep.subr.bf16.mxu0 %v9013_v23  ;;  %3624 = vmatprep.subr.bf16.mxu1 %v9016_v24  ;;  %v9083_v23 = vld [vmem:[#allocation16 + $0x420] ss:$16 sps:$4 sm:$0xff]   ;;  %v9086_v24 = vld [vmem:[#allocation16 + $0x428] ss:$16 sps:$4 sm:$0xff]  }
 0x809   :  { %3584 = vmatpush1.bf16.msra.mxu0 %v9011_v25  ;;  %3625 = vmatpush1.bf16.msra.mxu1 %v9014_v26  ;;  %v9091_v25 = vld [vmem:[#allocation16 + $0x444] ss:$16 sps:$4 sm:$0xff]   ;;  %v9094_v26 = vld [vmem:[#allocation16 + $0x44c] ss:$16 sps:$4 sm:$0xff]  }
 0x80a   :  { %3585 = vmatprep.subr.bf16.mxu0 %v9019_v27  ;;  %3626 = vmatprep.subr.bf16.mxu1 %v9022_v28  ;;  %v9089_v27 = vld [vmem:[#allocation16 + $0x440] ss:$16 sps:$4 sm:$0xff]   ;;  %v9092_v28 = vld [vmem:[#allocation16 + $0x448] ss:$16 sps:$4 sm:$0xff]  }
 0x80d   :  { %3586 = vmatpush1.bf16.msra.mxu0 %v9017_v29  ;;  %3627 = vmatpush1.bf16.msra.mxu1 %v9020_v30  ;;  %v9097_v29 = vld [vmem:[#allocation16 + $0x464] ss:$16 sps:$4 sm:$0xff]   ;;  %v9100_v30 = vld [vmem:[#allocation16 + $0x46c] ss:$16 sps:$4 sm:$0xff]  }
 0x80e   :  { %3587 = vmatprep.subr.bf16.mxu0 %v9025_v31  ;;  %3628 = vmatprep.subr.bf16.mxu1 %v9028_v32  ;;  %v9095_v31 = vld [vmem:[#allocation16 + $0x460] ss:$16 sps:$4 sm:$0xff]   ;;  %v9098_v32 = vld [vmem:[#allocation16 + $0x468] ss:$16 sps:$4 sm:$0xff]  }
 0x811   :  { %3588 = vmatpush1.bf16.msra.mxu0 %v9023_v35  ;;  %3629 = vmatpush1.bf16.msra.mxu1 %v9026_v36  ;;  %v9103_v35 = vld [vmem:[#allocation16 + $0x484] ss:$16 sps:$4 sm:$0xff]   ;;  %v9106_v36 = vld [vmem:[#allocation16 + $0x48c] ss:$16 sps:$4 sm:$0xff]  }
 0x812   :  { %3589 = vmatprep.subr.bf16.mxu0 %v9031_v37  ;;  %3630 = vmatprep.subr.bf16.mxu1 %v9034_v38  ;;  %v9101_v37 = vld [vmem:[#allocation16 + $0x480] ss:$16 sps:$4 sm:$0xff]   ;;  %v9104_v38 = vld [vmem:[#allocation16 + $0x488] ss:$16 sps:$4 sm:$0xff]  }
 0x815   :  { %3590 = vmatpush1.bf16.msra.mxu0 %v9029_v40  ;;  %3631 = vmatpush1.bf16.msra.mxu1 %v9032_v41  ;;  %v9109_v40 = vld [vmem:[#allocation16 + $0x4a4] ss:$16 sps:$4 sm:$0xff]   ;;  %v9112_v41 = vld [vmem:[#allocation16 + $0x4ac] ss:$16 sps:$4 sm:$0xff]  }
 0x816   :  { %3591 = vmatprep.subr.bf16.mxu0 %v9037_v43  ;;  %3632 = vmatprep.subr.bf16.mxu1 %v9040_v44  ;;  %v9107_v43 = vld [vmem:[#allocation16 + $0x4a0] ss:$16 sps:$4 sm:$0xff]   ;;  %v9110_v44 = vld [vmem:[#allocation16 + $0x4a8] ss:$16 sps:$4 sm:$0xff]  }
 0x819   :  { %3592 = vmatpush1.bf16.msra.mxu0 %v9035_v45  ;;  %3633 = vmatpush1.bf16.msra.mxu1 %v9038_v46  ;;  %v9115_v45 = vld [vmem:[#allocation16 + $0x4c4] ss:$16 sps:$4 sm:$0xff]   ;;  %v9118_v46 = vld [vmem:[#allocation16 + $0x4cc] ss:$16 sps:$4 sm:$0xff]  }
 0x81a   :  { %3593 = vmatprep.subr.bf16.mxu0 %v9043_v47  ;;  %3634 = vmatprep.subr.bf16.mxu1 %v9046_v48  ;;  %v9113_v47 = vld [vmem:[#allocation16 + $0x4c0] ss:$16 sps:$4 sm:$0xff]   ;;  %v9116_v48 = vld [vmem:[#allocation16 + $0x4c8] ss:$16 sps:$4 sm:$0xff]  }
 0x81d   :  { %3594 = vmatpush1.bf16.msra.mxu0 %v9041_v49  ;;  %3635 = vmatpush1.bf16.msra.mxu1 %v9044_v50  ;;  %v9121_v49 = vld [vmem:[#allocation16 + $0x4e4] ss:$16 sps:$4 sm:$0xff]   ;;  %v9124_v50 = vld [vmem:[#allocation16 + $0x4ec] ss:$16 sps:$4 sm:$0xff]  }
 0x81e   :  { %3595 = vmatprep.subr.bf16.mxu0 %v9049_v51  ;;  %3636 = vmatprep.subr.bf16.mxu1 %v9052_v52  ;;  %v9119_v51 = vld [vmem:[#allocation16 + $0x4e0] ss:$16 sps:$4 sm:$0xff]   ;;  %v9122_v52 = vld [vmem:[#allocation16 + $0x4e8] ss:$16 sps:$4 sm:$0xff]  }
 0x821   :  { %3596 = vmatpush1.bf16.msra.mxu0 %v9047_v53  ;;  %3637 = vmatpush1.bf16.msra.mxu1 %v9050_v54  ;;  %v9127_v53 = vld [vmem:[#allocation16 + $0x504] ss:$16 sps:$4 sm:$0xff]   ;;  %v9130_v54 = vld [vmem:[#allocation16 + $0x50c] ss:$16 sps:$4 sm:$0xff]  }
 0x822   :  { %3597 = vmatprep.subr.bf16.mxu0 %v9055_v55  ;;  %3638 = vmatprep.subr.bf16.mxu1 %v9058_v56  ;;  %v9125_v55 = vld [vmem:[#allocation16 + $0x500] ss:$16 sps:$4 sm:$0xff]   ;;  %v9128_v56 = vld [vmem:[#allocation16 + $0x508] ss:$16 sps:$4 sm:$0xff]  }
 0x825   :  { %3598 = vmatpush1.bf16.msra.mxu0 %v9053_v57  ;;  %3639 = vmatpush1.bf16.msra.mxu1 %v9056_v58  ;;  %v9133_v57 = vld [vmem:[#allocation16 + $0x524] ss:$16 sps:$4 sm:$0xff]   ;;  %v9136_v58 = vld [vmem:[#allocation16 + $0x52c] ss:$16 sps:$4 sm:$0xff]  }
 0x826   :  { %3599 = vmatprep.subr.bf16.mxu0 %v9061_v63  ;;  %3640 = vmatprep.subr.bf16.mxu1 %v9064_v1  ;;  %v9131_v63 = vld [vmem:[#allocation16 + $0x520] ss:$16 sps:$4 sm:$0xff]   ;;  %v9134_v1 = vld [vmem:[#allocation16 + $0x528] ss:$16 sps:$4 sm:$0xff]  }
 0x829   :  { %3600 = vmatpush1.bf16.msra.mxu0 %v9059_v2  ;;  %3641 = vmatpush1.bf16.msra.mxu1 %v9062_v3  ;;  %v9139_v2 = vld [vmem:[#allocation16 + $0x544] ss:$16 sps:$4 sm:$0xff]   ;;  %v9142_v3 = vld [vmem:[#allocation16 + $0x54c] ss:$16 sps:$4 sm:$0xff]  }
 0x82a   :  { %3601 = vmatprep.subr.bf16.mxu0 %v9067_v4  ;;  %3642 = vmatprep.subr.bf16.mxu1 %v9070_v5  ;;  %v9137_v4 = vld [vmem:[#allocation16 + $0x540] ss:$16 sps:$4 sm:$0xff]   ;;  %v9140_v5 = vld [vmem:[#allocation16 + $0x548] ss:$16 sps:$4 sm:$0xff]  }
 0x82d   :  { %3602 = vmatpush1.bf16.msra.mxu0 %v9065_v6  ;;  %3643 = vmatpush1.bf16.msra.mxu1 %v9068_v7  ;;  %v9145_v6 = vld [vmem:[#allocation16 + $0x564] ss:$16 sps:$4 sm:$0xff]   ;;  %v9148_v7 = vld [vmem:[#allocation16 + $0x56c] ss:$16 sps:$4 sm:$0xff]  }
 0x82e   :  { %3603 = vmatprep.subr.bf16.mxu0 %v9073_v8  ;;  %3644 = vmatprep.subr.bf16.mxu1 %v9076_v9  ;;  %v9143_v8 = vld [vmem:[#allocation16 + $0x560] ss:$16 sps:$4 sm:$0xff]   ;;  %v9146_v9 = vld [vmem:[#allocation16 + $0x568] ss:$16 sps:$4 sm:$0xff]  }
 0x831   :  { %3604 = vmatpush1.bf16.msra.mxu0 %v9071_v60  ;;  %3645 = vmatpush1.bf16.msra.mxu1 %v9074_v10  ;;  %v9151_v60 = vld [vmem:[#allocation16 + $0x584] ss:$16 sps:$4 sm:$0xff]   ;;  %v9154_v10 = vld [vmem:[#allocation16 + $0x58c] ss:$16 sps:$4 sm:$0xff]  }
 0x832   :  { %4105 = vmatprep.subr.bf16.mxu0 %v9079_v33  ;;  %4146 = vmatprep.subr.bf16.mxu1 %v9082_v11  ;;  %v9149_v33 = vld [vmem:[#allocation16 + $0x580] ss:$16 sps:$4 sm:$0xff]   ;;  %v9152_v11 = vld [vmem:[#allocation16 + $0x588] ss:$16 sps:$4 sm:$0xff]  }
 0x8c7   :  { %v2909_v12 = vpop.f32.mrb[50].mxu0  ;;  %v3180_v14 = vpop.f32.mrb[54].mxu1 }
 0x8c8   :  { %v3185_v15 = vmax.f32 %v2909_v12, %v3180_v14  ;;  %v2911_v16 = vpop.f32.mrb[51].mxu0  ;;  %v3182_v17 = vpop.f32.mrb[55].mxu1  ;;  %v9157_v12 = vld [vmem:[#allocation16 + $0x5a4] ss:$16 sps:$4 sm:$0xff]   ;;  %v9160_v14 = vld [vmem:[#allocation16 + $0x5ac] ss:$16 sps:$4 sm:$0xff]  }
 0x8c9   :  { %v3186_v18 = vmax.f32 %v2911_v16, %v3182_v17  ;;  %v9158_v16 = vld [vmem:[#allocation16 + $0x5a8] ss:$16 sps:$4 sm:$0xff]   ;;  %v9163_v17 = vld [vmem:[#allocation16 + $0x5c4] ss:$16 sps:$4 sm:$0xff]  }
 0x8ca   :  { %v10383_v21 = vpack.c.bf16 %v3185_v15, %v3185_v15  ;;  %v9155_v15 = vld [vmem:[#allocation16 + $0x5a0] ss:$16 sps:$4 sm:$0xff]  }
 0x8cb   :  { %v10381_v20 = vpack.c.bf16 %v3186_v18, %v3186_v18  ;;  %v9166_v18 = vld [vmem:[#allocation16 + $0x5cc] ss:$16 sps:$4 sm:$0xff]  }
 0x8cd   :  { %3605 = vmatprep.mubr.bf16.mxu0 %v10381_v20  ;;  %3646 = vmatprep.mubr.bf16.mxu1 %v10381_v20 }
 0x8ce   :  { %3606 = vmatmul.mubr.bf16.vlgmr.msra.gmra.mrb[52].mxu0 %v10383_v21  ;;  %3647 = vmatmul.mubr.bf16.vlgmr.msra.gmra.mrb[56].mxu1 %v10383_v21 }
 0x8cf   :  { %4106 = vmatpush1.bf16.msra.mxu0 %v9077_v62  ;;  %4147 = vmatpush1.bf16.msra.mxu1 %v9080_v19  ;;  %v9161_v62 = vld [vmem:[#allocation16 + $0x5c0] ss:$16 sps:$4 sm:$0xff]   ;;  %v9164_v19 = vld [vmem:[#allocation16 + $0x5c8] ss:$16 sps:$4 sm:$0xff]  }
 0x8d0   :  { %4137 = vmatprep.mubr.bf16.mxu0 %v10381_v20  ;;  %4178 = vmatprep.mubr.bf16.mxu1 %v10381_v20 }
 0x8d1   :  { %4107 = vmatprep.subr.bf16.mxu0 %v9085_v22  ;;  %4148 = vmatprep.subr.bf16.mxu1 %v9088_v61  ;;  %v9169_v22 = vld [vmem:[#allocation16 + $0x5e4] ss:$16 sps:$4 sm:$0xff]   ;;  %v9172_v61 = vld [vmem:[#allocation16 + $0x5ec] ss:$16 sps:$4 sm:$0xff]  }
 0x8d3   :  { %4108 = vmatpush1.bf16.msra.mxu0 %v9083_v23  ;;  %4149 = vmatpush1.bf16.msra.mxu1 %v9086_v24  ;;  %v9167_v23 = vld [vmem:[#allocation16 + $0x5e0] ss:$16 sps:$4 sm:$0xff]   ;;  %v9170_v24 = vld [vmem:[#allocation16 + $0x5e8] ss:$16 sps:$4 sm:$0xff]  }
 0x8d4   :  { %4109 = vmatprep.subr.bf16.mxu0 %v9091_v25  ;;  %4150 = vmatprep.subr.bf16.mxu1 %v9094_v26 }
 0x8d7   :  { %4110 = vmatpush1.bf16.msra.mxu0 %v9089_v27  ;;  %4151 = vmatpush1.bf16.msra.mxu1 %v9092_v28  ;;  %v4187_v27 = vld [vmem:[#allocation14] sm:$0xff] }
 0x8d8   :  { %4111 = vmatprep.subr.bf16.mxu0 %v9097_v29  ;;  %4152 = vmatprep.subr.bf16.mxu1 %v9100_v30  ;;  %v9175_v30 = vld [vmem:[#allocation16 + $0x204] ss:$16 sps:$4 sm:$0xff]  }
 0x8db   :  { %4112 = vmatpush1.bf16.msra.mxu0 %v9095_v31  ;;  %4153 = vmatpush1.bf16.msra.mxu1 %v9098_v32  ;;  %v9178_v31 = vld [vmem:[#allocation16 + $0x20c] ss:$16 sps:$4 sm:$0xff]  }
 0x8dc   :  { %4113 = vmatprep.subr.bf16.mxu0 %v9103_v35  ;;  %4154 = vmatprep.subr.bf16.mxu1 %v9106_v36  ;;  %v9173_v36 = vld [vmem:[#allocation16 + $0x200] ss:$16 sps:$4 sm:$0xff]  }
 0x8df   :  { %4114 = vmatpush1.bf16.msra.mxu0 %v9101_v37  ;;  %4155 = vmatpush1.bf16.msra.mxu1 %v9104_v38 }
 0x8e0   :  { %4115 = vmatprep.subr.bf16.mxu0 %v9109_v40  ;;  %4156 = vmatprep.subr.bf16.mxu1 %v9112_v41  ;;  %v9176_v40 = vld [vmem:[#allocation16 + $0x208] ss:$16 sps:$4 sm:$0xff]   ;;  %v9181_v41 = vld [vmem:[#allocation16 + $0x224] ss:$16 sps:$4 sm:$0xff]  }
 0x8e3   :  { %4116 = vmatpush1.bf16.msra.mxu0 %v9107_v43  ;;  %4157 = vmatpush1.bf16.msra.mxu1 %v9110_v44  ;;  %v9184_v43 = vld [vmem:[#allocation16 + $0x22c] ss:$16 sps:$4 sm:$0xff]   ;;  %v9179_v44 = vld [vmem:[#allocation16 + $0x220] ss:$16 sps:$4 sm:$0xff]  }
 0x8e4   :  { %4117 = vmatprep.subr.bf16.mxu0 %v9115_v45  ;;  %4158 = vmatprep.subr.bf16.mxu1 %v9118_v46  ;;  %v9182_v45 = vld [vmem:[#allocation16 + $0x228] ss:$16 sps:$4 sm:$0xff]   ;;  %v9187_v46 = vld [vmem:[#allocation16 + $0x244] ss:$16 sps:$4 sm:$0xff]  }
 0x8e7   :  { %4118 = vmatpush1.bf16.msra.mxu0 %v9113_v47  ;;  %4159 = vmatpush1.bf16.msra.mxu1 %v9116_v48  ;;  %v9190_v47 = vld [vmem:[#allocation16 + $0x24c] ss:$16 sps:$4 sm:$0xff]   ;;  %v9185_v48 = vld [vmem:[#allocation16 + $0x240] ss:$16 sps:$4 sm:$0xff]  }
 0x8e8   :  { %4119 = vmatprep.subr.bf16.mxu0 %v9121_v49  ;;  %4160 = vmatprep.subr.bf16.mxu1 %v9124_v50  ;;  %v9188_v49 = vld [vmem:[#allocation16 + $0x248] ss:$16 sps:$4 sm:$0xff]   ;;  %v9193_v50 = vld [vmem:[#allocation16 + $0x264] ss:$16 sps:$4 sm:$0xff]  }
 0x8eb   :  { %4120 = vmatpush1.bf16.msra.mxu0 %v9119_v51  ;;  %4161 = vmatpush1.bf16.msra.mxu1 %v9122_v52  ;;  %v9196_v51 = vld [vmem:[#allocation16 + $0x26c] ss:$16 sps:$4 sm:$0xff]   ;;  %v9191_v52 = vld [vmem:[#allocation16 + $0x260] ss:$16 sps:$4 sm:$0xff]  }
 0x8ec   :  { %4121 = vmatprep.subr.bf16.mxu0 %v9127_v53  ;;  %4162 = vmatprep.subr.bf16.mxu1 %v9130_v54  ;;  %v9194_v53 = vld [vmem:[#allocation16 + $0x268] ss:$16 sps:$4 sm:$0xff]   ;;  %v9199_v54 = vld [vmem:[#allocation16 + $0x284] ss:$16 sps:$4 sm:$0xff]  }
 0x8ef   :  { %4122 = vmatpush1.bf16.msra.mxu0 %v9125_v55  ;;  %4163 = vmatpush1.bf16.msra.mxu1 %v9128_v56  ;;  %v9197_v55 = vld [vmem:[#allocation16 + $0x280] ss:$16 sps:$4 sm:$0xff]   ;;  %v9200_v56 = vld [vmem:[#allocation16 + $0x288] ss:$16 sps:$4 sm:$0xff]  }
 0x8f0   :  { %4123 = vmatprep.subr.bf16.mxu0 %v9133_v57  ;;  %4164 = vmatprep.subr.bf16.mxu1 %v9136_v58  ;;  %v9205_v57 = vld [vmem:[#allocation16 + $0x2a4] ss:$16 sps:$4 sm:$0xff]   ;;  %v9208_v58 = vld [vmem:[#allocation16 + $0x2ac] ss:$16 sps:$4 sm:$0xff]  }
 0x8f3   :  { %4124 = vmatpush1.bf16.msra.mxu0 %v9131_v63  ;;  %4165 = vmatpush1.bf16.msra.mxu1 %v9134_v1  ;;  %v9203_v63 = vld [vmem:[#allocation16 + $0x2a0] ss:$16 sps:$4 sm:$0xff]   ;;  %v9206_v1 = vld [vmem:[#allocation16 + $0x2a8] ss:$16 sps:$4 sm:$0xff]  }
 0x8f4   :  { %4125 = vmatprep.subr.bf16.mxu0 %v9139_v2  ;;  %4166 = vmatprep.subr.bf16.mxu1 %v9142_v3  ;;  %v9211_v2 = vld [vmem:[#allocation16 + $0x2c4] ss:$16 sps:$4 sm:$0xff]   ;;  %v9214_v3 = vld [vmem:[#allocation16 + $0x2cc] ss:$16 sps:$4 sm:$0xff]  }
 0x8f7   :  { %4126 = vmatpush1.bf16.msra.mxu0 %v9137_v4  ;;  %4167 = vmatpush1.bf16.msra.mxu1 %v9140_v5  ;;  %v9209_v4 = vld [vmem:[#allocation16 + $0x2c0] ss:$16 sps:$4 sm:$0xff]   ;;  %v9212_v5 = vld [vmem:[#allocation16 + $0x2c8] ss:$16 sps:$4 sm:$0xff]  }
 0x8f8   :  { %4127 = vmatprep.subr.bf16.mxu0 %v9145_v6  ;;  %4168 = vmatprep.subr.bf16.mxu1 %v9148_v7  ;;  %v9217_v6 = vld [vmem:[#allocation16 + $0x2e4] ss:$16 sps:$4 sm:$0xff]   ;;  %v9220_v7 = vld [vmem:[#allocation16 + $0x2ec] ss:$16 sps:$4 sm:$0xff]  }
 0x8fb   :  { %4128 = vmatpush1.bf16.msra.mxu0 %v9143_v8  ;;  %4169 = vmatpush1.bf16.msra.mxu1 %v9146_v9  ;;  %v9215_v8 = vld [vmem:[#allocation16 + $0x2e0] ss:$16 sps:$4 sm:$0xff]   ;;  %v9218_v9 = vld [vmem:[#allocation16 + $0x2e8] ss:$16 sps:$4 sm:$0xff]  }
 0x8fc   :  { %4129 = vmatprep.subr.bf16.mxu0 %v9151_v60  ;;  %4170 = vmatprep.subr.bf16.mxu1 %v9154_v10  ;;  %v9223_v60 = vld [vmem:[#allocation16 + $0x304] ss:$16 sps:$4 sm:$0xff]   ;;  %v9226_v10 = vld [vmem:[#allocation16 + $0x30c] ss:$16 sps:$4 sm:$0xff]  }
 0x8ff   :  { %4130 = vmatpush1.bf16.msra.mxu0 %v9149_v33  ;;  %4171 = vmatpush1.bf16.msra.mxu1 %v9152_v11  ;;  %v9221_v33 = vld [vmem:[#allocation16 + $0x300] ss:$16 sps:$4 sm:$0xff]   ;;  %v9224_v11 = vld [vmem:[#allocation16 + $0x308] ss:$16 sps:$4 sm:$0xff]  }
 0x900   :  { %4131 = vmatprep.subr.bf16.mxu0 %v9157_v12  ;;  %4172 = vmatprep.subr.bf16.mxu1 %v9160_v14  ;;  %v9229_v12 = vld [vmem:[#allocation16 + $0x324] ss:$16 sps:$4 sm:$0xff]   ;;  %v9232_v14 = vld [vmem:[#allocation16 + $0x32c] ss:$16 sps:$4 sm:$0xff]  }
 0x903   :  { %4132 = vmatpush1.bf16.msra.mxu0 %v9155_v15  ;;  %4173 = vmatpush1.bf16.msra.mxu1 %v9158_v16  ;;  %v9227_v15 = vld [vmem:[#allocation16 + $0x320] ss:$16 sps:$4 sm:$0xff]   ;;  %v9230_v16 = vld [vmem:[#allocation16 + $0x328] ss:$16 sps:$4 sm:$0xff]  }
 0x904   :  { %4133 = vmatprep.subr.bf16.mxu0 %v9163_v17  ;;  %4174 = vmatprep.subr.bf16.mxu1 %v9166_v18  ;;  %v9235_v17 = vld [vmem:[#allocation16 + $0x344] ss:$16 sps:$4 sm:$0xff]   ;;  %v9238_v18 = vld [vmem:[#allocation16 + $0x34c] ss:$16 sps:$4 sm:$0xff]  }
 0x907   :  { %4134 = vmatpush1.bf16.msra.mxu0 %v9161_v62  ;;  %4175 = vmatpush1.bf16.msra.mxu1 %v9164_v19  ;;  %v9233_v62 = vld [vmem:[#allocation16 + $0x340] ss:$16 sps:$4 sm:$0xff]   ;;  %v9236_v19 = vld [vmem:[#allocation16 + $0x348] ss:$16 sps:$4 sm:$0xff]  }
 0x908   :  { %4135 = vmatprep.subr.bf16.mxu0 %v9169_v22  ;;  %4176 = vmatprep.subr.bf16.mxu1 %v9172_v61  ;;  %v9241_v22 = vld [vmem:[#allocation16 + $0x364] ss:$16 sps:$4 sm:$0xff]   ;;  %v9244_v61 = vld [vmem:[#allocation16 + $0x36c] ss:$16 sps:$4 sm:$0xff]  }
 0x90b   :  { %4136 = vmatpush1.bf16.msra.mxu0 %v9167_v23  ;;  %4177 = vmatpush1.bf16.msra.mxu1 %v9170_v24  ;;  %v9239_v23 = vld [vmem:[#allocation16 + $0x360] ss:$16 sps:$4 sm:$0xff]   ;;  %v9242_v24 = vld [vmem:[#allocation16 + $0x368] ss:$16 sps:$4 sm:$0xff]  }
 0x90e   :  { %4138 = vmatmul.mubr.bf16.vlgmr.msra.gmra.mrb[56].mxu0 %v10383_v21  ;;  %4179 = vmatmul.mubr.bf16.vlgmr.msra.gmra.mrb[60].mxu1 %v10383_v21 }
 0x90f   :  { %4256 = vmatprep.mubr.f32.mxu0 %v9830_v13  ;;  %4327 = vmatprep.mubr.f32.mxu1 %v9830_v13 }
 0x9a1   :  { %v3607_v25 = vpop.f32.mrb[52].mxu0  ;;  %v3648_v26 = vpop.f32.mrb[56].mxu1 }
 0x9a2   :  { %v3609_v28 = vpop.f32.mrb[53].mxu0  ;;  %v3650_v29 = vpop.f32.mrb[57].mxu1 }
 0x9a3   :  { %v3611_v32 = vpop.f32.mrb[54].mxu0  ;;  %v3652_v35 = vpop.f32.mrb[58].mxu1  ;;  %4192 = vmatprep.subr.mxu0 %v3609_v28  ;;  %4263 = vmatprep.subr.mxu1 %v3650_v29  ;;  %v9248_v28 = vld [vmem:[#allocation16 + $0x388] ss:$16 sps:$4 sm:$0xff]   ;;  %v9253_v29 = vld [vmem:[#allocation16 + $0x3a4] ss:$16 sps:$4 sm:$0xff]  }
 0x9a4   :  { %v3612_v37 = vpop.f32.mrb[55].mxu0  ;;  %v3653_v38 = vpop.f32.mrb[59].mxu1  ;;  %4193 = vmatpush1.msra.mxu0 %v3607_v25  ;;  %4264 = vmatpush1.msra.mxu1 %v3648_v26  ;;  %v9247_v25 = vld [vmem:[#allocation16 + $0x384] ss:$16 sps:$4 sm:$0xff]   ;;  %v9250_v26 = vld [vmem:[#allocation16 + $0x38c] ss:$16 sps:$4 sm:$0xff]  }
 0x9a5   :  { %7651 = vmatmul.mubr.msk.f32.vlgmr.msra.gmra.mrb[60].mxu0 %vm4188_vm2, %v4187_v27  ;;  %7652 = vmatmul.mubr.msk.f32.vlgmr.msra.gmra.mrb[64].mxu1 %vm4188_vm2, %v4187_v27  ;;  %v9245_v27 = vld [vmem:[#allocation16 + $0x380] ss:$16 sps:$4 sm:$0xff]   ;;  %v9254_v32 = vld [vmem:[#allocation16 + $0x3a8] ss:$16 sps:$4 sm:$0xff]   ;;  %v9259_v35 = vld [vmem:[#allocation16 + $0x3c4] ss:$16 sps:$4 sm:$0xff]  }
 0x9a6   :  { %4654 = vmatprep.subr.bf16.mxu0 %v9175_v30  ;;  %4695 = vmatprep.subr.bf16.mxu1 %v9178_v31  ;;  %v9256_v30 = vld [vmem:[#allocation16 + $0x3ac] ss:$16 sps:$4 sm:$0xff]   ;;  %v9251_v31 = vld [vmem:[#allocation16 + $0x3a0] ss:$16 sps:$4 sm:$0xff]   ;;  %v9260_v38 = vld [vmem:[#allocation16 + $0x3c8] ss:$16 sps:$4 sm:$0xff]  }
 0x9a7   :  { %4655 = vmatpush1.bf16.msra.mxu0 %v9173_v36  ;;  %4686 = vmatprep.mubr.bf16.mxu0 %v10381_v20  ;;  %v9262_v36 = vld [vmem:[#allocation16 + $0x3cc] ss:$16 sps:$4 sm:$0xff]   ;;  %v9257_v37 = vld [vmem:[#allocation16 + $0x3c0] ss:$16 sps:$4 sm:$0xff]  }
 0x9a8   :  { %4696 = vmatpush1.bf16.msra.mxu1 %v9176_v40  ;;  %4727 = vmatprep.mubr.bf16.mxu1 %v10381_v20  ;;  %v9202_v20 = vld [vmem:[#allocation16 + $0x28c] ss:$16 sps:$4 sm:$0xff]   ;;  %v9265_v40 = vld [vmem:[#allocation16 + $0x3e4] ss:$16 sps:$4 sm:$0xff]  }
 0x9a9   :  { %4656 = vmatprep.subr.bf16.mxu0 %v9181_v41  ;;  %4697 = vmatprep.subr.bf16.mxu1 %v9184_v43  ;;  %v9268_v41 = vld [vmem:[#allocation16 + $0x3ec] ss:$16 sps:$4 sm:$0xff]   ;;  %v9263_v43 = vld [vmem:[#allocation16 + $0x3e0] ss:$16 sps:$4 sm:$0xff]  }
 0x9ab   :  { %4657 = vmatpush1.bf16.msra.mxu0 %v9179_v44  ;;  %v9266_v44 = vld [vmem:[#allocation16 + $0x3e8] ss:$16 sps:$4 sm:$0xff]  }
 0x9ac   :  { %4698 = vmatpush1.bf16.msra.mxu1 %v9182_v45  ;;  %4658 = vmatprep.subr.bf16.mxu0 %v9187_v46 }
 0x9ad   :  { %4699 = vmatprep.subr.bf16.mxu1 %v9190_v47 }
 0x9af   :  { %4659 = vmatpush1.bf16.msra.mxu0 %v9185_v48 }
 0x9b0   :  { %4700 = vmatpush1.bf16.msra.mxu1 %v9188_v49  ;;  %4660 = vmatprep.subr.bf16.mxu0 %v9193_v50 }
 0x9b1   :  { %4701 = vmatprep.subr.bf16.mxu1 %v9196_v51 }
 0x9b3   :  { %4661 = vmatpush1.bf16.msra.mxu0 %v9191_v52 }
 0x9b4   :  { %4702 = vmatpush1.bf16.msra.mxu1 %v9194_v53  ;;  %4662 = vmatprep.subr.bf16.mxu0 %v9199_v54  ;;  %v4737_v53 = vld [vmem:[#allocation14 + $0x8] sm:$0xff] }
 0x9b5   :  { %4703 = vmatprep.subr.bf16.mxu1 %v9202_v20 }
 0x9b7   :  { %4663 = vmatpush1.bf16.msra.mxu0 %v9197_v55 }
 0x9b8   :  { %4704 = vmatpush1.bf16.msra.mxu1 %v9200_v56  ;;  %4664 = vmatprep.subr.bf16.mxu0 %v9205_v57 }
 0x9b9   :  { %4705 = vmatprep.subr.bf16.mxu1 %v9208_v58 }
 0x9bb   :  { %4665 = vmatpush1.bf16.msra.mxu0 %v9203_v63 }
 0x9bc   :  { %4706 = vmatpush1.bf16.msra.mxu1 %v9206_v1  ;;  %4666 = vmatprep.subr.bf16.mxu0 %v9211_v2 }
 0x9bd   :  { %4707 = vmatprep.subr.bf16.mxu1 %v9214_v3 }
 0x9bf   :  { %4667 = vmatpush1.bf16.msra.mxu0 %v9209_v4 }
 0x9c0   :  { %4708 = vmatpush1.bf16.msra.mxu1 %v9212_v5  ;;  %4668 = vmatprep.subr.bf16.mxu0 %v9217_v6 }
 0x9c1   :  { %4709 = vmatprep.subr.bf16.mxu1 %v9220_v7 }
 0x9c3   :  { %4669 = vmatpush1.bf16.msra.mxu0 %v9215_v8 }
 0x9c4   :  { %4710 = vmatpush1.bf16.msra.mxu1 %v9218_v9  ;;  %4670 = vmatprep.subr.bf16.mxu0 %v9223_v60  ;;  %v4887_v9 = vld [vmem:[#allocation17] sm:$0xf] }
 0x9c5   :  { %4711 = vmatprep.subr.bf16.mxu1 %v9226_v10  ;;  %v4892_v60 = vrot.slane %v4887_v9, %v10306_v39 }
 0x9c7   :  { %4671 = vmatpush1.bf16.msra.mxu0 %v9221_v33  ;;  %v4900_v33 = vrot.slane %v4887_v9, %v2321_v0  ;;  %v4917_v0 = vld [vmem:[#allocation19] sm:$0xf] }
 0x9c8   :  { %4712 = vmatpush1.bf16.msra.mxu1 %v9224_v11  ;;  %4672 = vmatprep.subr.bf16.mxu0 %v9229_v12  ;;  %v4896_v11 = vrot.slane %v4887_v9, %v10312_v42 }
 0x9c9   :  { %4713 = vmatprep.subr.bf16.mxu1 %v9232_v14 }
 0x9cb   :  { %4673 = vmatpush1.bf16.msra.mxu0 %v9227_v15 }
 0x9cc   :  { %4714 = vmatpush1.bf16.msra.mxu1 %v9230_v16  ;;  %4674 = vmatprep.subr.bf16.mxu0 %v9235_v17  ;;  %v4904_v16 = vrot.slane %v4887_v9, %v2325_v59  ;;  %v5216_v59 = vld [vmem:[#allocation20 + $0x10] sm:$0xff] }
 0x9cd   :  { %4715 = vmatprep.subr.bf16.mxu1 %v9238_v18 }
 0x9cf   :  { %4675 = vmatpush1.bf16.msra.mxu0 %v9233_v62 }
 0x9d0   :  { %4716 = vmatpush1.bf16.msra.mxu1 %v9236_v19  ;;  %4676 = vmatprep.subr.bf16.mxu0 %v9241_v22 }
 0x9d1   :  { %4717 = vmatprep.subr.bf16.mxu1 %v9244_v61 }
 0x9d3   :  { %4677 = vmatpush1.bf16.msra.mxu0 %v9239_v23 }
 0x9d4   :  { %4718 = vmatpush1.bf16.msra.mxu1 %v9242_v24  ;;  %4678 = vmatprep.subr.bf16.mxu0 %v9247_v25 }
 0x9d5   :  { %4719 = vmatprep.subr.bf16.mxu1 %v9250_v26 }
 0x9d7   :  { %4679 = vmatpush1.bf16.msra.mxu0 %v9245_v27 }
 0x9d8   :  { %4720 = vmatpush1.bf16.msra.mxu1 %v9248_v28  ;;  %4680 = vmatprep.subr.bf16.mxu0 %v9253_v29  ;;  %v5215_v28 = vld [vmem:[#allocation20 + $0x8] sm:$0xff] }
 0x9d9   :  { %4721 = vmatprep.subr.bf16.mxu1 %v9256_v30  ;;  %v5217_v30 = vld [vmem:[#allocation20 + $0x18] sm:$0xff] }
 0x9db   :  { %4681 = vmatpush1.bf16.msra.mxu0 %v9251_v31  ;;  %v5486_v31 = vld [vmem:[#allocation20 + $0x408] sm:$0xff] }
 0x9dc   :  { %4722 = vmatpush1.bf16.msra.mxu1 %v9254_v32  ;;  %4682 = vmatprep.subr.bf16.mxu0 %v9259_v35  ;;  %v5488_v32 = vld [vmem:[#allocation20 + $0x418] sm:$0xff]  ;;  %v5485_v35 = vld [vmem:[#allocation20 + $0x400] sm:$0xff] }
 0x9dd   :  { %4723 = vmatprep.subr.bf16.mxu1 %v9262_v36  ;;  %v5487_v36 = vld [vmem:[#allocation20 + $0x410] sm:$0xff] }
 0x9df   :  { %4683 = vmatpush1.bf16.msra.mxu0 %v9257_v37  ;;  %v5219_v37 = vld [vmem:[#allocation20 + $0x28] sm:$0xff] }
 0x9e0   :  { %4724 = vmatpush1.bf16.msra.mxu1 %v9260_v38  ;;  %4684 = vmatprep.subr.bf16.mxu0 %v9265_v40  ;;  %v5221_v38 = vld [vmem:[#allocation20 + $0x38] sm:$0xff] }
 0x9e1   :  { %v4139_v45 = vpop.f32.mrb[56].mxu0  ;;  %v4180_v46 = vpop.f32.mrb[60].mxu1  ;;  %4725 = vmatprep.subr.bf16.mxu1 %v9268_v41  ;;  %v5064_v40 = vld [vmem:[#allocation19 + $0x4] sm:$0xf]  ;;  %v8520_v41 = vpack.c.bf16 %v5217_v30, %v5215_v28 }
 0x9e2   :  { %v4141_v47 = vpop.f32.mrb[57].mxu0  ;;  %v4182_v48 = vpop.f32.mrb[61].mxu1  ;;  %v5237_v28 = vld [vmem:[#allocation20 + $0xb8] sm:$0xff] }
 0x9e3   :  { %v4143_v49 = vpop.f32.mrb[58].mxu0  ;;  %v4184_v50 = vpop.f32.mrb[62].mxu1  ;;  %4685 = vmatpush1.bf16.msra.mxu0 %v9263_v43  ;;  %v8648_v43 = vpack.c.bf16 %v5488_v32, %v5486_v31  ;;  %v5508_v30 = vld [vmem:[#allocation20 + $0x4b8] sm:$0xff] }
 0x9e4   :  { %4726 = vmatpush1.bf16.msra.mxu1 %v9266_v44  ;;  %v4144_v51 = vpop.f32.mrb[59].mxu0  ;;  %v4185_v52 = vpop.f32.mrb[63].mxu1  ;;  %4741 = vmatprep.subr.mxu0 %v4141_v47  ;;  %v5490_v44 = vld [vmem:[#allocation20 + $0x428] sm:$0xff]  ;;  %v8650_v47 = vpack.c.bf16 %v5487_v36, %v5485_v35  ;;  %v5218_v49 = vld [vmem:[#allocation20 + $0x20] sm:$0xff]  ;;  %v5220_v50 = vld [vmem:[#allocation20 + $0x30] sm:$0xff] }
 0x9e5   :  { %4812 = vmatprep.subr.mxu1 %v4182_v48  ;;  %v8524_v48 = vpack.c.bf16 %v5221_v38, %v5219_v37  ;;  %v5489_v51 = vld [vmem:[#allocation20 + $0x420] sm:$0xff]  ;;  %v5236_v35 = vld [vmem:[#allocation20 + $0xb0] sm:$0xff] }
 0x9e6   :  { %4687 = vmatmul.mubr.bf16.vlgmr.msra.gmra.mrb[64].mxu0 %v10383_v21  ;;  %v5505_v36 = vld [vmem:[#allocation20 + $0x4a0] sm:$0xff]  ;;  %v5507_v38 = vld [vmem:[#allocation20 + $0x4b0] sm:$0xff] }
 0x9e7   :  { %4728 = vmatmul.mubr.bf16.vlgmr.msra.gmra.mrb[68].mxu1 %v10383_v21  ;;  %4742 = vmatpush1.msra.mxu0 %v4139_v45  ;;  %v5492_v45 = vld [vmem:[#allocation20 + $0x438] sm:$0xff] }
 0x9e8   :  { %4813 = vmatpush1.msra.mxu1 %v4180_v46  ;;  %4805 = vmatprep.mubr.f32.mxu0 %v9830_v13  ;;  %v8522_v46 = vpack.c.bf16 %v5216_v59, %v5214_v34  ;;  %v8652_v52 = vpack.c.bf16 %v5492_v45, %v5490_v44  ;;  %v5234_v59 = vld [vmem:[#allocation20 + $0xa0] sm:$0xff]  ;;  %v5512_v44 = vld [vmem:[#allocation20 + $0x4d8] sm:$0xff] }
 0x9e9   :  { %4876 = vmatprep.mubr.f32.mxu1 %v9830_v13  ;;  %v8542_v45 = vpack.c.bf16 %v5236_v35, %v5234_v59  ;;  %v5256_v59 = vld [vmem:[#allocation20 + $0x150] sm:$0xff]  ;;  %v5525_v35 = vld [vmem:[#allocation20 + $0x540] sm:$0xff] }
 0x9ee   :  { %7717 = vmatmul.mubr.msk.f32.vlgmr.msra.gmra.mrb[62].mxu0 %vm4188_vm2, %v4737_v53 }
 0x9ef   :  { %7718 = vmatmul.mubr.msk.f32.vlgmr.msra.gmra.mrb[66].mxu1 %vm4188_vm2, %v4737_v53  ;;  %4985 = vmatprep.mubr.f32.mxu0 %v9830_v13  ;;  %v5491_v53 = vld [vmem:[#allocation20 + $0x430] sm:$0xff] }
 0x9f0   :  { %5056 = vmatprep.mubr.f32.mxu1 %v9830_v13 }
 0xa78   :  { %v4258_v54 = vpop.f32.mrb[60].mxu0  ;;  %v4329_v20 = vpop.f32.mrb[64].mxu1 }
 0xa79   :  { %v4260_v55 = vpop.f32.mrb[61].mxu0  ;;  %v4331_v56 = vpop.f32.mrb[65].mxu1 }
 0xab9   :  { %v4688_v21 = vpop.f32.mrb[64].mxu0 }
 0xaba   :  { %v4689_v57 = vadd.f32 %v4688_v21, %v4258_v54  ;;  %v4729_v58 = vpop.f32.mrb[68].mxu1  ;;  %v4690_v63 = vpop.f32.mrb[65].mxu0  ;;  %v5223_v54 = vld [vmem:[#allocation20 + $0x48] sm:$0xff]  ;;  %v8526_v21 = vpack.c.bf16 %v5220_v50, %v5218_v49  ;;  %v5240_v49 = vld [vmem:[#allocation20 + $0xd0] sm:$0xff]  ;;  %v5509_v50 = vld [vmem:[#allocation20 + $0x4c0] sm:$0xff] }
 0xabb   :  { %v4730_v1 = vadd.f32 %v4729_v58, %v4329_v20  ;;  %v4691_v2 = vadd.f32 %v4690_v63, %v4260_v55  ;;  %v4731_v3 = vpop.f32.mrb[69].mxu1  ;;  %v4692_v4 = vpop.f32.mrb[66].mxu0  ;;  %v5225_v20 = vld [vmem:[#allocation20 + $0x58] sm:$0xff]  ;;  %v5494_v55 = vld [vmem:[#allocation20 + $0x448] sm:$0xff]  ;;  %v5222_v63 = vld [vmem:[#allocation20 + $0x40] sm:$0xff] }
 0xabc   :  { %v4732_v5 = vadd.f32 %v4731_v3, %v4331_v56  ;;  %v4733_v6 = vpop.f32.mrb[70].mxu1  ;;  %v4693_v7 = vpop.f32.mrb[67].mxu0  ;;  %v5496_v56 = vld [vmem:[#allocation20 + $0x458] sm:$0xff]  ;;  %v8528_v58 = vpack.c.bf16 %v5225_v20, %v5223_v54  ;;  %v5495_v4 = vld [vmem:[#allocation20 + $0x450] sm:$0xff]  ;;  %v5514_v20 = vld [vmem:[#allocation20 + $0x4e8] sm:$0xff] }
 0xabd   :  { %v4734_v8 = vpop.f32.mrb[71].mxu1  ;;  %v8656_v3 = vpack.c.bf16 %v5496_v56, %v5494_v55  ;;  %v5229_v6 = vld [vmem:[#allocation20 + $0x78] sm:$0xff]  ;;  %v5498_v7 = vld [vmem:[#allocation20 + $0x468] sm:$0xff] }
 0xabe   :  { %v5500_v8 = vld [vmem:[#allocation20 + $0x478] sm:$0xff] }
 0xabf   :  { %v5245_v54 = vld [vmem:[#allocation20 + $0xf8] sm:$0xff] }
 0xac0   :  { %v5516_v55 = vld [vmem:[#allocation20 + $0x4f8] sm:$0xff] }
 0xac1   :  { %v4807_v10 = vpop.f32.mrb[62].mxu0 }
 0xac2   :  { %v4883_v12 = vadd.f32 %v4807_v10, %v4689_v57  ;;  %v4878_v14 = vpop.f32.mrb[66].mxu1  ;;  %v4809_v15 = vpop.f32.mrb[63].mxu0  ;;  %v8654_v57 = vpack.c.bf16 %v5491_v53, %v5489_v51  ;;  %v5243_v53 = vld [vmem:[#allocation20 + $0xe8] sm:$0xff] }
 0xac3   :  { %v4885_v17 = vadd.f32 %v4878_v14, %v4730_v1  ;;  %v4884_v18 = vadd.f32 %v4809_v15, %v4691_v2  ;;  %v4880_v62 = vpop.f32.mrb[67].mxu1  ;;  %v5224_v1 = vld [vmem:[#allocation20 + $0x50] sm:$0xff]  ;;  %v5493_v2 = vld [vmem:[#allocation20 + $0x440] sm:$0xff]  ;;  %v8660_v14 = vpack.c.bf16 %v5500_v8, %v5498_v7  ;;  %v5520_v7 = vld [vmem:[#allocation20 + $0x518] sm:$0xff] }
 0xac4   :  { %v4909_v19 = vadd.f32 %v4892_v60, %v4883_v12  ;;  %v4886_v22 = vadd.f32 %v4880_v62, %v4732_v5  ;;  %v5227_v5 = vld [vmem:[#allocation20 + $0x68] sm:$0xff]  ;;  %v8530_v9 = vpack.c.bf16 %v5224_v1, %v5222_v63  ;;  %v8658_v60 = vpack.c.bf16 %v5495_v4, %v5493_v2  ;;  %v5497_v12 = vld [vmem:[#allocation20 + $0x460] sm:$0xff]  ;;  %v5499_v15 = vld [vmem:[#allocation20 + $0x470] sm:$0xff] }
 0xac5   :  { %v4911_v61 = vadd.f32 %v4900_v33, %v4885_v17  ;;  %v4910_v23 = vadd.f32 %v4896_v11, %v4884_v18  ;;  %v8532_v10 = vpack.c.bf16 %v5229_v6, %v5227_v5  ;;  %v5226_v33 = vld [vmem:[#allocation20 + $0x60] sm:$0xff]  ;;  %v5228_v11 = vld [vmem:[#allocation20 + $0x70] sm:$0xff]  ;;  %v5233_v17 = vld [vmem:[#allocation20 + $0x98] sm:$0xff]  ;;  %v8676_v2 = vpack.c.bf16 %v5516_v55, %v5514_v20 }
 0xac6   :  { %v4912_v24 = vadd.f32 %v4904_v16, %v4886_v22  ;;  %v4913_v26 = vmax.f32 %v4909_v19, 0.0  ;;  %v5231_v16 = vld [vmem:[#allocation20 + $0x88] sm:$0xff]  ;;  %v5504_v62 = vld [vmem:[#allocation20 + $0x498] sm:$0xff]  ;;  %v8534_v19 = vpack.c.bf16 %v5228_v11, %v5226_v33  ;;  %v8662_v22 = vpack.c.bf16 %v5499_v15, %v5497_v12  ;;  %v5244_v63 = vld [vmem:[#allocation20 + $0xf0] sm:$0xff] }
 0xac7   :  { %v4914_v25 = vmax.f32 %v4910_v23, 0.0  ;;  %v4915_v29 = vmax.f32 %v4911_v61, 0.0  ;;  %v5502_v18 = vld [vmem:[#allocation20 + $0x488] sm:$0xff]  ;;  %v8536_v61 = vpack.c.bf16 %v5233_v17, %v5231_v16  ;;  %v5230_v23 = vld [vmem:[#allocation20 + $0x80] sm:$0xff]  ;;  %v5249_v5 = vld [vmem:[#allocation20 + $0x118] sm:$0xff] }
 0xac8   :  { %v4916_v27 = vmax.f32 %v4912_v24, 0.0  ;;  %v5232_v24 = vld [vmem:[#allocation20 + $0x90] sm:$0xff]  ;;  %v5513_v1 = vld [vmem:[#allocation20 + $0x4e0] sm:$0xff]  ;;  %v5247_v4 = vld [vmem:[#allocation20 + $0x108] sm:$0xff] }
 0xac9   :  { %4921 = vmatprep.subr.mxu0 %v4914_v25  ;;  %v8538_v31 = vpack.c.bf16 %v5232_v24, %v5230_v23  ;;  %v5518_v6 = vld [vmem:[#allocation20 + $0x508] sm:$0xff]  ;;  %v5248_v33 = vld [vmem:[#allocation20 + $0x110] sm:$0xff]  ;;  %v5517_v11 = vld [vmem:[#allocation20 + $0x500] sm:$0xff] }
 0xaca   :  { %4992 = vmatprep.subr.mxu1 %v4916_v27  ;;  %4922 = vmatpush1.msra.mxu0 %v4913_v26  ;;  %v8680_v12 = vpack.c.bf16 %v5520_v7, %v5518_v6  ;;  %v5251_v15 = vld [vmem:[#allocation20 + $0x128] sm:$0xff]  ;;  %v5253_v16 = vld [vmem:[#allocation20 + $0x138] sm:$0xff]  ;;  %v5252_v23 = vld [vmem:[#allocation20 + $0x130] sm:$0xff] }
 0xacb   :  { %4993 = vmatpush1.msra.mxu1 %v4915_v29  ;;  %7719 = vmatmul.mubr.msk.f32.vlgmr.msra.gmra.mrb[68].mxu0 %vm4188_vm2, %v4917_v0  ;;  %v5522_v17 = vld [vmem:[#allocation20 + $0x528] sm:$0xff]  ;;  %v5521_v24 = vld [vmem:[#allocation20 + $0x520] sm:$0xff]  ;;  %v5536_v20 = vld [vmem:[#allocation20 + $0x598] sm:$0xff] }
 0xacc   :  { %5068 = vmatprep.subr.mxu0 %v4914_v25  ;;  %5139 = vmatprep.subr.mxu1 %v4916_v27  ;;  %v5501_v25 = vld [vmem:[#allocation20 + $0x480] sm:$0xff]  ;;  %v5503_v27 = vld [vmem:[#allocation20 + $0x490] sm:$0xff]  ;;  %v5540_v6 = vld [vmem:[#allocation20 + $0x5b8] sm:$0xff] }
 0xacd   :  { %7720 = vmatmul.mubr.msk.f32.vlgmr.msra.gmra.mrb[72].mxu1 %vm4188_vm2, %v4917_v0  ;;  %5069 = vmatpush1.msra.mxu0 %v4913_v26  ;;  %v8664_v26 = vpack.c.bf16 %v5504_v62, %v5502_v18  ;;  %v5235_v0 = vld [vmem:[#allocation20 + $0xa8] sm:$0xff]  ;;  %v8666_v32 = vpack.c.bf16 %v5503_v27, %v5501_v25  ;;  %v5524_v18 = vld [vmem:[#allocation20 + $0x538] sm:$0xff] }
 0xace   :  { %5140 = vmatpush1.msra.mxu1 %v4915_v29  ;;  %5132 = vmatprep.mubr.f32.mxu0 %v9830_v13  ;;  %v5506_v29 = vld [vmem:[#allocation20 + $0x4a8] sm:$0xff]  ;;  %v8540_v34 = vpack.c.bf16 %v5237_v28, %v5235_v0  ;;  %v8684_v25 = vpack.c.bf16 %v5524_v18, %v5522_v17  ;;  %v5257_v0 = vld [vmem:[#allocation20 + $0x158] sm:$0xff] }
 0xacf   :  { %7721 = vmatmul.mubr.msk.f32.vlgmr.msra.gmra.mrb[70].mxu0 %vm4188_vm2, %v5064_v40  ;;  %5203 = vmatprep.mubr.f32.mxu1 %v9830_v13  ;;  %v8668_v37 = vpack.c.bf16 %v5508_v30, %v5506_v29  ;;  %v5255_v27 = vld [vmem:[#allocation20 + $0x148] sm:$0xff]  ;;  %v5528_v29 = vld [vmem:[#allocation20 + $0x558] sm:$0xff] }
 0xad0   :  { %8521 = vmatprep.subr.bf16.mxu0 %v8520_v41  ;;  %8649 = vmatprep.subr.bf16.mxu1 %v8648_v43  ;;  %v5241_v41 = vld [vmem:[#allocation20 + $0xd8] sm:$0xff]  ;;  %v5510_v43 = vld [vmem:[#allocation20 + $0x4c8] sm:$0xff] }
 0xad1   :  { %7722 = vmatmul.mubr.msk.f32.vlgmr.msra.gmra.mrb[74].mxu1 %vm4188_vm2, %v5064_v40  ;;  %8523 = vmatpush1.bf16.msra.mxu0 %v8522_v46  ;;  %v5239_v40 = vld [vmem:[#allocation20 + $0xc8] sm:$0xff]  ;;  %v8670_v46 = vpack.c.bf16 %v5507_v38, %v5505_v36  ;;  %v8672_v51 = vpack.c.bf16 %v5512_v44, %v5510_v43  ;;  %v5532_v43 = vld [vmem:[#allocation20 + $0x578] sm:$0xff] }
 0xad2   :  { %8651 = vmatpush1.bf16.msra.mxu1 %v8650_v47  ;;  %8525 = vmatprep.subr.bf16.mxu0 %v8524_v48  ;;  %v8544_v47 = vpack.c.bf16 %v5241_v41, %v5239_v40  ;;  %v5238_v48 = vld [vmem:[#allocation20 + $0xc0] sm:$0xff]  ;;  %v5526_v28 = vld [vmem:[#allocation20 + $0x548] sm:$0xff]  ;;  %v5261_v40 = vld [vmem:[#allocation20 + $0x178] sm:$0xff] }
 0xad3   :  { %8653 = vmatprep.subr.bf16.mxu1 %v8652_v52  ;;  %v5511_v52 = vld [vmem:[#allocation20 + $0x4d0] sm:$0xff]  ;;  %v8546_v56 = vpack.c.bf16 %v5240_v49, %v5238_v48  ;;  %v8688_v36 = vpack.c.bf16 %v5528_v29, %v5526_v28  ;;  %v5259_v38 = vld [vmem:[#allocation20 + $0x168] sm:$0xff]  ;;  %v5529_v49 = vld [vmem:[#allocation20 + $0x560] sm:$0xff] }
 0xad4   :  { %v5530_v41 = vld [vmem:[#allocation20 + $0x568] sm:$0xff]  ;;  %v5260_v48 = vld [vmem:[#allocation20 + $0x170] sm:$0xff]  ;;  %v5273_v17 = vld [vmem:[#allocation20 + $0x1d8] sm:$0xff] }
 0xad5   :  { %8527 = vmatpush1.bf16.msra.mxu0 %v8526_v21  ;;  %v8674_v21 = vpack.c.bf16 %v5511_v52, %v5509_v50  ;;  %v8692_v50 = vpack.c.bf16 %v5532_v43, %v5530_v41  ;;  %v5263_v52 = vld [vmem:[#allocation20 + $0x188] sm:$0xff]  ;;  %v5277_v28 = vld [vmem:[#allocation20 + $0x1f8] sm:$0xff] }
 0xad6   :  { %8655 = vmatpush1.bf16.msra.mxu1 %v8654_v57  ;;  %8529 = vmatprep.subr.bf16.mxu0 %v8528_v58  ;;  %v8548_v57 = vpack.c.bf16 %v5245_v54, %v5243_v53  ;;  %v5242_v58 = vld [vmem:[#allocation20 + $0xe0] sm:$0xff]  ;;  %v5265_v53 = vld [vmem:[#allocation20 + $0x198] sm:$0xff]  ;;  %v5534_v54 = vld [vmem:[#allocation20 + $0x588] sm:$0xff] }
 0xad7   :  { %8657 = vmatprep.subr.bf16.mxu1 %v8656_v3  ;;  %v5515_v3 = vld [vmem:[#allocation20 + $0x4f0] sm:$0xff]  ;;  %v8550_v8 = vpack.c.bf16 %v5244_v63, %v5242_v58  ;;  %v5533_v63 = vld [vmem:[#allocation20 + $0x580] sm:$0xff]  ;;  %v5542_v18 = vld [vmem:[#allocation20 + $0x5c8] sm:$0xff] }
 0xad8   :  { %v5264_v58 = vld [vmem:[#allocation20 + $0x190] sm:$0xff]  ;;  %v5546_v29 = vld [vmem:[#allocation20 + $0x5e8] sm:$0xff]  ;;  %v5281_v41 = vld [vmem:[#allocation20 + $0x218] sm:$0xff] }
 0xad9   :  { %8531 = vmatpush1.bf16.msra.mxu0 %v8530_v9  ;;  %v8678_v9 = vpack.c.bf16 %v5515_v3, %v5513_v1  ;;  %v8696_v1 = vpack.c.bf16 %v5536_v20, %v5534_v54  ;;  %v5267_v3 = vld [vmem:[#allocation20 + $0x1a8] sm:$0xff] }
 0xada   :  { %8659 = vmatpush1.bf16.msra.mxu1 %v8658_v60  ;;  %8533 = vmatprep.subr.bf16.mxu0 %v8532_v10  ;;  %v8552_v60 = vpack.c.bf16 %v5249_v5, %v5247_v4  ;;  %v5246_v10 = vld [vmem:[#allocation20 + $0x100] sm:$0xff]  ;;  %v5269_v4 = vld [vmem:[#allocation20 + $0x1b8] sm:$0xff]  ;;  %v5538_v5 = vld [vmem:[#allocation20 + $0x5a8] sm:$0xff] }
 0xadb   :  { %8661 = vmatprep.subr.bf16.mxu1 %v8660_v14  ;;  %v5519_v14 = vld [vmem:[#allocation20 + $0x510] sm:$0xff]  ;;  %v8554_v62 = vpack.c.bf16 %v5248_v33, %v5246_v10  ;;  %v8700_v33 = vpack.c.bf16 %v5540_v6, %v5538_v5  ;;  %v5550_v43 = vld [vmem:[#allocation20 + $0x608] sm:$0xff] }
 0xadc   :  { %v5268_v10 = vld [vmem:[#allocation20 + $0x1b0] sm:$0xff]  ;;  %v5283_v54 = vld [vmem:[#allocation20 + $0x228] sm:$0xff] }
 0xadd   :  { %8535 = vmatpush1.bf16.msra.mxu0 %v8534_v19  ;;  %v8682_v19 = vpack.c.bf16 %v5519_v14, %v5517_v11  ;;  %v5537_v11 = vld [vmem:[#allocation20 + $0x5a0] sm:$0xff]  ;;  %v5284_v5 = vld [vmem:[#allocation20 + $0x230] sm:$0xff] }
 0xade   :  { %8663 = vmatpush1.bf16.msra.mxu1 %v8662_v22  ;;  %8537 = vmatprep.subr.bf16.mxu0 %v8536_v61  ;;  %v8556_v22 = vpack.c.bf16 %v5253_v16, %v5251_v15  ;;  %v5250_v61 = vld [vmem:[#allocation20 + $0x120] sm:$0xff]  ;;  %v5271_v16 = vld [vmem:[#allocation20 + $0x1c8] sm:$0xff] }
 0xadf   :  { %8665 = vmatprep.subr.bf16.mxu1 %v8664_v26  ;;  %v5523_v26 = vld [vmem:[#allocation20 + $0x530] sm:$0xff]  ;;  %v8558_v30 = vpack.c.bf16 %v5252_v23, %v5250_v61 }
 0xae0   :  { %v5272_v61 = vld [vmem:[#allocation20 + $0x1d0] sm:$0xff] }
 0xae1   :  { %8539 = vmatpush1.bf16.msra.mxu0 %v8538_v31  ;;  %v8686_v31 = vpack.c.bf16 %v5523_v26, %v5521_v24  ;;  %v5543_v26 = vld [vmem:[#allocation20 + $0x5d0] sm:$0xff] }
 0xae2   :  { %8667 = vmatpush1.bf16.msra.mxu1 %v8666_v32  ;;  %8541 = vmatprep.subr.bf16.mxu0 %v8540_v34  ;;  %v8560_v32 = vpack.c.bf16 %v5257_v0, %v5255_v27  ;;  %v5254_v34 = vld [vmem:[#allocation20 + $0x140] sm:$0xff]  ;;  %v5275_v0 = vld [vmem:[#allocation20 + $0x1e8] sm:$0xff] }
 0xae3   :  { %8669 = vmatprep.subr.bf16.mxu1 %v8668_v37  ;;  %v5527_v37 = vld [vmem:[#allocation20 + $0x550] sm:$0xff]  ;;  %v8562_v44 = vpack.c.bf16 %v5256_v59, %v5254_v34 }
 0xae4   :  { %v5276_v34 = vld [vmem:[#allocation20 + $0x1f0] sm:$0xff] }
 0xae5   :  { %8543 = vmatpush1.bf16.msra.mxu0 %v8542_v45  ;;  %v8690_v45 = vpack.c.bf16 %v5527_v37, %v5525_v35  ;;  %v5547_v37 = vld [vmem:[#allocation20 + $0x5f0] sm:$0xff] }
 0xae6   :  { %8671 = vmatpush1.bf16.msra.mxu1 %v8670_v46  ;;  %8545 = vmatprep.subr.bf16.mxu0 %v8544_v47  ;;  %v8564_v46 = vpack.c.bf16 %v5261_v40, %v5259_v38  ;;  %v5258_v47 = vld [vmem:[#allocation20 + $0x160] sm:$0xff]  ;;  %v5279_v40 = vld [vmem:[#allocation20 + $0x208] sm:$0xff] }
 0xae7   :  { %8673 = vmatprep.subr.bf16.mxu1 %v8672_v51  ;;  %v5531_v51 = vld [vmem:[#allocation20 + $0x570] sm:$0xff]  ;;  %v8566_v55 = vpack.c.bf16 %v5260_v48, %v5258_v47 }
 0xae9   :  { %8547 = vmatpush1.bf16.msra.mxu0 %v8546_v56  ;;  %v8694_v56 = vpack.c.bf16 %v5531_v51, %v5529_v49  ;;  %v5278_v49 = vld [vmem:[#allocation20 + $0x200] sm:$0xff] }
 0xaea   :  { %8675 = vmatpush1.bf16.msra.mxu1 %v8674_v21  ;;  %8549 = vmatprep.subr.bf16.mxu0 %v8548_v57  ;;  %v8568_v21 = vpack.c.bf16 %v5265_v53, %v5263_v52  ;;  %v5262_v57 = vld [vmem:[#allocation20 + $0x180] sm:$0xff]  ;;  %v5551_v53 = vld [vmem:[#allocation20 + $0x610] sm:$0xff] }
 0xaeb   :  { %8677 = vmatprep.subr.bf16.mxu1 %v8676_v2  ;;  %v5535_v2 = vld [vmem:[#allocation20 + $0x590] sm:$0xff]  ;;  %v8570_v7 = vpack.c.bf16 %v5264_v58, %v5262_v57  ;;  %v5549_v52 = vld [vmem:[#allocation20 + $0x600] sm:$0xff]  ;;  %v5556_v57 = vld [vmem:[#allocation20 + $0x638] sm:$0xff] }
 0xaed   :  { %8551 = vmatpush1.bf16.msra.mxu0 %v8550_v8  ;;  %v8698_v8 = vpack.c.bf16 %v5535_v2, %v5533_v63 }
 0xaee   :  { %8679 = vmatpush1.bf16.msra.mxu1 %v8678_v9  ;;  %8553 = vmatprep.subr.bf16.mxu0 %v8552_v60  ;;  %v8572_v9 = vpack.c.bf16 %v5269_v4, %v5267_v3  ;;  %v5266_v60 = vld [vmem:[#allocation20 + $0x1a0] sm:$0xff]  ;;  %v8714_v3 = vpack.c.bf16 %v5551_v53, %v5549_v52  ;;  %v5570_v52 = vld [vmem:[#allocation20 + $0x6a8] sm:$0xff]  ;;  %v5572_v53 = vld [vmem:[#allocation20 + $0x6b8] sm:$0xff] }
 0xaef   :  { %8681 = vmatprep.subr.bf16.mxu1 %v8680_v12  ;;  %v5539_v12 = vld [vmem:[#allocation20 + $0x5b0] sm:$0xff]  ;;  %v8574_v14 = vpack.c.bf16 %v5268_v10, %v5266_v60  ;;  %v5282_v4 = vld [vmem:[#allocation20 + $0x220] sm:$0xff]  ;;  %v5287_v10 = vld [vmem:[#allocation20 + $0x248] sm:$0xff] }
 0xaf0   :  { %v8702_v15 = vpack.c.bf16 %v5539_v12, %v5537_v11  ;;  %v5555_v60 = vld [vmem:[#allocation20 + $0x630] sm:$0xff]  ;;  %v5289_v12 = vld [vmem:[#allocation20 + $0x258] sm:$0xff] }
 0xaf1   :  { %8555 = vmatpush1.bf16.msra.mxu0 %v8554_v62  ;;  %v8576_v62 = vpack.c.bf16 %v5273_v17, %v5271_v16  ;;  %v8590_v17 = vpack.c.bf16 %v5284_v5, %v5282_v4  ;;  %v5576_v4 = vld [vmem:[#allocation20 + $0x6d8] sm:$0xff] }
 0xaf2   :  { %8683 = vmatpush1.bf16.msra.mxu1 %v8682_v19  ;;  %8557 = vmatprep.subr.bf16.mxu0 %v8556_v22  ;;  %v5544_v19 = vld [vmem:[#allocation20 + $0x5d8] sm:$0xff]  ;;  %v5270_v22 = vld [vmem:[#allocation20 + $0x1c0] sm:$0xff] }
 0xaf3   :  { %8685 = vmatprep.subr.bf16.mxu1 %v8684_v25  ;;  %v8704_v23 = vpack.c.bf16 %v5544_v19, %v5542_v18  ;;  %v8578_v24 = vpack.c.bf16 %v5272_v61, %v5270_v22  ;;  %v5541_v25 = vld [vmem:[#allocation20 + $0x5c0] sm:$0xff]  ;;  %v5288_v19 = vld [vmem:[#allocation20 + $0x250] sm:$0xff]  ;;  %v8592_v22 = vpack.c.bf16 %v5289_v12, %v5287_v10  ;;  %v5307_v12 = vld [vmem:[#allocation20 + $0x2e8] sm:$0xff] }
 0xaf4   :  { %v8706_v27 = vpack.c.bf16 %v5543_v26, %v5541_v25  ;;  %v5291_v25 = vld [vmem:[#allocation20 + $0x268] sm:$0xff]  ;;  %v5293_v26 = vld [vmem:[#allocation20 + $0x278] sm:$0xff]  ;;  %v5573_v10 = vld [vmem:[#allocation20 + $0x6c0] sm:$0xff] }
 0xaf5   :  { %8559 = vmatpush1.bf16.msra.mxu0 %v8558_v30  ;;  %v8580_v30 = vpack.c.bf16 %v5277_v28, %v5275_v0  ;;  %v5564_v0 = vld [vmem:[#allocation20 + $0x678] sm:$0xff] }
 0xaf6   :  { %8687 = vmatpush1.bf16.msra.mxu1 %v8686_v31  ;;  %8561 = vmatprep.subr.bf16.mxu0 %v8560_v32  ;;  %v5548_v31 = vld [vmem:[#allocation20 + $0x5f8] sm:$0xff]  ;;  %v5274_v32 = vld [vmem:[#allocation20 + $0x1e0] sm:$0xff] }
 0xaf7   :  { %8689 = vmatprep.subr.bf16.mxu1 %v8688_v36  ;;  %v8708_v59 = vpack.c.bf16 %v5548_v31, %v5546_v29  ;;  %v8582_v35 = vpack.c.bf16 %v5276_v34, %v5274_v32  ;;  %v5545_v36 = vld [vmem:[#allocation20 + $0x5e0] sm:$0xff]  ;;  %v5292_v31 = vld [vmem:[#allocation20 + $0x270] sm:$0xff]  ;;  %v8596_v32 = vpack.c.bf16 %v5293_v26, %v5291_v25  ;;  %v5311_v25 = vld [vmem:[#allocation20 + $0x308] sm:$0xff] }
 0xaf8   :  { %v8710_v38 = vpack.c.bf16 %v5547_v37, %v5545_v36  ;;  %v5295_v36 = vld [vmem:[#allocation20 + $0x288] sm:$0xff]  ;;  %v5297_v37 = vld [vmem:[#allocation20 + $0x298] sm:$0xff] }
 0xaf9   :  { %8563 = vmatpush1.bf16.msra.mxu0 %v8562_v44  ;;  %v8584_v44 = vpack.c.bf16 %v5281_v41, %v5279_v40  ;;  %v5568_v40 = vld [vmem:[#allocation20 + $0x698] sm:$0xff] }
 0xafa   :  { %8691 = vmatpush1.bf16.msra.mxu1 %v8690_v45  ;;  %8565 = vmatprep.subr.bf16.mxu0 %v8564_v46  ;;  %v5552_v45 = vld [vmem:[#allocation20 + $0x618] sm:$0xff] }
 0xafb   :  { %8693 = vmatprep.subr.bf16.mxu1 %v8692_v50  ;;  %v8712_v46 = vpack.c.bf16 %v5552_v45, %v5550_v43  ;;  %v5280_v50 = vld [vmem:[#allocation20 + $0x210] sm:$0xff]  ;;  %v5313_v26 = vld [vmem:[#allocation20 + $0x318] sm:$0xff] }
 0xafc   :  { %v8586_v2 = vpack.c.bf16 %v5280_v50, %v5278_v49  ;;  %v5296_v45 = vld [vmem:[#allocation20 + $0x290] sm:$0xff]  ;;  %v5299_v50 = vld [vmem:[#allocation20 + $0x2a8] sm:$0xff] }
 0xafd   :  { %8567 = vmatpush1.bf16.msra.mxu0 %v8566_v55  ;;  %v5567_v49 = vld [vmem:[#allocation20 + $0x690] sm:$0xff] }
 0xafe   :  { %8695 = vmatpush1.bf16.msra.mxu1 %v8694_v56  ;;  %8569 = vmatprep.subr.bf16.mxu0 %v8568_v21  ;;  %v5285_v56 = vld [vmem:[#allocation20 + $0x238] sm:$0xff]  ;;  %v5554_v21 = vld [vmem:[#allocation20 + $0x628] sm:$0xff] }
 0xaff   :  { %8697 = vmatprep.subr.bf16.mxu1 %v8696_v1 }
 0xb01   :  { %8571 = vmatpush1.bf16.msra.mxu0 %v8570_v7  ;;  %v8588_v7 = vpack.c.bf16 %v5285_v56, %v5283_v54  ;;  %v5300_v56 = vld [vmem:[#allocation20 + $0x2b0] sm:$0xff] }
 0xb02   :  { %8699 = vmatpush1.bf16.msra.mxu1 %v8698_v8  ;;  %8573 = vmatprep.subr.bf16.mxu0 %v8572_v9  ;;  %v8716_v8 = vpack.c.bf16 %v5556_v57, %v5554_v21  ;;  %v5553_v9 = vld [vmem:[#allocation20 + $0x620] sm:$0xff]  ;;  %v8732_v57 = vpack.c.bf16 %v5572_v53, %v5570_v52  ;;  %v5590_v52 = vld [vmem:[#allocation20 + $0x748] sm:$0xff]  ;;  %v5592_v53 = vld [vmem:[#allocation20 + $0x758] sm:$0xff] }
 0xb03   :  { %8701 = vmatprep.subr.bf16.mxu1 %v8700_v33  ;;  %v8718_v18 = vpack.c.bf16 %v5555_v60, %v5553_v9 }
 0xb05   :  { %8575 = vmatpush1.bf16.msra.mxu0 %v8574_v14  ;;  %v5558_v14 = vld [vmem:[#allocation20 + $0x648] sm:$0xff] }
 0xb06   :  { %8703 = vmatpush1.bf16.msra.mxu1 %v8702_v15  ;;  %8577 = vmatprep.subr.bf16.mxu0 %v8576_v62  ;;  %v5560_v15 = vld [vmem:[#allocation20 + $0x658] sm:$0xff]  ;;  %v5286_v62 = vld [vmem:[#allocation20 + $0x240] sm:$0xff] }
 0xb07   :  { %8705 = vmatprep.subr.bf16.mxu1 %v8704_v23  ;;  %v8720_v61 = vpack.c.bf16 %v5560_v15, %v5558_v14  ;;  %v5557_v23 = vld [vmem:[#allocation20 + $0x640] sm:$0xff]  ;;  %v8594_v28 = vpack.c.bf16 %v5288_v19, %v5286_v62  ;;  %v5309_v14 = vld [vmem:[#allocation20 + $0x2f8] sm:$0xff]  ;;  %v5578_v15 = vld [vmem:[#allocation20 + $0x6e8] sm:$0xff] }
 0xb08   :  { %v5306_v62 = vld [vmem:[#allocation20 + $0x2e0] sm:$0xff]  ;;  %v5308_v19 = vld [vmem:[#allocation20 + $0x2f0] sm:$0xff] }
 0xb09   :  { %8579 = vmatpush1.bf16.msra.mxu0 %v8578_v24  ;;  %v5559_v24 = vld [vmem:[#allocation20 + $0x650] sm:$0xff] }
 0xb0a   :  { %8707 = vmatpush1.bf16.msra.mxu1 %v8706_v27  ;;  %8581 = vmatprep.subr.bf16.mxu0 %v8580_v30  ;;  %v5562_v27 = vld [vmem:[#allocation20 + $0x668] sm:$0xff]  ;;  %v8722_v29 = vpack.c.bf16 %v5559_v24, %v5557_v23  ;;  %v5290_v30 = vld [vmem:[#allocation20 + $0x260] sm:$0xff]  ;;  %v5579_v24 = vld [vmem:[#allocation20 + $0x6f0] sm:$0xff] }
 0xb0b   :  { %8709 = vmatprep.subr.bf16.mxu1 %v8708_v59  ;;  %v8724_v34 = vpack.c.bf16 %v5564_v0, %v5562_v27  ;;  %v5561_v59 = vld [vmem:[#allocation20 + $0x660] sm:$0xff]  ;;  %v8598_v41 = vpack.c.bf16 %v5292_v31, %v5290_v30  ;;  %v5582_v27 = vld [vmem:[#allocation20 + $0x708] sm:$0xff]  ;;  %v5584_v0 = vld [vmem:[#allocation20 + $0x718] sm:$0xff] }
 0xb0c   :  { %v5577_v23 = vld [vmem:[#allocation20 + $0x6e0] sm:$0xff]  ;;  %v5312_v31 = vld [vmem:[#allocation20 + $0x310] sm:$0xff] }
 0xb0d   :  { %8583 = vmatpush1.bf16.msra.mxu0 %v8582_v35  ;;  %v5563_v35 = vld [vmem:[#allocation20 + $0x670] sm:$0xff]  ;;  %v5310_v30 = vld [vmem:[#allocation20 + $0x300] sm:$0xff] }
 0xb0e   :  { %8711 = vmatpush1.bf16.msra.mxu1 %v8710_v38  ;;  %8585 = vmatprep.subr.bf16.mxu0 %v8584_v44  ;;  %v5566_v38 = vld [vmem:[#allocation20 + $0x688] sm:$0xff]  ;;  %v8726_v43 = vpack.c.bf16 %v5563_v35, %v5561_v59  ;;  %v5294_v44 = vld [vmem:[#allocation20 + $0x280] sm:$0xff]  ;;  %v5583_v35 = vld [vmem:[#allocation20 + $0x710] sm:$0xff] }
 0xb0f   :  { %8713 = vmatprep.subr.bf16.mxu1 %v8712_v46  ;;  %v8600_v46 = vpack.c.bf16 %v5297_v37, %v5295_v36  ;;  %v8602_v54 = vpack.c.bf16 %v5296_v45, %v5294_v44  ;;  %v5581_v59 = vld [vmem:[#allocation20 + $0x700] sm:$0xff]  ;;  %v5315_v36 = vld [vmem:[#allocation20 + $0x328] sm:$0xff]  ;;  %v5317_v37 = vld [vmem:[#allocation20 + $0x338] sm:$0xff] }
 0xb10   :  { %v5314_v44 = vld [vmem:[#allocation20 + $0x320] sm:$0xff]  ;;  %v5316_v45 = vld [vmem:[#allocation20 + $0x330] sm:$0xff] }
 0xb9e   :  { %v4987_v47 = vpop.f32.mrb[68].mxu0 }
 0xb9f   :  { %v4989_v48 = vpop.f32.mrb[69].mxu0 }
 0xba0   :  { %v5058_v51 = vpop.f32.mrb[72].mxu1 }
 0xba1   :  { %v5060_v20 = vpop.f32.mrb[73].mxu1 }
 0xba2   :  { %v5134_v55 = vpop.f32.mrb[70].mxu0 }
 0xba3   :  { %v5210_v58 = vmax.f32 %v4987_v47, %v5134_v55  ;;  %v5136_v63 = vpop.f32.mrb[71].mxu0  ;;  %v8728_v47 = vpack.c.bf16 %v5568_v40, %v5566_v38  ;;  %v5298_v55 = vld [vmem:[#allocation20 + $0x2a0] sm:$0xff]  ;;  %v5586_v38 = vld [vmem:[#allocation20 + $0x728] sm:$0xff]  ;;  %v5588_v40 = vld [vmem:[#allocation20 + $0x738] sm:$0xff] }
 0xba4   :  { %v5211_v1 = vmax.f32 %v4989_v48, %v5136_v63  ;;  %v5205_v6 = vpop.f32.mrb[74].mxu1  ;;  %v5565_v48 = vld [vmem:[#allocation20 + $0x680] sm:$0xff]  ;;  %v5571_v63 = vld [vmem:[#allocation20 + $0x6b0] sm:$0xff]  ;;  %v8606_v5 = vpack.c.bf16 %v5300_v56, %v5298_v55 }
 0xba5   :  { %v10419_v33 = vmax.f32 %v5058_v51, %v5205_v6  ;;  %v5207_v11 = vpop.f32.mrb[75].mxu1  ;;  %v5301_v51 = vld [vmem:[#allocation20 + $0x2b8] sm:$0xff]  ;;  %v5318_v55 = vld [vmem:[#allocation20 + $0x340] sm:$0xff]  ;;  %v5320_v56 = vld [vmem:[#allocation20 + $0x350] sm:$0xff] }
 0xba6   :  { %5406 = vmatprep.mubr.f32.mxu0 %v5211_v1  ;;  %5677 = vmatprep.mubr.f32.mxu1 %v5211_v1  ;;  %v5213_v16 = vmax.f32 %v5060_v20, %v5207_v11  ;;  %v8730_v20 = vpack.c.bf16 %v5567_v49, %v5565_v48  ;;  %v8604_v21 = vpack.c.bf16 %v5301_v51, %v5299_v50  ;;  %v5303_v1 = vld [vmem:[#allocation20 + $0x2c8] sm:$0xff]  ;;  %v5575_v11 = vld [vmem:[#allocation20 + $0x6d0] sm:$0xff]  ;;  %v5585_v48 = vld [vmem:[#allocation20 + $0x720] sm:$0xff] }
 0xba7   :  { %5407 = vmatmul.mubr.f32.vlgmr.msra.gmra.mrb[72].mxu0 %v5210_v58  ;;  %5678 = vmatmul.mubr.f32.vlgmr.msra.gmra.mrb[76].mxu1 %v5210_v58  ;;  %v5569_v58 = vld [vmem:[#allocation20 + $0x6a0] sm:$0xff]  ;;  %v5587_v49 = vld [vmem:[#allocation20 + $0x730] sm:$0xff]  ;;  %v5319_v50 = vld [vmem:[#allocation20 + $0x348] sm:$0xff] }
 0xba8   :  { %8587 = vmatpush1.bf16.msra.mxu0 %v8586_v2  ;;  %8715 = vmatpush1.bf16.msra.mxu1 %v8714_v3  ;;  %v5305_v2 = vld [vmem:[#allocation20 + $0x2d8] sm:$0xff]  ;;  %v5574_v3 = vld [vmem:[#allocation20 + $0x6c8] sm:$0xff]  ;;  %v8734_v6 = vpack.c.bf16 %v5571_v63, %v5569_v58  ;;  %v5589_v58 = vld [vmem:[#allocation20 + $0x740] sm:$0xff] }
 0xba9   :  { %8589 = vmatprep.subr.bf16.mxu0 %v8588_v7  ;;  %8717 = vmatprep.subr.bf16.mxu1 %v8716_v8  ;;  %v5302_v7 = vld [vmem:[#allocation20 + $0x2c0] sm:$0xff]  ;;  %v5304_v8 = vld [vmem:[#allocation20 + $0x2d0] sm:$0xff]  ;;  %v8608_v9 = vpack.c.bf16 %v5305_v2, %v5303_v1  ;;  %v8736_v60 = vpack.c.bf16 %v5576_v4, %v5574_v3  ;;  %v5321_v51 = vld [vmem:[#allocation20 + $0x358] sm:$0xff] }
 0xbaa   :  { %5477 = vmatprep.mubr.f32.mxu0 %v5213_v16  ;;  %5748 = vmatprep.mubr.f32.mxu1 %v5213_v16  ;;  %v5580_v16 = vld [vmem:[#allocation20 + $0x6f8] sm:$0xff]  ;;  %v5591_v63 = vld [vmem:[#allocation20 + $0x750] sm:$0xff]  ;;  %v5323_v1 = vld [vmem:[#allocation20 + $0x368] sm:$0xff] }
 0xbab   :  { %v5325_v2 = vld [vmem:[#allocation20 + $0x378] sm:$0xff]  ;;  %v5594_v3 = vld [vmem:[#allocation20 + $0x768] sm:$0xff] }
 0xbac   :  { %8591 = vmatpush1.bf16.msra.mxu0 %v8590_v17  ;;  %8719 = vmatpush1.bf16.msra.mxu1 %v8718_v18  ;;  %v8610_v17 = vpack.c.bf16 %v5304_v8, %v5302_v7  ;;  %v8738_v18 = vpack.c.bf16 %v5575_v11, %v5573_v10  ;;  %v5596_v4 = vld [vmem:[#allocation20 + $0x778] sm:$0xff]  ;;  %v5322_v7 = vld [vmem:[#allocation20 + $0x360] sm:$0xff]  ;;  %v5324_v8 = vld [vmem:[#allocation20 + $0x370] sm:$0xff] }
 0xbad   :  { %8593 = vmatprep.subr.bf16.mxu0 %v8592_v22  ;;  %8721 = vmatprep.subr.bf16.mxu1 %v8720_v61  ;;  %v8612_v22 = vpack.c.bf16 %v5309_v14, %v5307_v12  ;;  %v8740_v61 = vpack.c.bf16 %v5580_v16, %v5578_v15  ;;  %v5593_v10 = vld [vmem:[#allocation20 + $0x760] sm:$0xff]  ;;  %v5595_v11 = vld [vmem:[#allocation20 + $0x770] sm:$0xff]  ;;  %v5327_v12 = vld [vmem:[#allocation20 + $0x388] sm:$0xff] }
 0xbae   :  { %v5329_v14 = vld [vmem:[#allocation20 + $0x398] sm:$0xff]  ;;  %v5598_v15 = vld [vmem:[#allocation20 + $0x788] sm:$0xff] }
 0xbaf   :  { %v5600_v16 = vld [vmem:[#allocation20 + $0x798] sm:$0xff] }
 0xbb0   :  { %8595 = vmatpush1.bf16.msra.mxu0 %v8594_v28  ;;  %8723 = vmatpush1.bf16.msra.mxu1 %v8722_v29  ;;  %v8614_v28 = vpack.c.bf16 %v5308_v19, %v5306_v62  ;;  %v8742_v29 = vpack.c.bf16 %v5579_v24, %v5577_v23  ;;  %v5326_v62 = vld [vmem:[#allocation20 + $0x380] sm:$0xff]  ;;  %v5328_v19 = vld [vmem:[#allocation20 + $0x390] sm:$0xff] }
 0xbb1   :  { %8597 = vmatprep.subr.bf16.mxu0 %v8596_v32  ;;  %8725 = vmatprep.subr.bf16.mxu1 %v8724_v34  ;;  %v8616_v32 = vpack.c.bf16 %v5313_v26, %v5311_v25  ;;  %v8744_v34 = vpack.c.bf16 %v5584_v0, %v5582_v27  ;;  %v5597_v23 = vld [vmem:[#allocation20 + $0x780] sm:$0xff]  ;;  %v5599_v24 = vld [vmem:[#allocation20 + $0x790] sm:$0xff]  ;;  %v5331_v25 = vld [vmem:[#allocation20 + $0x3a8] sm:$0xff] }
 0xbb2   :  { %v5333_v26 = vld [vmem:[#allocation20 + $0x3b8] sm:$0xff]  ;;  %v5602_v27 = vld [vmem:[#allocation20 + $0x7a8] sm:$0xff] }
 0xbb3   :  { %v5604_v0 = vld [vmem:[#allocation20 + $0x7b8] sm:$0xff] }
 0xbb4   :  { %8599 = vmatpush1.bf16.msra.mxu0 %v8598_v41  ;;  %8727 = vmatpush1.bf16.msra.mxu1 %v8726_v43  ;;  %v8618_v41 = vpack.c.bf16 %v5312_v31, %v5310_v30  ;;  %v8746_v43 = vpack.c.bf16 %v5583_v35, %v5581_v59  ;;  %v5330_v30 = vld [vmem:[#allocation20 + $0x3a0] sm:$0xff]  ;;  %v5332_v31 = vld [vmem:[#allocation20 + $0x3b0] sm:$0xff] }
 0xbb5   :  { %8601 = vmatprep.subr.bf16.mxu0 %v8600_v46  ;;  %8729 = vmatprep.subr.bf16.mxu1 %v8728_v47  ;;  %v8620_v46 = vpack.c.bf16 %v5317_v37, %v5315_v36  ;;  %v8748_v47 = vpack.c.bf16 %v5588_v40, %v5586_v38  ;;  %v5601_v59 = vld [vmem:[#allocation20 + $0x7a0] sm:$0xff]  ;;  %v5603_v35 = vld [vmem:[#allocation20 + $0x7b0] sm:$0xff]  ;;  %v5335_v36 = vld [vmem:[#allocation20 + $0x3c8] sm:$0xff] }
 0xbb6   :  { %v5337_v37 = vld [vmem:[#allocation20 + $0x3d8] sm:$0xff]  ;;  %v5606_v38 = vld [vmem:[#allocation20 + $0x7c8] sm:$0xff] }
 0xbb7   :  { %v5608_v40 = vld [vmem:[#allocation20 + $0x7d8] sm:$0xff] }
 0xbb8   :  { %8603 = vmatpush1.bf16.msra.mxu0 %v8602_v54  ;;  %8731 = vmatpush1.bf16.msra.mxu1 %v8730_v20  ;;  %v8622_v54 = vpack.c.bf16 %v5316_v45, %v5314_v44  ;;  %v8750_v20 = vpack.c.bf16 %v5587_v49, %v5585_v48  ;;  %v5334_v44 = vld [vmem:[#allocation20 + $0x3c0] sm:$0xff]  ;;  %v5336_v45 = vld [vmem:[#allocation20 + $0x3d0] sm:$0xff] }
 0xbb9   :  { %8605 = vmatprep.subr.bf16.mxu0 %v8604_v21  ;;  %8733 = vmatprep.subr.bf16.mxu1 %v8732_v57  ;;  %v8624_v21 = vpack.c.bf16 %v5321_v51, %v5319_v50  ;;  %v8752_v57 = vpack.c.bf16 %v5592_v53, %v5590_v52  ;;  %v5605_v48 = vld [vmem:[#allocation20 + $0x7c0] sm:$0xff]  ;;  %v5607_v49 = vld [vmem:[#allocation20 + $0x7d0] sm:$0xff]  ;;  %v5339_v50 = vld [vmem:[#allocation20 + $0x3e8] sm:$0xff] }
 0xbba   :  { %v5341_v51 = vld [vmem:[#allocation20 + $0x3f8] sm:$0xff]  ;;  %v5610_v52 = vld [vmem:[#allocation20 + $0x7e8] sm:$0xff] }
 0xbbb   :  { %v5612_v53 = vld [vmem:[#allocation20 + $0x7f8] sm:$0xff] }
 0xbbc   :  { %8607 = vmatpush1.bf16.msra.mxu0 %v8606_v5  ;;  %8735 = vmatpush1.bf16.msra.mxu1 %v8734_v6  ;;  %v8626_v5 = vpack.c.bf16 %v5320_v56, %v5318_v55  ;;  %v8754_v6 = vpack.c.bf16 %v5591_v63, %v5589_v58  ;;  %v5338_v55 = vld [vmem:[#allocation20 + $0x3e0] sm:$0xff]  ;;  %v8644_v56 = vpack.c.bf16 %v5341_v51, %v5339_v50  ;;  %v5611_v63 = vld [vmem:[#allocation20 + $0x7f0] sm:$0xff] }
 0xbbd   :  { %8609 = vmatprep.subr.bf16.mxu0 %v8608_v9  ;;  %8737 = vmatprep.subr.bf16.mxu1 %v8736_v60  ;;  %v8628_v9 = vpack.c.bf16 %v5325_v2, %v5323_v1  ;;  %v8756_v60 = vpack.c.bf16 %v5596_v4, %v5594_v3  ;;  %v5609_v58 = vld [vmem:[#allocation20 + $0x7e0] sm:$0xff]  ;;  %v9338_v50 = vld [vmem:[#allocation22 + $0x1b0] ss:$8 sps:$4 sm:$0xff]  }
 0xbbe   :  { %v8774_v2 = vpack.c.bf16 %v5611_v63, %v5609_v58  ;;  %v9271_v3 = vld [vmem:[#allocation22 + $0x4] ss:$8 sps:$4 sm:$0xff]   ;;  %v9353_v63 = vld [vmem:[#allocation22 + $0xe0] ss:$8 sps:$4 sm:$0xff]  }
 0xbbf   :  { %v9274_v4 = vld [vmem:[#allocation22 + $0x104] ss:$8 sps:$4 sm:$0xff]  }
 0xbc0   :  { %8611 = vmatpush1.bf16.msra.mxu0 %v8610_v17  ;;  %8739 = vmatpush1.bf16.msra.mxu1 %v8738_v18  ;;  %v8630_v17 = vpack.c.bf16 %v5324_v8, %v5322_v7  ;;  %v8758_v18 = vpack.c.bf16 %v5595_v11, %v5593_v10  ;;  %v9277_v7 = vld [vmem:[#allocation22 + $0x14] ss:$8 sps:$4 sm:$0xff]   ;;  %v9283_v10 = vld [vmem:[#allocation22 + $0x24] ss:$8 sps:$4 sm:$0xff]  }
 0xbc1   :  { %8613 = vmatprep.subr.bf16.mxu0 %v8612_v22  ;;  %8741 = vmatprep.subr.bf16.mxu1 %v8740_v61  ;;  %v8632_v22 = vpack.c.bf16 %v5329_v14, %v5327_v12  ;;  %v8760_v61 = vpack.c.bf16 %v5600_v16, %v5598_v15  ;;  %v9280_v8 = vld [vmem:[#allocation22 + $0x114] ss:$8 sps:$4 sm:$0xff]   ;;  %v9286_v11 = vld [vmem:[#allocation22 + $0x124] ss:$8 sps:$4 sm:$0xff]   ;;  %v9281_v12 = vld [vmem:[#allocation22 + $0x20] ss:$8 sps:$4 sm:$0xff]  }
 0xbc2   :  { %v9284_v14 = vld [vmem:[#allocation22 + $0x120] ss:$8 sps:$4 sm:$0xff]   ;;  %v9289_v15 = vld [vmem:[#allocation22 + $0x34] ss:$8 sps:$4 sm:$0xff]   ;;  %v9343_v51 = vld [vmem:[#allocation22 + $0xc4] ss:$8 sps:$4 sm:$0xff]  }
 0xbc3   :  { %v9292_v16 = vld [vmem:[#allocation22 + $0x134] ss:$8 sps:$4 sm:$0xff]   ;;  %v9358_v58 = vld [vmem:[#allocation22 + $0x1e4] ss:$8 sps:$4 sm:$0xff]  }
 0xbc4   :  { %8615 = vmatpush1.bf16.msra.mxu0 %v8614_v28  ;;  %8743 = vmatpush1.bf16.msra.mxu1 %v8742_v29  ;;  %v8634_v28 = vpack.c.bf16 %v5328_v19, %v5326_v62  ;;  %v8762_v29 = vpack.c.bf16 %v5599_v24, %v5597_v23  ;;  %v9298_v62 = vld [vmem:[#allocation22 + $0x144] ss:$8 sps:$4 sm:$0xff]   ;;  %v9293_v19 = vld [vmem:[#allocation22 + $0x40] ss:$8 sps:$4 sm:$0xff]   ;;  %v9304_v23 = vld [vmem:[#allocation22 + $0x154] ss:$8 sps:$4 sm:$0xff]  }
 0xbc5   :  { %8617 = vmatprep.subr.bf16.mxu0 %v8616_v32  ;;  %8745 = vmatprep.subr.bf16.mxu1 %v8744_v34  ;;  %v8636_v32 = vpack.c.bf16 %v5333_v26, %v5331_v25  ;;  %v8764_v34 = vpack.c.bf16 %v5604_v0, %v5602_v27  ;;  %v9299_v24 = vld [vmem:[#allocation22 + $0x50] ss:$8 sps:$4 sm:$0xff]   ;;  %v9307_v26 = vld [vmem:[#allocation22 + $0x64] ss:$8 sps:$4 sm:$0xff]   ;;  %v9305_v0 = vld [vmem:[#allocation22 + $0x60] ss:$8 sps:$4 sm:$0xff]  }
 0xbc6   :  { %v9302_v25 = vld [vmem:[#allocation22 + $0x150] ss:$8 sps:$4 sm:$0xff]   ;;  %v9310_v27 = vld [vmem:[#allocation22 + $0x164] ss:$8 sps:$4 sm:$0xff]  }
 0xbc8   :  { %8619 = vmatpush1.bf16.msra.mxu0 %v8618_v41  ;;  %8747 = vmatpush1.bf16.msra.mxu1 %v8746_v43  ;;  %v8638_v41 = vpack.c.bf16 %v5332_v31, %v5330_v30  ;;  %v8766_v43 = vpack.c.bf16 %v5603_v35, %v5601_v59  ;;  %v9316_v30 = vld [vmem:[#allocation22 + $0x174] ss:$8 sps:$4 sm:$0xff]   ;;  %v9311_v31 = vld [vmem:[#allocation22 + $0x70] ss:$8 sps:$4 sm:$0xff]   ;;  %v9322_v59 = vld [vmem:[#allocation22 + $0x184] ss:$8 sps:$4 sm:$0xff]  }
 0xbc9   :  { %8621 = vmatprep.subr.bf16.mxu0 %v8620_v46  ;;  %8749 = vmatprep.subr.bf16.mxu1 %v8748_v47  ;;  %v8640_v46 = vpack.c.bf16 %v5337_v37, %v5335_v36  ;;  %v8768_v47 = vpack.c.bf16 %v5608_v40, %v5606_v38  ;;  %v9317_v35 = vld [vmem:[#allocation22 + $0x80] ss:$8 sps:$4 sm:$0xff]   ;;  %v9325_v37 = vld [vmem:[#allocation22 + $0x94] ss:$8 sps:$4 sm:$0xff]   ;;  %v9323_v40 = vld [vmem:[#allocation22 + $0x90] ss:$8 sps:$4 sm:$0xff]  }
 0xbca   :  { %v9320_v36 = vld [vmem:[#allocation22 + $0x180] ss:$8 sps:$4 sm:$0xff]   ;;  %v9328_v38 = vld [vmem:[#allocation22 + $0x194] ss:$8 sps:$4 sm:$0xff]  }
 0xbcc   :  { %8623 = vmatpush1.bf16.msra.mxu0 %v8622_v54  ;;  %8751 = vmatpush1.bf16.msra.mxu1 %v8750_v20  ;;  %v8642_v54 = vpack.c.bf16 %v5336_v45, %v5334_v44  ;;  %v8770_v20 = vpack.c.bf16 %v5607_v49, %v5605_v48  ;;  %v9334_v44 = vld [vmem:[#allocation22 + $0x1a4] ss:$8 sps:$4 sm:$0xff]   ;;  %v9329_v45 = vld [vmem:[#allocation22 + $0xa0] ss:$8 sps:$4 sm:$0xff]   ;;  %v9340_v48 = vld [vmem:[#allocation22 + $0x1b4] ss:$8 sps:$4 sm:$0xff]  }
 0xbcd   :  { %8625 = vmatprep.subr.bf16.mxu0 %v8624_v21  ;;  %8753 = vmatprep.subr.bf16.mxu1 %v8752_v57  ;;  %v8772_v21 = vpack.c.bf16 %v5612_v53, %v5610_v52  ;;  %v5340_v57 = vld [vmem:[#allocation20 + $0x3f0] sm:$0xff]  ;;  %v9346_v52 = vld [vmem:[#allocation22 + $0x1c4] ss:$8 sps:$4 sm:$0xff]   ;;  %v9341_v53 = vld [vmem:[#allocation22 + $0xc0] ss:$8 sps:$4 sm:$0xff]  }
 0xbce   :  { %v8646_v1 = vpack.c.bf16 %v5340_v57, %v5338_v55  ;;  %v9335_v49 = vld [vmem:[#allocation22 + $0xb0] ss:$8 sps:$4 sm:$0xff]   ;;  %v9352_v55 = vld [vmem:[#allocation22 + $0x1d4] ss:$8 sps:$4 sm:$0xff]   ;;  %v9355_v57 = vld [vmem:[#allocation22 + $0xe4] ss:$8 sps:$4 sm:$0xff]  }
 0xbd0   :  { %8627 = vmatpush1.bf16.msra.mxu0 %v8626_v5  ;;  %8755 = vmatpush1.bf16.msra.mxu1 %v8754_v6  ;;  %v9269_v5 = vld [vmem:[#allocation22] ss:$8 sps:$4 sm:$0xff]  }
 0xbd1   :  { %8629 = vmatprep.subr.bf16.mxu0 %v8628_v9  ;;  %8757 = vmatprep.subr.bf16.mxu1 %v8756_v60  ;;  %v9272_v6 = vld [vmem:[#allocation22 + $0x100] ss:$8 sps:$4 sm:$0xff]   ;;  %v9275_v9 = vld [vmem:[#allocation22 + $0x10] ss:$8 sps:$4 sm:$0xff]  }
 0xbd2   :  { %v9278_v60 = vld [vmem:[#allocation22 + $0x110] ss:$8 sps:$4 sm:$0xff]  }
 0xbd4   :  { %8631 = vmatpush1.bf16.msra.mxu0 %v8630_v17  ;;  %8759 = vmatpush1.bf16.msra.mxu1 %v8758_v18  ;;  %v9287_v17 = vld [vmem:[#allocation22 + $0x30] ss:$8 sps:$4 sm:$0xff]   ;;  %v9295_v18 = vld [vmem:[#allocation22 + $0x44] ss:$8 sps:$4 sm:$0xff]  }
 0xbd5   :  { %8633 = vmatprep.subr.bf16.mxu0 %v8632_v22  ;;  %8761 = vmatprep.subr.bf16.mxu1 %v8760_v61  ;;  %v9296_v22 = vld [vmem:[#allocation22 + $0x140] ss:$8 sps:$4 sm:$0xff]   ;;  %v9301_v61 = vld [vmem:[#allocation22 + $0x54] ss:$8 sps:$4 sm:$0xff]  }
 0xbd8   :  { %8635 = vmatpush1.bf16.msra.mxu0 %v8634_v28  ;;  %8763 = vmatpush1.bf16.msra.mxu1 %v8762_v29  ;;  %v9308_v28 = vld [vmem:[#allocation22 + $0x160] ss:$8 sps:$4 sm:$0xff]   ;;  %v9313_v29 = vld [vmem:[#allocation22 + $0x74] ss:$8 sps:$4 sm:$0xff]  }
 0xbd9   :  { %8637 = vmatprep.subr.bf16.mxu0 %v8636_v32  ;;  %8765 = vmatprep.subr.bf16.mxu1 %v8764_v34  ;;  %v9314_v32 = vld [vmem:[#allocation22 + $0x170] ss:$8 sps:$4 sm:$0xff]   ;;  %v9319_v34 = vld [vmem:[#allocation22 + $0x84] ss:$8 sps:$4 sm:$0xff]  }
 0xbdc   :  { %8639 = vmatpush1.bf16.msra.mxu0 %v8638_v41  ;;  %8767 = vmatpush1.bf16.msra.mxu1 %v8766_v43  ;;  %v9326_v41 = vld [vmem:[#allocation22 + $0x190] ss:$8 sps:$4 sm:$0xff]   ;;  %v9331_v43 = vld [vmem:[#allocation22 + $0xa4] ss:$8 sps:$4 sm:$0xff]  }
 0xbdd   :  { %8641 = vmatprep.subr.bf16.mxu0 %v8640_v46  ;;  %8769 = vmatprep.subr.bf16.mxu1 %v8768_v47  ;;  %v9332_v46 = vld [vmem:[#allocation22 + $0x1a0] ss:$8 sps:$4 sm:$0xff]   ;;  %v9337_v47 = vld [vmem:[#allocation22 + $0xb4] ss:$8 sps:$4 sm:$0xff]  }
 0xbe0   :  { %8643 = vmatpush1.bf16.msra.mxu0 %v8642_v54  ;;  %8771 = vmatpush1.bf16.msra.mxu1 %v8770_v20  ;;  %v9344_v54 = vld [vmem:[#allocation22 + $0x1c0] ss:$8 sps:$4 sm:$0xff]   ;;  %v9349_v20 = vld [vmem:[#allocation22 + $0xd4] ss:$8 sps:$4 sm:$0xff]  }
 0xbe1   :  { %8645 = vmatprep.subr.bf16.mxu0 %v8644_v56  ;;  %8773 = vmatprep.subr.bf16.mxu1 %v8772_v21  ;;  %v9347_v56 = vld [vmem:[#allocation22 + $0xd0] ss:$8 sps:$4 sm:$0xff]  }
 0xbe2   :  { %v9350_v21 = vld [vmem:[#allocation22 + $0x1d0] ss:$8 sps:$4 sm:$0xff]  }
 0xbe4   :  { %8647 = vmatpush1.bf16.msra.mxu0 %v8646_v1  ;;  %8775 = vmatpush1.bf16.msra.mxu1 %v8774_v2  ;;  %v9356_v1 = vld [vmem:[#allocation22 + $0x1e0] ss:$8 sps:$4 sm:$0xff]   ;;  %v9361_v2 = vld [vmem:[#allocation22 + $0xf4] ss:$8 sps:$4 sm:$0xff]  }
 0xbe5   :  { %5951 = vmatprep.subr.bf16.mxu0 %v9271_v3  ;;  %6185 = vmatprep.subr.bf16.mxu1 %v9274_v4  ;;  %v9364_v3 = vld [vmem:[#allocation22 + $0x1f4] ss:$8 sps:$4 sm:$0xff]   ;;  %v9359_v4 = vld [vmem:[#allocation22 + $0xf0] ss:$8 sps:$4 sm:$0xff]  }
 0xbe7   :  { %5478 = vmatmul.mubr.f32.vlgmr.msra.gmra.mrb[72].mxu0 %v10419_v33  ;;  %5749 = vmatmul.mubr.f32.vlgmr.msra.gmra.mrb[76].mxu1 %v10419_v33  ;;  %v9290_v33 = vld [vmem:[#allocation22 + $0x130] ss:$8 sps:$4 sm:$0xff]  }
 0xbe8   :  { %5952 = vmatpush1.bf16.msra.mxu0 %v9269_v5  ;;  %6186 = vmatpush1.bf16.msra.mxu1 %v9272_v6  ;;  %v9362_v5 = vld [vmem:[#allocation22 + $0x1f0] ss:$8 sps:$4 sm:$0xff]  }
 0xbe9   :  { %5953 = vmatprep.subr.bf16.mxu0 %v9277_v7  ;;  %6187 = vmatprep.subr.bf16.mxu1 %v9280_v8 }
 0xbec   :  { %5954 = vmatpush1.bf16.msra.mxu0 %v9275_v9  ;;  %6188 = vmatpush1.bf16.msra.mxu1 %v9278_v60 }
 0xbed   :  { %5955 = vmatprep.subr.bf16.mxu0 %v9283_v10  ;;  %6189 = vmatprep.subr.bf16.mxu1 %v9286_v11 }
 0xbf0   :  { %5956 = vmatpush1.bf16.msra.mxu0 %v9281_v12  ;;  %6190 = vmatpush1.bf16.msra.mxu1 %v9284_v14  ;;  %v9365_v14 = vld [vmem:[%s10688_s20 + $0x40] sm:$0xff]  }
 0xbf1   :  { %5957 = vmatprep.subr.bf16.mxu0 %v9289_v15  ;;  %6191 = vmatprep.subr.bf16.mxu1 %v9292_v16  ;;  %v9367_v15 = vld [vmem:[%s10688_s20] sm:$0xff]   ;;  %v9369_v16 = vld [vmem:[%s10688_s20 + $0x48] sm:$0xff]  }
 0xbf4   :  { %5958 = vmatpush1.bf16.msra.mxu0 %v9287_v17  ;;  %6192 = vmatpush1.bf16.msra.mxu1 %v9290_v33  ;;  %v9371_v17 = vld [vmem:[%s10688_s20 + $0x8] sm:$0xff]   ;;  %v9373_v33 = vld [vmem:[%s10688_s20 + $0x50] sm:$0xff]  }
 0xbf5   :  { %5959 = vmatprep.subr.bf16.mxu0 %v9295_v18  ;;  %6193 = vmatprep.subr.bf16.mxu1 %v9298_v62  ;;  %v9375_v18 = vld [vmem:[%s10688_s20 + $0x10] sm:$0xff]   ;;  %v9377_v62 = vld [vmem:[%s10688_s20 + $0x58] sm:$0xff]  }
 0xbf8   :  { %5960 = vmatpush1.bf16.msra.mxu0 %v9293_v19  ;;  %6194 = vmatpush1.bf16.msra.mxu1 %v9296_v22  ;;  %v9379_v19 = vld [vmem:[%s10688_s20 + $0x18] sm:$0xff]   ;;  %v9381_v22 = vld [vmem:[%s10688_s20 + $0x60] sm:$0xff]  }
 0xbf9   :  { %5961 = vmatprep.subr.bf16.mxu0 %v9301_v61  ;;  %6195 = vmatprep.subr.bf16.mxu1 %v9304_v23  ;;  %v9383_v61 = vld [vmem:[%s10688_s20 + $0x20] sm:$0xff]   ;;  %v9385_v23 = vld [vmem:[%s10688_s20 + $0x68] sm:$0xff]  }
 0xbfc   :  { %5962 = vmatpush1.bf16.msra.mxu0 %v9299_v24  ;;  %6196 = vmatpush1.bf16.msra.mxu1 %v9302_v25  ;;  %v9387_v24 = vld [vmem:[%s10688_s20 + $0x28] sm:$0xff]  }
 0xbfd   :  { %5963 = vmatprep.subr.bf16.mxu0 %v9307_v26  ;;  %6197 = vmatprep.subr.bf16.mxu1 %v9310_v27 }
 0xc00   :  { %5964 = vmatpush1.bf16.msra.mxu0 %v9305_v0  ;;  %6198 = vmatpush1.bf16.msra.mxu1 %v9308_v28  ;;  %v7787_v28 = vld [vmem:[%s10684_s16 + $0x8] sm:$0xff] }
 0xc01   :  { %5965 = vmatprep.subr.bf16.mxu0 %v9313_v29  ;;  %6199 = vmatprep.subr.bf16.mxu1 %v9316_v30 }
 0xc04   :  { %5966 = vmatpush1.bf16.msra.mxu0 %v9311_v31  ;;  %6200 = vmatpush1.bf16.msra.mxu1 %v9314_v32  ;;  %v9366_v31 = vld [vmem:[%s10688_s20 + $0xc0] sm:$0xff]  }
 0xc05   :  { %5967 = vmatprep.subr.bf16.mxu0 %v9319_v34  ;;  %6201 = vmatprep.subr.bf16.mxu1 %v9322_v59  ;;  %v6226_v59 = vld [vmem:[%s10684_s16] sm:$0xff] }
 0xc08   :  { %5968 = vmatpush1.bf16.msra.mxu0 %v9317_v35  ;;  %6202 = vmatpush1.bf16.msra.mxu1 %v9320_v36  ;;  %v9368_v35 = vld [vmem:[%s10688_s20 + $0x80] sm:$0xff]   ;;  %v9370_v36 = vld [vmem:[%s10688_s20 + $0xc8] sm:$0xff]  }
 0xc09   :  { %5969 = vmatprep.subr.bf16.mxu0 %v9325_v37  ;;  %6203 = vmatprep.subr.bf16.mxu1 %v9328_v38  ;;  %v9372_v37 = vld [vmem:[%s10688_s20 + $0x88] sm:$0xff]   ;;  %v9374_v38 = vld [vmem:[%s10688_s20 + $0xd0] sm:$0xff]  }
 0xc0c   :  { %5970 = vmatpush1.bf16.msra.mxu0 %v9323_v40  ;;  %6204 = vmatpush1.bf16.msra.mxu1 %v9326_v41  ;;  %v9376_v40 = vld [vmem:[%s10688_s20 + $0x90] sm:$0xff]   ;;  %v9378_v41 = vld [vmem:[%s10688_s20 + $0xd8] sm:$0xff]  }
 0xc0d   :  { %5971 = vmatprep.subr.bf16.mxu0 %v9331_v43  ;;  %6205 = vmatprep.subr.bf16.mxu1 %v9334_v44  ;;  %v9380_v43 = vld [vmem:[%s10688_s20 + $0x98] sm:$0xff]   ;;  %v9382_v44 = vld [vmem:[%s10688_s20 + $0xe0] sm:$0xff]  }
 0xc10   :  { %5972 = vmatpush1.bf16.msra.mxu0 %v9329_v45  ;;  %6206 = vmatpush1.bf16.msra.mxu1 %v9332_v46  ;;  %v9384_v45 = vld [vmem:[%s10688_s20 + $0xa0] sm:$0xff]   ;;  %v9386_v46 = vld [vmem:[%s10688_s20 + $0xe8] sm:$0xff]  }
 0xc11   :  { %5973 = vmatprep.subr.bf16.mxu0 %v9337_v47  ;;  %6207 = vmatprep.subr.bf16.mxu1 %v9340_v48  ;;  %v9388_v47 = vld [vmem:[%s10688_s20 + $0xa8] sm:$0xff]   ;;  %v9389_v48 = vld [vmem:[%s10688_s20 + $0x70] sm:$0xff]  }
 0xc14   :  { %5974 = vmatpush1.bf16.msra.mxu0 %v9335_v49  ;;  %6208 = vmatpush1.bf16.msra.mxu1 %v9338_v50  ;;  %v9390_v49 = vld [vmem:[%s10688_s20 + $0xf0] sm:$0xff]  }
 0xc15   :  { %5975 = vmatprep.subr.bf16.mxu0 %v9343_v51  ;;  %6209 = vmatprep.subr.bf16.mxu1 %v9346_v52  ;;  %v9391_v50 = vld [vmem:[%s10688_s20 + $0x30] sm:$0xff]   ;;  %v9393_v52 = vld [vmem:[%s10688_s20 + $0x78] sm:$0xff]  }
 0xc16   :  { %v9392_v51 = vld [vmem:[%s10688_s20 + $0xb0] sm:$0xff]  }
 0xc18   :  { %5976 = vmatpush1.bf16.msra.mxu0 %v9341_v53  ;;  %6210 = vmatpush1.bf16.msra.mxu1 %v9344_v54  ;;  %v9394_v53 = vld [vmem:[%s10688_s20 + $0xf8] sm:$0xff]  }
 0xc19   :  { %5977 = vmatprep.subr.bf16.mxu0 %v9349_v20  ;;  %6211 = vmatprep.subr.bf16.mxu1 %v9352_v55  ;;  %v9395_v54 = vld [vmem:[%s10688_s20 + $0x38] sm:$0xff]   ;;  %v6391_v55 = vld [vmem:[#allocation23] sm:$0x3] }
 0xc1a   :  { %v9396_v20 = vld [vmem:[%s10688_s20 + $0xb8] sm:$0xff]   ;;  %s9832_s20 = smov [#allocation28]  }
 0xc1b   :  { %s7363_s8 = sshll.u32 %s9832_s20, 4  ;;  %s7364_s8 = int_to_ptr.vmem [resolvable:$true] %s7363_s8 }
 0xc1c   :  { %5978 = vmatpush1.bf16.msra.mxu0 %v9347_v56  ;;  %6212 = vmatpush1.bf16.msra.mxu1 %v9350_v21  ;;  %v6396_v56 = vrot.slane %v6391_v55, %v10306_v39  ;;  %v6400_v21 = vrot.slane %v6391_v55, %v10312_v42  ;;  %v9397_v39 = vld [vmem:[%s10735_s12] sm:$0xff]   ;;  %v9399_v42 = vld [vmem:[%s10735_s12 + $0x8] sm:$0xff]   ;;  %s9765_s13 = scalar_lea.vmem %s7364_s8, 512  ;;  %p9770_p3 = scmp.lt.s32.totalorder %s7364_s8, %s7364_s8 }
 0xc1d   :  { %5979 = vmatprep.subr.bf16.mxu0 %v9355_v57  ;;  %6213 = vmatprep.subr.bf16.mxu1 %v9358_v58  ;;  %p9766_p2 = scmp.ne.s32.totalorder %s7364_s8, %s9765_s13  ;;  %p9771_p4 = scmp.lt.s32.totalorder %s9765_s13, %s9765_s13 }
 0xc1f   :  { %p9772_p5 = por %p9771_p4, %p9770_p3 }
 0xc20   :  { %5980 = vmatpush1.bf16.msra.mxu0 %v9353_v63  ;;  %6214 = vmatpush1.bf16.msra.mxu1 %v9356_v1 }
 0xc21   :  { %5981 = vmatprep.subr.bf16.mxu0 %v9361_v2  ;;  %6215 = vmatprep.subr.bf16.mxu1 %v9364_v3  ;;  %p9773_p6 = pnand %p9772_p5, %p9766_p2 }
 0xc24   :  { %5982 = vmatpush1.bf16.msra.mxu0 %v9359_v4  ;;  %6216 = vmatpush1.bf16.msra.mxu1 %v9362_v5 }
 0xc25   :  { %7986 = vmatprep.subr.bf16.mxu1 %v9365_v14 }
 0xcba   :  { %v5479_v6 = vpop.f32.mrb[72].mxu0  ;;  %v5750_v7 = vpop.f32.mrb[76].mxu1 }
 0xcbb   :  { %v5755_v8 = vmax.f32 %v5479_v6, %v5750_v7  ;;  %v5481_v9 = vpop.f32.mrb[73].mxu0  ;;  %v5752_v60 = vpop.f32.mrb[77].mxu1  ;;  %v7858_v6 = vld [vmem:[%s10687_s19 + $0x10] sm:$0xff] }
 0xcbc   :  { %v5756_v10 = vmax.f32 %v5481_v9, %v5752_v60  ;;  %v9401_v7 = vld [vmem:[%s10735_s12 + $0x10] sm:$0xff]   ;;  %v9405_v9 = vld [vmem:[%s10735_s12 + $0x20] sm:$0xff]   ;;  %v9407_v60 = vld [vmem:[%s10735_s12 + $0x28] sm:$0xff]  }
 0xcbd   :  { %v5757_v12 = vpack.c.bf16 %v5755_v8, %v5755_v8  ;;  %v9403_v8 = vld [vmem:[%s10735_s12 + $0x18] sm:$0xff]  }
 0xcbe   :  { %v5758_v11 = vpack.c.bf16 %v5756_v10, %v5756_v10 }
 0xcc0   :  { %5983 = vmatprep.mubr.bf16.mxu0 %v5758_v11  ;;  %6217 = vmatprep.mubr.bf16.mxu1 %v5758_v11 }
 0xcc1   :  { %5984 = vmatmul.mubr.bf16.vlgmr.msra.gmra.mrb[76].mxu0 %v5757_v12  ;;  %6218 = vmatmul.mubr.bf16.vlgmr.msra.gmra.mrb[80].mxu1 %v5757_v12 }
 0xcc2   :  { %6304 = vmatprep.mubr.f32.mxu0 %v9830_v13  ;;  %7987 = vmatpush3.bf16.msra.mxu1 %v9367_v15 }
 0xcc3   :  { %7988 = vmatprep.subr.bf16.mxu1 %v9369_v16 }
 0xcc6   :  { %7989 = vmatpush3.bf16.msra.mxu1 %v9371_v17 }
 0xcc7   :  { %7990 = vmatprep.subr.bf16.mxu1 %v9373_v33 }
 0xcca   :  { %7991 = vmatpush3.bf16.msra.mxu1 %v9375_v18 }
 0xccb   :  { %7992 = vmatprep.subr.bf16.mxu1 %v9377_v62 }
 0xcce   :  { %7993 = vmatpush3.bf16.msra.mxu1 %v9379_v19  ;;  %v7859_v19 = vld [vmem:[%s10687_s19 + $0x18] sm:$0xff] }
 0xccf   :  { %7994 = vmatprep.subr.bf16.mxu1 %v9381_v22  ;;  %v6746_v22 = vld [vmem:[%s10687_s19] sm:$0xff] }
 0xcd2   :  { %7995 = vmatpush3.bf16.msra.mxu1 %v9383_v61  ;;  %v6747_v61 = vld [vmem:[%s10687_s19 + $0x8] sm:$0xff] }
 0xcd3   :  { %7996 = vmatprep.subr.bf16.mxu1 %v9385_v23  ;;  %v9398_v23 = vld [vmem:[%s10735_s12 + $0x40] sm:$0xff]  }
 0xcd6   :  { %7997 = vmatpush3.bf16.msra.mxu1 %v9387_v24  ;;  %v9400_v24 = vld [vmem:[%s10735_s12 + $0x48] sm:$0xff]  }
 0xcd7   :  { %7998 = vmatprep.subr.bf16.mxu1 %v9389_v48 }
 0xcda   :  { %7999 = vmatpush3.bf16.msra.mxu1 %v9391_v50 }
 0xcdb   :  { %8000 = vmatprep.subr.bf16.mxu1 %v9393_v52 }
 0xcde   :  { %8001 = vmatpush3.bf16.msra.mxu1 %v9395_v54 }
 0xd94   :  { %v5985_v25 = vpop.f32.mrb[76].mxu0  ;;  %v6219_v26 = vpop.f32.mrb[80].mxu1 }
 0xd95   :  { %v5987_v27 = vpop.f32.mrb[77].mxu0  ;;  %v6221_v0 = vpop.f32.mrb[81].mxu1 }
 0xd96   :  { %v5989_v29 = vpop.f32.mrb[78].mxu0  ;;  %v6223_v30 = vpop.f32.mrb[82].mxu1  ;;  %7788 = vmatprep.subr.msk.mxu0 %vm6233_vm3, %v6221_v0  ;;  %v9408_v0 = vld [vmem:[%s10735_s12 + $0x68] sm:$0xff]  }
 0xd97   :  { %v5990_v32 = vpop.f32.mrb[79].mxu0  ;;  %v6224_v34 = vpop.f32.mrb[83].mxu1  ;;  %7789 = vmatpush1.msk.msra.mxu0 %vm6233_vm3, %v6219_v26  ;;  %v9404_v26 = vld [vmem:[%s10735_s12 + $0x58] sm:$0xff]   ;;  %v9410_v29 = vld [vmem:[%s10735_s12 + $0x70] sm:$0xff]  }
 0xd98   :  { %7790 = vmatmul.mubr.msk.f32.vlgmr.msra.gmra.mrb[74].mxu0 %vm6229_vm4, %v7787_v28  ;;  %7791 = vmatprep.subr.msk.mxu0 %vm6233_vm3, %v5987_v27  ;;  %v9406_v27 = vld [vmem:[%s10735_s12 + $0x60] sm:$0xff]   ;;  %v9409_v28 = vld [vmem:[%s10735_s12 + $0x30] sm:$0xff]   ;;  %v9411_v30 = vld [vmem:[%s10735_s12 + $0x38] sm:$0xff]  }
 0xd99   :  { %7792 = vmatpush1.msk.msra.mxu0 %vm6233_vm3, %v5985_v25  ;;  %6384 = vmatprep.mubr.f32.mxu0 %v9830_v13  ;;  %v9402_v25 = vld [vmem:[%s10735_s12 + $0x50] sm:$0xff]  }
 0xd9a   :  { %8008 = vmatprep.subr.bf16.mxu0 %v9366_v31  ;;  %v9412_v31 = vld [vmem:[%s10735_s12 + $0x78] sm:$0xff]   ;;  %v7864_v32 = vld [vmem:[#allocation25] ss:$0 sm:$0xff]  ;;  %s10736_s12 = sld [smem:[#allocation49_spill]] }
 0xda0   :  { %7793 = vmatmul.mubr.msk.f32.vlgmr.msra.gmra.mrb[74].mxu0 %vm6229_vm4, %v6226_v59  ;;  %v7898_v52 = vld [vmem:[%s10736_s12 + $0x28] sm:$0xff]  ;;  %v7900_v54 = vld [vmem:[%s10736_s12 + $0x38] sm:$0xff] }
 0xda1   :  { %8009 = vmatpush3.bf16.msra.mxu0 %v9368_v35  ;;  %v7137_v55 = vld [vmem:[%s10736_s12 + $0x8] sm:$0xff] }
 0xda2   :  { %8010 = vmatprep.subr.bf16.mxu0 %v9370_v36 }
 0xda5   :  { %8011 = vmatpush3.bf16.msra.mxu0 %v9372_v37 }
 0xda6   :  { %8012 = vmatprep.subr.bf16.mxu0 %v9374_v38 }
 0xda9   :  { %8013 = vmatpush3.bf16.msra.mxu0 %v9376_v40 }
 0xdaa   :  { %8014 = vmatprep.subr.bf16.mxu0 %v9378_v41  ;;  %v7897_v41 = vld [vmem:[%s10736_s12 + $0x20] sm:$0xff] }
 0xdad   :  { %8015 = vmatpush3.bf16.msra.mxu0 %v9380_v43 }
 0xdae   :  { %8016 = vmatprep.subr.bf16.mxu0 %v9382_v44 }
 0xdb1   :  { %8017 = vmatpush3.bf16.msra.mxu0 %v9384_v45 }
 0xdb2   :  { %8018 = vmatprep.subr.bf16.mxu0 %v9386_v46 }
 0xdb5   :  { %8019 = vmatpush3.bf16.msra.mxu0 %v9388_v47 }
 0xdb6   :  { %8020 = vmatprep.subr.bf16.mxu0 %v9390_v49 }
 0xdb9   :  { %8021 = vmatpush3.bf16.msra.mxu0 %v9392_v51 }
 0xdba   :  { %8022 = vmatprep.subr.bf16.mxu0 %v9394_v53  ;;  %v7899_v53 = vld [vmem:[%s10736_s12 + $0x30] sm:$0xff] }
 0xdbd   :  { %8023 = vmatpush3.bf16.msra.mxu0 %v9396_v20  ;;  %v7136_v20 = vld [vmem:[%s10736_s12] sm:$0xff] }
 0xdbe   :  { %8076 = vmatprep.subr.bf16.mxu0 %v9830_v13 }
 0xe73   :  { %v6386_v57 = vpop.f32.mrb[74].mxu0 }
 0xe74   :  { %v6403_v58 = vadd.f32 %v6396_v56, %v6386_v57  ;;  %v6388_v63 = vpop.f32.mrb[75].mxu0  ;;  %v7138_v56 = vld [vmem:[%s10736_s12 + $0x10] sm:$0xff] }
 0xe75   :  { %v6404_v1 = vadd.f32 %v6400_v21, %v6388_v63  ;;  %v7139_v21 = vld [vmem:[%s10736_s12 + $0x18] sm:$0xff]  ;;  %v7909_v57 = vld [vmem:[#allocation26] ss:$0 sm:$0xff] }
 0xe76   :  { %v6405_v2 = vmax.f32 %v6403_v58, 0.0 }
 0xe77   :  { %v6406_v3 = vmax.f32 %v6404_v1, 0.0 }
 0xe78   :  { %v6407_v5 = vpack.c.bf16 %v6405_v2, %v6405_v2 }
 0xe79   :  { %v6408_v4 = vpack.c.bf16 %v6406_v3, %v6406_v3 }
 0xe7b   :  { %6569 = vmatprep.mubr.bf16.mxu1 %v6408_v4  ;;  %6738 = vmatprep.mubr.bf16.mxu0 %v6408_v4 }
 0xe7c   :  { %6570 = vmatmul.mubr.bf16.vlgmr.msra.gmra.mrb[84].mxu1 %v6407_v5  ;;  %6739 = vmatmul.mubr.bf16.vlgmr.msra.gmra.mrb[80].mxu0 %v6407_v5 }
 0xe7d   :  { %8068 = vmatprep.mubr.msk.f32.mxu1 %vm4188_vm2, %v7858_v6  ;;  %8077 = vmatpush3.bf16.msra.mxu0 %v9397_v39 }
 0xe7e   :  { %8078 = vmatprep.subr.bf16.mxu0 %v9830_v13  ;;  %8092 = vmatprep.mubr.msk.bf16.mxu0 %vm9831_vm5, %v9830_v13 }
 0xe81   :  { %8079 = vmatpush3.bf16.msra.mxu0 %v9399_v42 }
 0xe82   :  { %8080 = vmatprep.subr.bf16.mxu0 %v9830_v13 }
 0xe85   :  { %8081 = vmatpush3.bf16.msra.mxu0 %v9401_v7 }
 0xe86   :  { %8082 = vmatprep.subr.bf16.mxu0 %v9830_v13 }
 0xe89   :  { %8083 = vmatpush3.bf16.msra.mxu0 %v9403_v8 }
 0xe8a   :  { %8084 = vmatprep.subr.bf16.mxu0 %v9830_v13 }
 0xe8d   :  { %8085 = vmatpush3.bf16.msra.mxu0 %v9405_v9 }
 0xe8e   :  { %8086 = vmatprep.subr.bf16.mxu0 %v9830_v13 }
 0xe91   :  { %8087 = vmatpush3.bf16.msra.mxu0 %v9407_v60 }
 0xe92   :  { %8088 = vmatprep.subr.bf16.mxu0 %v9830_v13 }
 0xe95   :  { %8089 = vmatpush3.bf16.msra.mxu0 %v9409_v28 }
 0xe96   :  { %8090 = vmatprep.subr.bf16.mxu0 %v9830_v13 }
 0xe99   :  { %8091 = vmatpush3.bf16.msra.mxu0 %v9411_v30 }
 0xf4f   :  { %v8002_v10 = vpop.f32.mrb[84].mxu1  ;;  %v8024_v11 = vpop.f32.mrb[80].mxu0 }
 0xf50   :  { %v8003_v12 = vpop.f32.mrb[85].mxu1  ;;  %v8025_v14 = vpop.f32.mrb[81].mxu0 }
 0xf51   :  { %v8004_v15 = vadd.f32 %v8003_v12, %v8002_v10  ;;  %v8026_v16 = vadd.f32 %v8025_v14, %v8024_v11  ;;  %v8005_v17 = vpop.f32.mrb[86].mxu1  ;;  %v8027_v33 = vpop.f32.mrb[82].mxu0 }
 0xf52   :  { %v8006_v18 = vpop.f32.mrb[87].mxu1  ;;  %v8028_v62 = vpop.f32.mrb[83].mxu0 }
 0xf53   :  { %8066 = vmatprep.subr.mxu1 %v8026_v16 }
 0xf54   :  { %8067 = vmatpush3.msra.mxu1 %v8026_v16 }
 0xf55   :  { %8069 = vmatmul.mubr.msk.f32.vlgmr.msra.gmra.mrb[78].mxu1 %vm4188_vm2, %v7859_v19  ;;  %8071 = vmatprep.subr.mxu1 %v8004_v15 }
 0xf56   :  { %8072 = vmatpush3.msra.mxu1 %v8004_v15  ;;  %8073 = vmatprep.mubr.msk.f32.mxu1 %vm4188_vm2, %v6746_v22 }
 0xf57   :  { %8096 = vmatprep.subr.bf16.mxu1 %v9830_v13 }
 0xf5d   :  { %8074 = vmatmul.mubr.msk.f32.vlgmr.msra.gmra.mrb[78].mxu1 %vm4188_vm2, %v6747_v61 }
 0xf5e   :  { %8097 = vmatpush3.bf16.msra.mxu1 %v9398_v23  ;;  %8112 = vmatprep.mubr.msk.bf16.mxu1 %vm9831_vm5, %v9830_v13 }
 0xf5f   :  { %8098 = vmatprep.subr.bf16.mxu1 %v9830_v13 }
 0xf62   :  { %8099 = vmatpush3.bf16.msra.mxu1 %v9400_v24 }
 0xf63   :  { %8100 = vmatprep.subr.bf16.mxu1 %v9830_v13 }
 0xf66   :  { %8101 = vmatpush3.bf16.msra.mxu1 %v9402_v25 }
 0xf67   :  { %8102 = vmatprep.subr.bf16.mxu1 %v9830_v13 }
 0xf6a   :  { %8103 = vmatpush3.bf16.msra.mxu1 %v9404_v26 }
 0xf6b   :  { %8104 = vmatprep.subr.bf16.mxu1 %v9830_v13 }
 0xf6e   :  { %8105 = vmatpush3.bf16.msra.mxu1 %v9406_v27 }
 0xf6f   :  { %8106 = vmatprep.subr.bf16.mxu1 %v9830_v13 }
 0xf72   :  { %8107 = vmatpush3.bf16.msra.mxu1 %v9408_v0 }
 0xf73   :  { %8108 = vmatprep.subr.bf16.mxu1 %v9830_v13 }
 0xf76   :  { %8109 = vmatpush3.bf16.msra.mxu1 %v9410_v29 }
 0xf77   :  { %8110 = vmatprep.subr.bf16.mxu1 %v9830_v13 }
 0xf7a   :  { %8111 = vmatpush3.bf16.msra.mxu1 %v9412_v31 }
0x1030   :  { %v8075_v34 = vpop.f32.mrb[78].mxu1 }
0x1031   :  { %v6921_v59 = vadd.f32 %v8075_v34, %v7864_v32  ;;  %v6904_v35 = vpop.f32.mrb[79].mxu1 }
0x1032   :  { %v6920_v36 = vadd.f32 %v7864_v32, %v6904_v35 }
0x1033   :  { %v6923_v37 = vmax.f32 %v6921_v59, 0.0 }
0x1034   :  { %v6922_v38 = vmax.f32 %v6920_v36, 0.0 }
0x1036   :  { %v6924_v40 = vpack.c.bf16 %v6923_v37, %v6922_v38 }
0x1038   :  { %8093 = vmatmul.mubr.bf16.vlgmr.msra.gmra.mrb[84].mxu0 %v6924_v40  ;;  %8113 = vmatmul.mubr.bf16.vlgmr.msra.gmra.mrb[88].mxu1 %v6924_v40 }
0x1039   :  { %8120 = vmatprep.mubr.msk.f32.mxu0 %vm307_vm0, %v7897_v41 }
0x110b   :  { %v7023_v43 = vpop.f32.mrb[84].mxu0  ;;  %v7129_v44 = vpop.f32.mrb[88].mxu1 }
0x110c   :  { %v8094_v45 = vpop.f32.mrb[85].mxu0  ;;  %v8114_v13 = vpop.f32.mrb[89].mxu1 }
0x110d   :  { %v7026_v46 = vpop.f32.mrb[86].mxu0  ;;  %v7132_v47 = vpop.f32.mrb[90].mxu1 }
0x110e   :  { %v8780_v48 = vpack.c.bf16 %v7026_v46, %v7023_v43  ;;  %v8776_v49 = vpack.c.bf16 %v7132_v47, %v7129_v44  ;;  %v8095_v50 = vpop.f32.mrb[87].mxu0  ;;  %v8115_v51 = vpop.f32.mrb[91].mxu1 }
0x1110   :  { %8777 = vmatprep.subr.bf16.mxu0 %v8776_v49 }
0x1111   :  { %8779 = vmatpush3.bf16.msra.mxu0 %v8776_v49 }
0x1112   :  { %8781 = vmatprep.subr.bf16.mxu0 %v8780_v48 }
0x1114   :  { %8121 = vmatmul.mubr.msk.f32.vlgmr.msra.gmra.mrb[88].mxu0 %vm307_vm0, %v7898_v52 }
0x1115   :  { %8783 = vmatpush3.bf16.msra.mxu0 %v8780_v48  ;;  %8123 = vmatprep.mubr.msk.f32.mxu0 %vm307_vm0, %v7899_v53 }
0x1118   :  { %8124 = vmatmul.mubr.msk.f32.gmra.mrb[90].mxu0 %vm307_vm0, %v7900_v54 }
0x1119   :  { %8130 = vmatprep.mubr.msk.f32.mxu0 %vm307_vm0, %v7136_v20 }
0x111c   :  { %8131 = vmatmul.mubr.msk.f32.vlgmr.msra.gmra.mrb[88].mxu0 %vm307_vm0, %v7137_v55 }
0x111d   :  { %8133 = vmatprep.mubr.msk.f32.mxu0 %vm307_vm0, %v7138_v56 }
0x1120   :  { %8134 = vmatmul.mubr.msk.f32.gmra.mrb[90].mxu0 %vm307_vm0, %v7139_v21 }
0x11ef   :  { %v8132_v58 = vpop.f32.mrb[88].mxu0 }
0x11f0   :  { %v7347_v63 = vadd.f32 %v8132_v58, %v7909_v57  ;;  %v7320_v1 = vpop.f32.mrb[89].mxu0 }
0x11f1   :  { %v7346_v2 = vadd.f32 %v7909_v57, %v7320_v1 }
0x11f2   :  { %v7351_v3 = vmax.f32 %v7347_v63, 0.0 }
0x11f3   :  { %v7350_v4 = vmax.f32 %v7346_v2, 0.0  ;;  %v8135_v5 = vpop.f32.mrb[90].mxu0 }
0x11f4   :  { %7355 = vst.msk [vmem:[#allocation28 + $0x8] sm:$0xff] %vm307_vm0, %v7351_v3  ;;  %v7349_v6 = vadd.f32 %v8135_v5, %v7909_v57  ;;  %v7330_v39 = vpop.f32.mrb[91].mxu0 }
0x11f5   :  { %7354 = vst.msk [vmem:[#allocation28] sm:$0xff] %vm307_vm0, %v7350_v4  ;;  %v7348_v42 = vadd.f32 %v7909_v57, %v7330_v39 }
0x11f6   :  { %v7353_v7 = vmax.f32 %v7349_v6, 0.0 }
0x11f7   :  { %v7352_v8 = vmax.f32 %v7348_v42, 0.0 }
0x11f8   :  { %7357 = vst.msk [vmem:[#allocation28 + $0x18] sm:$0xff] %vm307_vm0, %v7353_v7 }
0x11f9   :  { %7356 = vst.msk [vmem:[#allocation28 + $0x10] sm:$0xff] %vm307_vm0, %v7352_v8 }
0x11fa   :  { %9776 = shalt.err (!%p9773_p6)
}
0x11fb   :  { %s10737_s26 = sld [smem:[#allocation51_spill]] }
0x1201   :  { %s9777_s27 = scalar_lea.hbm %s10737_s26, 512 }
0x1202   :  { %p9778_p7 = scmp.ne.s32.totalorder %s10737_s26, %s9777_s27  ;;  %p9781_p8 = scmp.lt.u32.totalorder %s9777_s27, %s10737_s26 }
0x1204   :  { %p9783_p9 = pnand %p9781_p8, %p9778_p7 }
0x1206   :  { %9786 = shalt.err (!%p9783_p9)
}
0x1207   :  { %7369 = dma.vmem_to_hbm [thread:$0]  %s7364_s8, 512, %s10737_s26, [#allocation4], %s10727_s29, %s10727_s29, %s10726_s1  }
0x1208   :  { %9805 = dma.done.wait [#allocation4], 512  }
0x1209   :  { %9806 = vsyncadd [#allocation4], 4294966784 }
0x120a   :  { %7373 = vsyncpa [#allocation3], 1 }
0x120b   :  { %7374 = vsyncpa [#allocation6], 1 }
0x120c   :  { %7375 = vsyncpa [#allocation9], 1 }
0x120d   :  { %7376 = vsyncpa [#allocation12], 1 }
0x120e   :  { %7377 = vsyncpa [#allocation15], 1 }
0x120f   :  { %7378 = vsyncpa [#allocation18], 1 }
0x1210   :  { %7379 = vsyncpa [#allocation21], 1 }
0x1211   :  { %7380 = vsyncpa [#allocation24], 1 }
0x1212   :  { %7381 = vsyncpa [#allocation27], 1 }
0x1213   :  { %7382 = vsyncpa [#allocation4], 1 }

</bundles_post_ra>
